<compile_context>
chip_gen: v7x
topology: tpu7x:2x2x1
jax: 0.10.0
libtpu: 0.0.40
codegen_flags: <defaults>
</compile_context>

<pallas_src>
import functools
import math

import jax
import jax.numpy as jnp
from jax.experimental import pallas as pl
from jax.experimental.pallas import tpu as pltpu


def lambda_init_fn(layer_idx):
    # standard Differential-Transformer lambda_init
    return 0.8 - 0.6 * math.exp(-0.3 * (layer_idx - 1))


# ---------------------------------------------------------------------------
# Pallas kernel
# ---------------------------------------------------------------------------

def _spatial_diff_attn_kernel(lam_ref, x_ref, w_ref, g_ref, b_ref, o_ref, *,
                              heads, head_dim, lambda_init, eps, mxu_dtype):
    Gb, N, D = x_ref.shape
    hd = head_dim
    hid = heads * 2 * hd
    A = 2 * heads                                  # number of (head, half) pairs
    lam_full = lam_ref[0]                          # SMEM f32 scalar

    # (1) Fused QKV projection: ONE (Gb*N, D) @ (D, 3*hid) MXU matmul.
    #     x is cast to the MXU dtype per tile here (no wrapper-side HBM pass);
    #     the softmax scale is already folded into the Wq columns.
    x2 = x_ref[...].astype(mxu_dtype).reshape(Gb * N, D)
    qkv = jnp.dot(x2, w_ref[...], preferred_element_type=jnp.float32)
    qkv = qkv.reshape(Gb, N, 3 * hid)              # f32

    q = qkv[..., 0 * hid:1 * hid]                  # lanes ordered (head, half, hd)
    k = qkv[..., 1 * hid:2 * hid]
    v = qkv[..., 2 * hid:3 * hid]                  # lanes ordered (head, 2*hd)

    # (2) Batch every (head, half) pair into one leading axis -> the score
    #     matmul is ONE batched dot_general (A*Gb instances) instead of
    #     2*heads separate einsums.  Slices below are contiguous lane ranges
    #     because the weight columns were laid out in (head, half, hd) order.
    qs = jnp.concatenate([q[:, :, i * hd:(i + 1) * hd] for i in range(A)], axis=0)
    ks = jnp.concatenate([k[:, :, i * hd:(i + 1) * hd] for i in range(A)], axis=0)
    # qs, ks: (A*Gb, N, hd); batch index = i*Gb + g with i = 2*head + half.
    s = jnp.einsum('bqd,bkd->bqk',
                   qs.astype(mxu_dtype), ks.astype(mxu_dtype),
                   preferred_element_type=jnp.float32)         # (A*Gb, N, N)

    # (3) Softmax in f32; the denominator reciprocal rides the EUP slot.
    m = jnp.max(s, axis=-1, keepdims=True)
    p = jnp.exp(s - m)
    den = jnp.sum(p, axis=-1, keepdims=True)
    p = p * pl.reciprocal(den, approx=True)                    # normalized probs

    # (4) PV: stack the two halves of each head along the query axis so each
    #     head needs ONE (2N, N) @ (N, 2*hd) matmul against its shared V.
    p4 = p.reshape(A, Gb, N, N)                                # free leading split
    p2 = jnp.concatenate(
        [jnp.concatenate([p4[2 * h], p4[2 * h + 1]], axis=1) for h in range(heads)],
        axis=0).astype(mxu_dtype)                              # (heads*Gb, 2N, N)
    vs = jnp.concatenate(
        [v[:, :, 2 * hd * h:2 * hd * (h + 1)] for h in range(heads)],
        axis=0).astype(mxu_dtype)                              # (heads*Gb, N, 2hd)
    o = jnp.einsum('bqk,bkd->bqd', p2, vs,
                   preferred_element_type=jnp.float32)         # (heads*Gb, 2N, 2hd)
    o = o.reshape(heads, Gb, 2 * N, 2 * hd)                    # free leading split
    a1 = o[:, :, :N, :]                                        # (q1,k1) attention
    a2 = o[:, :, N:, :]                                        # (q2,k2) attention

    # (5) Differential combine + LayerNorm(2*hd) + (1 - lambda_init) scale,
    #     applied to ALL heads at once; gamma/beta broadcast hoisted.
    d = a1 - lam_full * a2                                     # (heads, Gb, N, 2hd)
    mu = jnp.mean(d, axis=-1, keepdims=True)
    var = jnp.mean((d - mu) * (d - mu), axis=-1, keepdims=True)
    gamma = g_ref[...].reshape(1, 1, 1, 2 * hd)
    beta = b_ref[...].reshape(1, 1, 1, 2 * hd)
    y = ((d - mu) * jax.lax.rsqrt(var + eps) * gamma + beta) * (1.0 - lambda_init)

    # (6) Lane-dense store: interleave heads back into the PyTorch layout
    #     (..., N, heads*2hd) and fold N into the lane dim so the output block
    #     is a (Gb, N*hid) slab -> full-width stores instead of 32-lane masked
    #     stores.  Done with static slices + lane concat (N, heads are small).
    rows = [y[h, :, n, :] for n in range(N) for h in range(heads)]   # (Gb, 2hd) each
    o_ref[...] = jnp.concatenate(rows, axis=-1).astype(o_ref.dtype)  # (Gb, N*hid)


# ---------------------------------------------------------------------------
# Tiling / VMEM sizing
# ---------------------------------------------------------------------------

def _pick_bt_block(BT, N, D, hid, heads, head_dim):
    """Block size along the fused B*T axis + an explicit scoped-VMEM limit.

    Counts the double-buffered input/output tiles plus the real in-kernel
    intermediates (qkv, stacked q/k/v operands, (2*heads,N,N) score/prob
    arrays, attention outputs).  The budget is derived from the actual chip
    (128 MiB VMEM on v5e/v6e, 64 MiB on v7x)."""
    try:
        cap = int(pltpu.get_tpu_info().vmem_capacity_bytes)
    except Exception:                      # conservative fallback = v7x
        cap = 64 * 1024 * 1024
    per_bt = 4 * (2 * N * D                       # x tile, double-buffered
                  + 2 * N * hid                   # output slab, double-buffered
                  + 4 * N * hid                   # qkv + stacked q/k/v copies
                  + 6 * heads * N * N             # scores, probs, stacked probs
                  + 6 * heads * N * 2 * head_dim) # o, a1/a2, d, LN temps
    budget = cap // 4                             # generous headroom
    g = max(1, min(BT, budget // max(per_bt, 1)))
    g = min(g, 128)                               # keep batched-matmul unroll sane
    if BT > 8:
        g = min(g, max(8, BT // 2))               # >=2 grid steps: feeds both v7x TCs
        g = max(8, (g // 8) * 8)                  # 8-sublane aligned output block
    vmem_limit = int(min(cap - (8 << 20),
                         max(32 << 20, 2 * g * per_bt + (8 << 20))))
    return g, vmem_limit


# ---------------------------------------------------------------------------
# Wrapper: one pallas_call for the whole forward
# ---------------------------------------------------------------------------

def spatial_diff_attn_forward(params, x, *, heads, head_dim, lambda_init,
                              eps=1e-5, mxu_dtype=jnp.bfloat16, bt_block=None):
    """x: (B, T, N, D) -> (B, T, N, heads * 2 * head_dim).  One pallas_call."""
    B, T, N, D = x.shape
    hd = head_dim
    hid = heads * 2 * hd
    BT = B * T
    scale = float(hd) ** -0.5

    # One-time weight prep (tiny constants):
    #   * Wq|Wk|Wv concatenated -> ONE projection matmul in the kernel.
    #   * softmax scale folded into the Wq columns (no per-score VPU multiply).
    #   * cast to bf16 here; x itself is NOT pre-cast (cast per tile in-kernel).
    w_cat = jnp.concatenate([params["Wq"] * scale, params["Wk"], params["Wv"]],
                            axis=1).astype(mxu_dtype)            # (D, 3*hid)

    lam1 = jnp.exp(jnp.sum(params["lambda_q1"] * params["lambda_k1"]))
    lam2 = jnp.exp(jnp.sum(params["lambda_q2"] * params["lambda_k2"]))
    lam_full = (lam1 - lam2 + lambda_init).astype(jnp.float32).reshape(1)

    gamma = params["ln_gamma"].astype(jnp.float32).reshape(1, 2 * hd)
    beta = params["ln_beta"].astype(jnp.float32).reshape(1, 2 * hd)

    auto_block, vmem_limit = _pick_bt_block(BT, N, D, hid, heads, hd)
    if bt_block is None:
        bt_block = auto_block

    # Pad B*T up to a block multiple (instead of shrinking to tiny divisors).
    num_blocks = pl.cdiv(BT, bt_block)
    BT_pad = num_blocks * bt_block
    x3 = x.reshape(BT, N, D)
    if BT_pad != BT:
        x3 = jnp.pad(x3, ((0, BT_pad - BT), (0, 0), (0, 0)))
    grid = (num_blocks,)

    kern = functools.partial(
        _spatial_diff_attn_kernel,
        heads=heads, head_dim=hd,
        lambda_init=float(lambda_init), eps=float(eps), mxu_dtype=mxu_dtype)

    out = pl.pallas_call(
        kern,
        out_shape=jax.ShapeDtypeStruct((BT_pad, N * hid), jnp.float32),
        grid=grid,
        in_specs=[
            pl.BlockSpec(memory_space=pltpu.MemorySpace.SMEM),        # lambda_full
            pl.BlockSpec((bt_block, N, D), lambda i: (i, 0, 0)),      # x (native f32)
            pl.BlockSpec((D, 3 * hid), lambda i: (0, 0)),             # W_qkv, resident
            pl.BlockSpec((1, 2 * hd), lambda i: (0, 0)),              # LN gamma
            pl.BlockSpec((1, 2 * hd), lambda i: (0, 0)),              # LN beta
        ],
        out_specs=pl.BlockSpec((bt_block, N * hid), lambda i: (i, 0)),
        compiler_params=pltpu.CompilerParams(
            dimension_semantics=("parallel",),
            vmem_limit_bytes=int(vmem_limit)),
    )(lam_full, x3, w_cat, gamma, beta)

    # TODO(synk): out_drop (nn.Dropout(attn_drop)) omitted — identity for
    # attn_drop=0.0 / eval mode.
    return out[:BT].reshape(B, T, N, hid)


# ---------------------------------------------------------------------------
# Independent pure-JAX reference: a direct translation of the PyTorch forward
# (per-head loop, explicit softmax / LayerNorm — shares NO helper with the
# kernel).  Matmuls run at the same precision the kernel deliberately uses
# (bf16 in / f32 accumulate, mirroring the fp16 flash-attn in the original
# module), so the comparison tolerance stays tight.
# ---------------------------------------------------------------------------

def spatial_diff_attn_ref(params, x, *, heads, head_dim, lambda_init,
                          eps=1e-5, mxu_dtype=jnp.bfloat16):
    B, T, N, D = x.shape
    hd = head_dim
    hid = heads * 2 * hd
    scale = float(hd) ** -0.5

    xb = x.reshape(B * T, N, D).astype(mxu_dtype)

    def conv1x1(w):            # 1x1 Conv2d(bias=False) == per-position matmul
        return jnp.einsum('gnd,dc->gnc', xb, w.astype(mxu_dtype),
                          preferred_element_type=jnp.float32)

    q = conv1x1(params["Wq"])                  # (BT, N, hid) f32
    k = conv1x1(params["Wk"])
    v = conv1x1(params["Wv"])

    lam1 = jnp.exp(jnp.sum(params["lambda_q1"] * params["lambda_k1"]))
    lam2 = jnp.exp(jnp.sum(params["lambda_q2"] * params["lambda_k2"]))
    lam_full = lam1 - lam2 + lambda_init

    outs = []
    for h in range(heads):
        sl = slice(h * 2 * hd, (h + 1) * 2 * hd)
        qh, kh, vh = q[..., sl], k[..., sl], v[..., sl]
        q1, q2 = qh[..., :hd], qh[..., hd:]
        k1, k2 = kh[..., :hd], kh[..., hd:]
        vb = vh.astype(mxu_dtype)              # flash_attn_func(...) runs in half

        def attn(qq, kk):
            ss = jnp.einsum('gqd,gkd->gqk',
                            (qq * scale).astype(mxu_dtype), kk.astype(mxu_dtype),
                            preferred_element_type=jnp.float32)
            pp = jax.nn.softmax(ss, axis=-1)
            return jnp.einsum('gqk,gkd->gqd', pp, vb,
                              preferred_element_type=jnp.float32)

        a1 = attn(q1, k1)      # == cat(flash(q1,k1,v1), flash(q1,k1,v2))
        a2 = attn(q2, k2)
        dh = a1 - lam_full * a2
        mu = jnp.mean(dh, axis=-1, keepdims=True)
        var = jnp.mean((dh - mu) ** 2, axis=-1, keepdims=True)
        yh = (dh - mu) * jax.lax.rsqrt(var + eps)
        yh = yh * params["ln_gamma"].reshape(1, 1, 2 * hd) \
             + params["ln_beta"].reshape(1, 1, 2 * hd)
        outs.append(yh * (1.0 - lambda_init))
    out = jnp.concatenate(outs, axis=-1)       # head-major, matches PyTorch reshape
    return out.reshape(B, T, N, hid)


# ---------------------------------------------------------------------------
# Main
# ---------------------------------------------------------------------------

if __name__ == "__main__":
    B, T, N, D = 2, 8, 16, 64          # x: (B, T, N, D); q_dim = kv_dim = D
    hid_dim, heads = 32, 2
    head_dim = hid_dim // heads // 2   # = 8, as in the PyTorch module
    layer_idx = 1
    lam_init = lambda_init_fn(layer_idx)

    key = jax.random.PRNGKey(0)
    ks = jax.random.split(key, 8)
    params = {
        # Conv2d weight W[out, in, 1, 1] stored transposed as (in, out).
        "Wq": 0.05 * jax.random.normal(ks[0], (D, hid_dim), jnp.float32),
        "Wk": 0.05 * jax.random.normal(ks[1], (D, hid_dim), jnp.float32),
        "Wv": 0.05 * jax.random.normal(ks[2], (D, hid_dim), jnp.float32),
        "lambda_q1": 0.1 * jax.random.normal(ks[3], (head_dim,), jnp.float32),
        "lambda_k1": 0.1 * jax.random.normal(ks[4], (head_dim,), jnp.float32),
        "lambda_q2": 0.1 * jax.random.normal(ks[5], (head_dim,), jnp.float32),
        "lambda_k2": 0.1 * jax.random.normal(ks[6], (head_dim,), jnp.float32),
        "ln_gamma": jnp.ones((2 * head_dim,), jnp.float32),
        "ln_beta": jnp.zeros((2 * head_dim,), jnp.float32),
    }
    x = jax.random.normal(ks[7], (B, T, N, D), jnp.float32)

    fwd = jax.jit(functools.partial(
        spatial_diff_attn_forward,
        heads=heads, head_dim=head_dim, lambda_init=lam_init))
    out = jax.block_until_ready(fwd(params, x))

    ref = jax.block_until_ready(
        spatial_diff_attn_ref(params, x, heads=heads, head_dim=head_dim,
                              lambda_init=lam_init))

    assert out.shape == (B, T, N, hid_dim), out.shape
    assert bool(jnp.all(jnp.isfinite(out)))
    max_err = float(jnp.max(jnp.abs(out - ref)))
    # bf16 matmuls + approx reciprocal vs the independent reference.
    assert max_err < 2.5e-2, f"mismatch vs reference: {max_err}"
    print("KERNEL_OK")
</pallas_src>

<mosaic_0001>
module attributes {stable_mosaic.version = 11 : i64} {
  func.func @_spatial_diff_attn_kernel(%arg0: i32, %arg1: memref<1xf32, #tpu.memory_space<smem>>, %arg2: memref<8x16x64xf32, #tpu.memory_space<vmem>>, %arg3: memref<64x96xbf16, #tpu.memory_space<vmem>>, %arg4: memref<1x16xf32, #tpu.memory_space<vmem>>, %arg5: memref<1x16xf32, #tpu.memory_space<vmem>>, %arg6: memref<8x512xf32, #tpu.memory_space<vmem>>) attributes {dimension_semantics = [#tpu.dimension_semantics<parallel>], iteration_bounds = array<i64: 2>, scalar_prefetch = 0 : i64, scratch_operands = 0 : i64, tpu.core_type = #tpu.core_type<tc>, window_params = [{transform_indices = @transform_0, window_bounds = array<i64: 1>}, {transform_indices = @transform_1, window_bounds = array<i64: 8, 16, 64>}, {pipeline_mode = #tpu.pipeline_mode<synchronous>, transform_indices = @transform_2, window_bounds = array<i64: 64, 96>}, {pipeline_mode = #tpu.pipeline_mode<synchronous>, transform_indices = @transform_3, window_bounds = array<i64: 1, 16>}, {pipeline_mode = #tpu.pipeline_mode<synchronous>, transform_indices = @transform_4, window_bounds = array<i64: 1, 16>}, {transform_indices = @transform_5, window_bounds = array<i64: 8, 512>}]} {
    %c0 = arith.constant 0 : index
    %0 = memref.load %arg1[%c0] : memref<1xf32, #tpu.memory_space<smem>>
    %c0_0 = arith.constant 0 : index
    %c0_1 = arith.constant 0 : index
    %c0_2 = arith.constant 0 : index
    %1 = vector.load %arg2[%c0_0, %c0_1, %c0_2] : memref<8x16x64xf32, #tpu.memory_space<vmem>>, vector<8x16x64xf32>
    %2 = arith.truncf %1 : vector<8x16x64xf32> to vector<8x16x64xbf16>
    %3 = vector.shape_cast %2 : vector<8x16x64xbf16> to vector<128x64xbf16>
    %c0_3 = arith.constant 0 : index
    %c0_4 = arith.constant 0 : index
    %4 = vector.load %arg3[%c0_3, %c0_4] : memref<64x96xbf16, #tpu.memory_space<vmem>>, vector<64x96xbf16>
    %cst = arith.constant dense<0.000000e+00> : vector<128x96xf32>
    %5 = tpu.matmul %3, %4, %cst {dimension_numbers = #tpu.dot_dimension_numbers<[1], [0], [0], [1], [0, 0, 1, 1], [], []>} : vector<128x64xbf16>, vector<64x96xbf16>, vector<128x96xf32> -> vector<128x96xf32>
    %6 = vector.shape_cast %5 : vector<128x96xf32> to vector<8x16x96xf32>
    %7 = vector.extract_strided_slice %6 {offsets = [0, 0, 0], sizes = [8, 16, 32], strides = [1, 1, 1]} : vector<8x16x96xf32> to vector<8x16x32xf32>
    %8 = vector.extract_strided_slice %6 {offsets = [0, 0, 32], sizes = [8, 16, 32], strides = [1, 1, 1]} : vector<8x16x96xf32> to vector<8x16x32xf32>
    %9 = vector.extract_strided_slice %6 {offsets = [0, 0, 64], sizes = [8, 16, 32], strides = [1, 1, 1]} : vector<8x16x96xf32> to vector<8x16x32xf32>
    %10 = vector.extract_strided_slice %7 {offsets = [0, 0, 0], sizes = [8, 16, 8], strides = [1, 1, 1]} : vector<8x16x32xf32> to vector<8x16x8xf32>
    %11 = vector.extract_strided_slice %7 {offsets = [0, 0, 8], sizes = [8, 16, 8], strides = [1, 1, 1]} : vector<8x16x32xf32> to vector<8x16x8xf32>
    %12 = vector.extract_strided_slice %7 {offsets = [0, 0, 16], sizes = [8, 16, 8], strides = [1, 1, 1]} : vector<8x16x32xf32> to vector<8x16x8xf32>
    %13 = vector.extract_strided_slice %7 {offsets = [0, 0, 24], sizes = [8, 16, 8], strides = [1, 1, 1]} : vector<8x16x32xf32> to vector<8x16x8xf32>
    %14 = tpu.concatenate %10, %11, %12, %13 in 0 : vector<8x16x8xf32>, vector<8x16x8xf32>, vector<8x16x8xf32>, vector<8x16x8xf32> -> vector<32x16x8xf32>
    %15 = vector.extract_strided_slice %8 {offsets = [0, 0, 0], sizes = [8, 16, 8], strides = [1, 1, 1]} : vector<8x16x32xf32> to vector<8x16x8xf32>
    %16 = vector.extract_strided_slice %8 {offsets = [0, 0, 8], sizes = [8, 16, 8], strides = [1, 1, 1]} : vector<8x16x32xf32> to vector<8x16x8xf32>
    %17 = vector.extract_strided_slice %8 {offsets = [0, 0, 16], sizes = [8, 16, 8], strides = [1, 1, 1]} : vector<8x16x32xf32> to vector<8x16x8xf32>
    %18 = vector.extract_strided_slice %8 {offsets = [0, 0, 24], sizes = [8, 16, 8], strides = [1, 1, 1]} : vector<8x16x32xf32> to vector<8x16x8xf32>
    %19 = tpu.concatenate %15, %16, %17, %18 in 0 : vector<8x16x8xf32>, vector<8x16x8xf32>, vector<8x16x8xf32>, vector<8x16x8xf32> -> vector<32x16x8xf32>
    %20 = arith.truncf %14 : vector<32x16x8xf32> to vector<32x16x8xbf16>
    %21 = arith.truncf %19 : vector<32x16x8xf32> to vector<32x16x8xbf16>
    "tpu.trace_start"() <{level = 10 : i32, message = "bqd,bkd->bqk"}> : () -> ()
    %cst_5 = arith.constant dense<0.000000e+00> : vector<32x16x16xf32>
    %22 = tpu.matmul %20, %21, %cst_5 {dimension_numbers = #tpu.dot_dimension_numbers<[2], [2], [1], [1], [0, 0, 0, 1, 1, 1], [0], [0]>} : vector<32x16x8xbf16>, vector<32x16x8xbf16>, vector<32x16x16xf32> -> vector<32x16x16xf32>
    "tpu.trace_stop"() : () -> ()
    %cst_6 = arith.constant dense<0xFF800000> : vector<32x16xf32>
    %23 = vector.multi_reduction <maximumf>, %22, %cst_6 [2] : vector<32x16x16xf32> to vector<32x16xf32>
    %24 = vector.shape_cast %23 : vector<32x16xf32> to vector<32x16x1xf32>
    %25 = vector.broadcast %24 : vector<32x16x1xf32> to vector<32x16x16xf32>
    %26 = arith.subf %22, %25 : vector<32x16x16xf32>
    %27 = math.exp %26 : vector<32x16x16xf32>
    %cst_7 = arith.constant dense<0.000000e+00> : vector<32x16xf32>
    %28 = vector.multi_reduction <add>, %27, %cst_7 [2] : vector<32x16x16xf32> to vector<32x16xf32>
    %29 = vector.shape_cast %28 : vector<32x16xf32> to vector<32x16x1xf32>
    %30 = tpu.reciprocal %29 {approx = true} : vector<32x16x1xf32> -> vector<32x16x1xf32>
    %31 = vector.broadcast %30 : vector<32x16x1xf32> to vector<32x16x16xf32>
    %32 = arith.mulf %27, %31 : vector<32x16x16xf32>
    %33 = vector.shape_cast %32 : vector<32x16x16xf32> to vector<4x8x16x16xf32>
    %34 = vector.extract_strided_slice %33 {offsets = [0, 0, 0, 0], sizes = [1, 8, 16, 16], strides = [1, 1, 1, 1]} : vector<4x8x16x16xf32> to vector<1x8x16x16xf32>
    %35 = vector.shape_cast %34 : vector<1x8x16x16xf32> to vector<8x16x16xf32>
    %36 = vector.extract_strided_slice %33 {offsets = [1, 0, 0, 0], sizes = [1, 8, 16, 16], strides = [1, 1, 1, 1]} : vector<4x8x16x16xf32> to vector<1x8x16x16xf32>
    %37 = vector.shape_cast %36 : vector<1x8x16x16xf32> to vector<8x16x16xf32>
    %38 = tpu.concatenate %35, %37 in 1 : vector<8x16x16xf32>, vector<8x16x16xf32> -> vector<8x32x16xf32>
    %39 = vector.extract_strided_slice %33 {offsets = [2, 0, 0, 0], sizes = [1, 8, 16, 16], strides = [1, 1, 1, 1]} : vector<4x8x16x16xf32> to vector<1x8x16x16xf32>
    %40 = vector.shape_cast %39 : vector<1x8x16x16xf32> to vector<8x16x16xf32>
    %41 = vector.extract_strided_slice %33 {offsets = [3, 0, 0, 0], sizes = [1, 8, 16, 16], strides = [1, 1, 1, 1]} : vector<4x8x16x16xf32> to vector<1x8x16x16xf32>
    %42 = vector.shape_cast %41 : vector<1x8x16x16xf32> to vector<8x16x16xf32>
    %43 = tpu.concatenate %40, %42 in 1 : vector<8x16x16xf32>, vector<8x16x16xf32> -> vector<8x32x16xf32>
    %44 = tpu.concatenate %38, %43 in 0 : vector<8x32x16xf32>, vector<8x32x16xf32> -> vector<16x32x16xf32>
    %45 = arith.truncf %44 : vector<16x32x16xf32> to vector<16x32x16xbf16>
    %46 = vector.extract_strided_slice %9 {offsets = [0, 0, 0], sizes = [8, 16, 16], strides = [1, 1, 1]} : vector<8x16x32xf32> to vector<8x16x16xf32>
    %47 = vector.extract_strided_slice %9 {offsets = [0, 0, 16], sizes = [8, 16, 16], strides = [1, 1, 1]} : vector<8x16x32xf32> to vector<8x16x16xf32>
    %48 = tpu.concatenate %46, %47 in 0 : vector<8x16x16xf32>, vector<8x16x16xf32> -> vector<16x16x16xf32>
    %49 = arith.truncf %48 : vector<16x16x16xf32> to vector<16x16x16xbf16>
    "tpu.trace_start"() <{level = 10 : i32, message = "bqk,bkd->bqd"}> : () -> ()
    %cst_8 = arith.constant dense<0.000000e+00> : vector<16x32x16xf32>
    %50 = tpu.matmul %45, %49, %cst_8 {dimension_numbers = #tpu.dot_dimension_numbers<[2], [1], [1], [2], [0, 0, 0, 1, 1, 2], [0], [0]>} : vector<16x32x16xbf16>, vector<16x16x16xbf16>, vector<16x32x16xf32> -> vector<16x32x16xf32>
    "tpu.trace_stop"() : () -> ()
    %51 = vector.shape_cast %50 : vector<16x32x16xf32> to vector<2x8x32x16xf32>
    %52 = vector.extract_strided_slice %51 {offsets = [0, 0, 0, 0], sizes = [2, 8, 16, 16], strides = [1, 1, 1, 1]} : vector<2x8x32x16xf32> to vector<2x8x16x16xf32>
    %53 = vector.extract_strided_slice %51 {offsets = [0, 0, 16, 0], sizes = [2, 8, 16, 16], strides = [1, 1, 1, 1]} : vector<2x8x32x16xf32> to vector<2x8x16x16xf32>
    %54 = vector.broadcast %0 : f32 to vector<2x8x16x16xf32>
    %55 = arith.mulf %54, %53 : vector<2x8x16x16xf32>
    %56 = arith.subf %52, %55 : vector<2x8x16x16xf32>
    %cst_9 = arith.constant dense<0.000000e+00> : vector<2x8x16xf32>
    %57 = vector.multi_reduction <add>, %56, %cst_9 [3] : vector<2x8x16x16xf32> to vector<2x8x16xf32>
    %58 = vector.shape_cast %57 : vector<2x8x16xf32> to vector<2x8x16x1xf32>
    %cst_10 = arith.constant 1.600000e+01 : f32
    %59 = vector.broadcast %cst_10 : f32 to vector<2x8x16x1xf32>
    %60 = arith.divf %58, %59 : vector<2x8x16x1xf32>
    %61 = vector.broadcast %60 : vector<2x8x16x1xf32> to vector<2x8x16x16xf32>
    %62 = arith.subf %56, %61 : vector<2x8x16x16xf32>
    %63 = vector.broadcast %60 : vector<2x8x16x1xf32> to vector<2x8x16x16xf32>
    %64 = arith.subf %56, %63 : vector<2x8x16x16xf32>
    %65 = arith.mulf %62, %64 : vector<2x8x16x16xf32>
    %cst_11 = arith.constant dense<0.000000e+00> : vector<2x8x16xf32>
    %66 = vector.multi_reduction <add>, %65, %cst_11 [3] : vector<2x8x16x16xf32> to vector<2x8x16xf32>
    %67 = vector.shape_cast %66 : vector<2x8x16xf32> to vector<2x8x16x1xf32>
    %cst_12 = arith.constant 1.600000e+01 : f32
    %68 = vector.broadcast %cst_12 : f32 to vector<2x8x16x1xf32>
    %69 = arith.divf %67, %68 : vector<2x8x16x1xf32>
    %c0_13 = arith.constant 0 : index
    %c0_14 = arith.constant 0 : index
    %70 = vector.load %arg4[%c0_13, %c0_14] : memref<1x16xf32, #tpu.memory_space<vmem>>, vector<1x16xf32>
    %71 = vector.shape_cast %70 : vector<1x16xf32> to vector<1x1x1x16xf32>
    %c0_15 = arith.constant 0 : index
    %c0_16 = arith.constant 0 : index
    %72 = vector.load %arg5[%c0_15, %c0_16] : memref<1x16xf32, #tpu.memory_space<vmem>>, vector<1x16xf32>
    %73 = vector.shape_cast %72 : vector<1x16xf32> to vector<1x1x1x16xf32>
    %74 = vector.broadcast %60 : vector<2x8x16x1xf32> to vector<2x8x16x16xf32>
    %75 = arith.subf %56, %74 : vector<2x8x16x16xf32>
    %cst_17 = arith.constant 9.99999974E-6 : f32
    %76 = vector.broadcast %cst_17 : f32 to vector<2x8x16x1xf32>
    %77 = arith.addf %69, %76 : vector<2x8x16x1xf32>
    %78 = math.rsqrt %77 : vector<2x8x16x1xf32>
    %79 = vector.broadcast %78 : vector<2x8x16x1xf32> to vector<2x8x16x16xf32>
    %80 = arith.mulf %75, %79 : vector<2x8x16x16xf32>
    %81 = vector.broadcast %71 : vector<1x1x1x16xf32> to vector<2x8x16x16xf32>
    %82 = arith.mulf %80, %81 : vector<2x8x16x16xf32>
    %83 = vector.broadcast %73 : vector<1x1x1x16xf32> to vector<2x8x16x16xf32>
    %84 = arith.addf %82, %83 : vector<2x8x16x16xf32>
    %cst_18 = arith.constant 8.000000e-01 : f32
    %85 = vector.broadcast %cst_18 : f32 to vector<2x8x16x16xf32>
    %86 = arith.mulf %84, %85 : vector<2x8x16x16xf32>
    %87 = vector.extract_strided_slice %86 {offsets = [0, 0, 0, 0], sizes = [1, 8, 1, 16], strides = [1, 1, 1, 1]} : vector<2x8x16x16xf32> to vector<1x8x1x16xf32>
    %88 = vector.shape_cast %87 : vector<1x8x1x16xf32> to vector<8x16xf32>
    %89 = vector.extract_strided_slice %86 {offsets = [1, 0, 0, 0], sizes = [1, 8, 1, 16], strides = [1, 1, 1, 1]} : vector<2x8x16x16xf32> to vector<1x8x1x16xf32>
    %90 = vector.shape_cast %89 : vector<1x8x1x16xf32> to vector<8x16xf32>
    %91 = vector.extract_strided_slice %86 {offsets = [0, 0, 1, 0], sizes = [1, 8, 1, 16], strides = [1, 1, 1, 1]} : vector<2x8x16x16xf32> to vector<1x8x1x16xf32>
    %92 = vector.shape_cast %91 : vector<1x8x1x16xf32> to vector<8x16xf32>
    %93 = vector.extract_strided_slice %86 {offsets = [1, 0, 1, 0], sizes = [1, 8, 1, 16], strides = [1, 1, 1, 1]} : vector<2x8x16x16xf32> to vector<1x8x1x16xf32>
    %94 = vector.shape_cast %93 : vector<1x8x1x16xf32> to vector<8x16xf32>
    %95 = vector.extract_strided_slice %86 {offsets = [0, 0, 2, 0], sizes = [1, 8, 1, 16], strides = [1, 1, 1, 1]} : vector<2x8x16x16xf32> to vector<1x8x1x16xf32>
    %96 = vector.shape_cast %95 : vector<1x8x1x16xf32> to vector<8x16xf32>
    %97 = vector.extract_strided_slice %86 {offsets = [1, 0, 2, 0], sizes = [1, 8, 1, 16], strides = [1, 1, 1, 1]} : vector<2x8x16x16xf32> to vector<1x8x1x16xf32>
    %98 = vector.shape_cast %97 : vector<1x8x1x16xf32> to vector<8x16xf32>
    %99 = vector.extract_strided_slice %86 {offsets = [0, 0, 3, 0], sizes = [1, 8, 1, 16], strides = [1, 1, 1, 1]} : vector<2x8x16x16xf32> to vector<1x8x1x16xf32>
    %100 = vector.shape_cast %99 : vector<1x8x1x16xf32> to vector<8x16xf32>
    %101 = vector.extract_strided_slice %86 {offsets = [1, 0, 3, 0], sizes = [1, 8, 1, 16], strides = [1, 1, 1, 1]} : vector<2x8x16x16xf32> to vector<1x8x1x16xf32>
    %102 = vector.shape_cast %101 : vector<1x8x1x16xf32> to vector<8x16xf32>
    %103 = vector.extract_strided_slice %86 {offsets = [0, 0, 4, 0], sizes = [1, 8, 1, 16], strides = [1, 1, 1, 1]} : vector<2x8x16x16xf32> to vector<1x8x1x16xf32>
    %104 = vector.shape_cast %103 : vector<1x8x1x16xf32> to vector<8x16xf32>
    %105 = vector.extract_strided_slice %86 {offsets = [1, 0, 4, 0], sizes = [1, 8, 1, 16], strides = [1, 1, 1, 1]} : vector<2x8x16x16xf32> to vector<1x8x1x16xf32>
    %106 = vector.shape_cast %105 : vector<1x8x1x16xf32> to vector<8x16xf32>
    %107 = vector.extract_strided_slice %86 {offsets = [0, 0, 5, 0], sizes = [1, 8, 1, 16], strides = [1, 1, 1, 1]} : vector<2x8x16x16xf32> to vector<1x8x1x16xf32>
    %108 = vector.shape_cast %107 : vector<1x8x1x16xf32> to vector<8x16xf32>
    %109 = vector.extract_strided_slice %86 {offsets = [1, 0, 5, 0], sizes = [1, 8, 1, 16], strides = [1, 1, 1, 1]} : vector<2x8x16x16xf32> to vector<1x8x1x16xf32>
    %110 = vector.shape_cast %109 : vector<1x8x1x16xf32> to vector<8x16xf32>
    %111 = vector.extract_strided_slice %86 {offsets = [0, 0, 6, 0], sizes = [1, 8, 1, 16], strides = [1, 1, 1, 1]} : vector<2x8x16x16xf32> to vector<1x8x1x16xf32>
    %112 = vector.shape_cast %111 : vector<1x8x1x16xf32> to vector<8x16xf32>
    %113 = vector.extract_strided_slice %86 {offsets = [1, 0, 6, 0], sizes = [1, 8, 1, 16], strides = [1, 1, 1, 1]} : vector<2x8x16x16xf32> to vector<1x8x1x16xf32>
    %114 = vector.shape_cast %113 : vector<1x8x1x16xf32> to vector<8x16xf32>
    %115 = vector.extract_strided_slice %86 {offsets = [0, 0, 7, 0], sizes = [1, 8, 1, 16], strides = [1, 1, 1, 1]} : vector<2x8x16x16xf32> to vector<1x8x1x16xf32>
    %116 = vector.shape_cast %115 : vector<1x8x1x16xf32> to vector<8x16xf32>
    %117 = vector.extract_strided_slice %86 {offsets = [1, 0, 7, 0], sizes = [1, 8, 1, 16], strides = [1, 1, 1, 1]} : vector<2x8x16x16xf32> to vector<1x8x1x16xf32>
    %118 = vector.shape_cast %117 : vector<1x8x1x16xf32> to vector<8x16xf32>
    %119 = vector.extract_strided_slice %86 {offsets = [0, 0, 8, 0], sizes = [1, 8, 1, 16], strides = [1, 1, 1, 1]} : vector<2x8x16x16xf32> to vector<1x8x1x16xf32>
    %120 = vector.shape_cast %119 : vector<1x8x1x16xf32> to vector<8x16xf32>
    %121 = vector.extract_strided_slice %86 {offsets = [1, 0, 8, 0], sizes = [1, 8, 1, 16], strides = [1, 1, 1, 1]} : vector<2x8x16x16xf32> to vector<1x8x1x16xf32>
    %122 = vector.shape_cast %121 : vector<1x8x1x16xf32> to vector<8x16xf32>
    %123 = vector.extract_strided_slice %86 {offsets = [0, 0, 9, 0], sizes = [1, 8, 1, 16], strides = [1, 1, 1, 1]} : vector<2x8x16x16xf32> to vector<1x8x1x16xf32>
    %124 = vector.shape_cast %123 : vector<1x8x1x16xf32> to vector<8x16xf32>
    %125 = vector.extract_strided_slice %86 {offsets = [1, 0, 9, 0], sizes = [1, 8, 1, 16], strides = [1, 1, 1, 1]} : vector<2x8x16x16xf32> to vector<1x8x1x16xf32>
    %126 = vector.shape_cast %125 : vector<1x8x1x16xf32> to vector<8x16xf32>
    %127 = vector.extract_strided_slice %86 {offsets = [0, 0, 10, 0], sizes = [1, 8, 1, 16], strides = [1, 1, 1, 1]} : vector<2x8x16x16xf32> to vector<1x8x1x16xf32>
    %128 = vector.shape_cast %127 : vector<1x8x1x16xf32> to vector<8x16xf32>
    %129 = vector.extract_strided_slice %86 {offsets = [1, 0, 10, 0], sizes = [1, 8, 1, 16], strides = [1, 1, 1, 1]} : vector<2x8x16x16xf32> to vector<1x8x1x16xf32>
    %130 = vector.shape_cast %129 : vector<1x8x1x16xf32> to vector<8x16xf32>
    %131 = vector.extract_strided_slice %86 {offsets = [0, 0, 11, 0], sizes = [1, 8, 1, 16], strides = [1, 1, 1, 1]} : vector<2x8x16x16xf32> to vector<1x8x1x16xf32>
    %132 = vector.shape_cast %131 : vector<1x8x1x16xf32> to vector<8x16xf32>
    %133 = vector.extract_strided_slice %86 {offsets = [1, 0, 11, 0], sizes = [1, 8, 1, 16], strides = [1, 1, 1, 1]} : vector<2x8x16x16xf32> to vector<1x8x1x16xf32>
    %134 = vector.shape_cast %133 : vector<1x8x1x16xf32> to vector<8x16xf32>
    %135 = vector.extract_strided_slice %86 {offsets = [0, 0, 12, 0], sizes = [1, 8, 1, 16], strides = [1, 1, 1, 1]} : vector<2x8x16x16xf32> to vector<1x8x1x16xf32>
    %136 = vector.shape_cast %135 : vector<1x8x1x16xf32> to vector<8x16xf32>
    %137 = vector.extract_strided_slice %86 {offsets = [1, 0, 12, 0], sizes = [1, 8, 1, 16], strides = [1, 1, 1, 1]} : vector<2x8x16x16xf32> to vector<1x8x1x16xf32>
    %138 = vector.shape_cast %137 : vector<1x8x1x16xf32> to vector<8x16xf32>
    %139 = vector.extract_strided_slice %86 {offsets = [0, 0, 13, 0], sizes = [1, 8, 1, 16], strides = [1, 1, 1, 1]} : vector<2x8x16x16xf32> to vector<1x8x1x16xf32>
    %140 = vector.shape_cast %139 : vector<1x8x1x16xf32> to vector<8x16xf32>
    %141 = vector.extract_strided_slice %86 {offsets = [1, 0, 13, 0], sizes = [1, 8, 1, 16], strides = [1, 1, 1, 1]} : vector<2x8x16x16xf32> to vector<1x8x1x16xf32>
    %142 = vector.shape_cast %141 : vector<1x8x1x16xf32> to vector<8x16xf32>
    %143 = vector.extract_strided_slice %86 {offsets = [0, 0, 14, 0], sizes = [1, 8, 1, 16], strides = [1, 1, 1, 1]} : vector<2x8x16x16xf32> to vector<1x8x1x16xf32>
    %144 = vector.shape_cast %143 : vector<1x8x1x16xf32> to vector<8x16xf32>
    %145 = vector.extract_strided_slice %86 {offsets = [1, 0, 14, 0], sizes = [1, 8, 1, 16], strides = [1, 1, 1, 1]} : vector<2x8x16x16xf32> to vector<1x8x1x16xf32>
    %146 = vector.shape_cast %145 : vector<1x8x1x16xf32> to vector<8x16xf32>
    %147 = vector.extract_strided_slice %86 {offsets = [0, 0, 15, 0], sizes = [1, 8, 1, 16], strides = [1, 1, 1, 1]} : vector<2x8x16x16xf32> to vector<1x8x1x16xf32>
    %148 = vector.shape_cast %147 : vector<1x8x1x16xf32> to vector<8x16xf32>
    %149 = vector.extract_strided_slice %86 {offsets = [1, 0, 15, 0], sizes = [1, 8, 1, 16], strides = [1, 1, 1, 1]} : vector<2x8x16x16xf32> to vector<1x8x1x16xf32>
    %150 = vector.shape_cast %149 : vector<1x8x1x16xf32> to vector<8x16xf32>
    %151 = tpu.concatenate %88, %90, %92, %94, %96, %98, %100, %102, %104, %106, %108, %110, %112, %114, %116, %118 in 1 : vector<8x16xf32>, vector<8x16xf32>, vector<8x16xf32>, vector<8x16xf32>, vector<8x16xf32>, vector<8x16xf32>, vector<8x16xf32>, vector<8x16xf32>, vector<8x16xf32>, vector<8x16xf32>, vector<8x16xf32>, vector<8x16xf32>, vector<8x16xf32>, vector<8x16xf32>, vector<8x16xf32>, vector<8x16xf32> -> vector<8x256xf32>
    %152 = tpu.concatenate %120, %122, %124, %126, %128, %130, %132, %134, %136, %138, %140, %142, %144, %146, %148, %150 in 1 : vector<8x16xf32>, vector<8x16xf32>, vector<8x16xf32>, vector<8x16xf32>, vector<8x16xf32>, vector<8x16xf32>, vector<8x16xf32>, vector<8x16xf32>, vector<8x16xf32>, vector<8x16xf32>, vector<8x16xf32>, vector<8x16xf32>, vector<8x16xf32>, vector<8x16xf32>, vector<8x16xf32>, vector<8x16xf32> -> vector<8x256xf32>
    %153 = tpu.concatenate %151, %152 in 1 : vector<8x256xf32>, vector<8x256xf32> -> vector<8x512xf32>
    %c0_19 = arith.constant 0 : index
    %c0_20 = arith.constant 0 : index
    %154 = vector.load %arg6[%c0_19, %c0_20] : memref<8x512xf32, #tpu.memory_space<vmem>>, vector<8x512xf32>
    tpu.vector_store %arg6[%c0_19, %c0_20], %153 {strides = array<i32>} : memref<8x512xf32, #tpu.memory_space<vmem>>, vector<8x512xf32>,
    return
  }
  func.func @transform_0(%arg0: i32) -> i32 {
    %c0_i32 = arith.constant 0 : i32
    %c0_i32_0 = arith.constant 0 : i32
    return %c0_i32 : i32
  }
  func.func @transform_1(%arg0: i32) -> (i32, i32, i32) {
    %c0_i32 = arith.constant 0 : i32
    %c0_i32_0 = arith.constant 0 : i32
    %c0_i32_1 = arith.constant 0 : i32
    return %arg0, %c0_i32, %c0_i32_0 : i32, i32, i32
  }
  func.func @transform_2(%arg0: i32) -> (i32, i32) {
    %c0_i32 = arith.constant 0 : i32
    %c0_i32_0 = arith.constant 0 : i32
    %c0_i32_1 = arith.constant 0 : i32
    return %c0_i32, %c0_i32_0 : i32, i32
  }
  func.func @transform_3(%arg0: i32) -> (i32, i32) {
    %c0_i32 = arith.constant 0 : i32
    %c0_i32_0 = arith.constant 0 : i32
    %c0_i32_1 = arith.constant 0 : i32
    return %c0_i32, %c0_i32_0 : i32, i32
  }
  func.func @transform_4(%arg0: i32) -> (i32, i32) {
    %c0_i32 = arith.constant 0 : i32
    %c0_i32_0 = arith.constant 0 : i32
    %c0_i32_1 = arith.constant 0 : i32
    return %c0_i32, %c0_i32_0 : i32, i32
  }
  func.func @transform_5(%arg0: i32) -> (i32, i32) {
    %c0_i32 = arith.constant 0 : i32
    %c0_i32_0 = arith.constant 0 : i32
    return %arg0, %c0_i32 : i32, i32
  }
}

</mosaic_0001>

<bundles_post_ra>
// kernel: spatial_diff_attn_forward.1
= control target key start
LH: loop header
LB: loop body
LE: loop exit
PB: predicated region body
PF: predicated region fallthrough
CT: control target
= control target key end

     0   :  { %s6171_s20 = smov 0   ;;  %s8589_s0 = inlined_call_operand.<no memory space> [shape: f32[1], index: 0, kind: input, shape index: {}]   ;;  %s8590_s1 = inlined_call_operand.vmem [shape: f32[16,16,64], index: 1, kind: input, shape index: {}]   ;;  %s8591_s2 = inlined_call_operand.vmem [shape: bf16[64,96], index: 2, kind: input, shape index: {}]   ;;  %s8592_s3 = inlined_call_operand.vmem [shape: f32[1,16], index: 3, kind: input, shape index: {}]   ;;  %s8593_s4 = inlined_call_operand.vmem [shape: f32[1,16], index: 4, kind: input, shape index: {}]   ;;  %s8594_s5 = inlined_call_operand.vmem [shape: f32[16,512], index: 5, kind: output, shape index: {}]  }
   0x1   :  { %10 = sst [smem:[#allocation2]] %s8589_s0 }
   0x2 LB: > { %s6177_s21 = sadd.s32 4294967295, %s6125_s20   ;;  %p5132_p0 = scmp.ge.s32.totalorder %s6125_s20, 1  ;;  %s6125_s20 = sphi %s6171_s20, %s16_s20  }
   0x3   : > { %p190_p1 = scmp.lt.s32.totalorder %s6125_s20, 3 }
   0x5   : > { %p191_p2 = pnand %p5132_p0, %p190_p1 }
   0x7   : > { %194 = sbr.rel (%p191_p2) target bundleno = 1902 (0x76e), region = 40 }
   0xe   : > { %v5795_v0 = vld [vmem:[%s8591_s2] sm:$0xff]   ;;  %s5133_s0 = sshll.u32 %s6177_s21, 3  ;;  %v5796_v1 = vld [vmem:[%s8591_s2 + $0x8] sm:$0xff]   ;;  %v5797_v2 = vld [vmem:[%s8591_s2 + $0x10] sm:$0xff]   ;;  %vm289_vm0 = vcmask 523264   ;;  %v6127_v30 = vmov 0.0  }
   0xf   : > { %p220_p3 = scmp.lt.s32.totalorder %s5133_s0, 15  ;;  %5344 = vmatprep.subr.bf16.mxu0 %v5795_v0  ;;  %v5798_v5 = vld [vmem:[%s8591_s2 + $0x18] sm:$0xff]   ;;  %5368 = vmatprep.subr.bf16.mxu1 %v6127_v30  ;;  %s6128_s9 = smov 120   ;;  %vm6129_vm1 = vmmov 0   ;;  %vm606_vm2 = vcmask 64512   ;;  %vm2204_vm3 = vcmask 130048  }
  0x10   : > { %5345 = vmatpush3.bf16.msra.mxu0 %v5795_v0  ;;  %5370 = vmatprep.mubr.msk.bf16.mxu1 %vm6129_vm1, %v6127_v30  ;;  %s6130_s10 = smov 96   ;;  %s6131_s11 = smov 112   ;;  %vm4470_vm4 = vcmask 1041409   ;;  %vm4473_vm5 = vcmask 1042434   ;;  %vm4476_vm6 = vcmask 1043459   ;;  %vm4479_vm7 = vcmask 1044484  }
  0x11   : > { %s8724_s0 = smov (!%p220_p3, %s5133_s0), 15  ;;  %5346 = vmatprep.subr.bf16.mxu0 %v5796_v1  ;;  %s6132_s12 = smov 104   ;;  %vm4482_vm8 = vcmask 1045509   ;;  %vm4485_vm9 = vcmask 1046534   ;;  %vm4488_vm10 = vcmask 1047559   ;;  %vm4755_vm11 = vcmask 392192  }
  0x12   : > { %s5218_s28 = sshll.u32 %s8724_s0, 4  ;;  %s6133_s13 = smov 64   ;;  %vm4753_vm12 = vcmask 261120   ;;  %vm4758_vm13 = vcmask 654336   ;;  %vm4760_vm14 = vcmask 785408   ;;  %vm4762_vm15 = vcmask 916480  }
  0x13   : > { %s6194_s6 = scalar_lea.vmem %s8590_s1, %s5218_s28  ;;  %s232_s14 = sld [smem:[#allocation2]] }
  0x14   : > { %5347 = vmatpush3.bf16.msra.mxu0 %v5796_v1  ;;  %v233_v3 = vld [vmem:[%s6194_s6] sm:$0xff]  ;;  %v234_v4 = vld [vmem:[%s6194_s6 + $0x8] sm:$0xff]  ;;  %v235_v7 = vld [vmem:[%s6194_s6 + $0x10] sm:$0xff]  ;;  %s6134_s19 = smov 32   ;;  %s6135_s22 = smov 80  }
  0x15   : > { %5348 = vmatprep.subr.bf16.mxu0 %v5797_v2  ;;  %v249_v6 = vpack.c.bf16 %v234_v4, %v233_v3  ;;  %v236_v8 = vld [vmem:[%s6194_s6 + $0x18] sm:$0xff]  ;;  %v237_v9 = vld [vmem:[%s6194_s6 + $0x20] sm:$0xff]  ;;  %v238_v10 = vld [vmem:[%s6194_s6 + $0x28] sm:$0xff]  ;;  %s6136_s23 = smov 16   ;;  %s6137_s0 = smov 48  }
  0x16   : > { %v250_v11 = vpack.c.bf16 %v236_v8, %v235_v7  ;;  %v251_v12 = vpack.c.bf16 %v238_v10, %v237_v9  ;;  %v239_v13 = vld [vmem:[%s6194_s6 + $0x30] sm:$0xff]  ;;  %v240_v14 = vld [vmem:[%s6194_s6 + $0x38] sm:$0xff]  ;;  %v241_v15 = vld [vmem:[%s6194_s6 + $0x40] sm:$0xff]  ;;  %p226_p4 = scmp.lt.s32.totalorder %s6177_s21, 1 }
  0x17   : > { %5352 = vmatprep.mubr.msk.bf16.mxu0 %vm289_vm0, %v249_v6  ;;  %v242_v16 = vld [vmem:[%s6194_s6 + $0x48] sm:$0xff]  ;;  %v252_v17 = vpack.c.bf16 %v240_v14, %v239_v13  ;;  %v243_v19 = vld [vmem:[%s6194_s6 + $0x50] sm:$0xff]  ;;  %v244_v20 = vld [vmem:[%s6194_s6 + $0x58] sm:$0xff] }
  0x18   : > { %5349 = vmatpush3.bf16.msra.mxu0 %v5797_v2  ;;  %v253_v18 = vpack.c.bf16 %v242_v16, %v241_v15  ;;  %v245_v21 = vld [vmem:[%s6194_s6 + $0x60] sm:$0xff]  ;;  %v246_v22 = vld [vmem:[%s6194_s6 + $0x68] sm:$0xff]  ;;  %v254_v23 = vpack.c.bf16 %v244_v20, %v243_v19  ;;  %v247_v25 = vld [vmem:[%s6194_s6 + $0x70] sm:$0xff]  ;;  %s8726_s21 = smov (!%p226_p4, %s6177_s21), 1 }
  0x19   : > { %5350 = vmatprep.subr.bf16.mxu0 %v5798_v5  ;;  %v255_v24 = vpack.c.bf16 %v246_v22, %v245_v21  ;;  %v248_v26 = vld [vmem:[%s6194_s6 + $0x78] sm:$0xff]  ;;  %s5219_s24 = sshll.u32 %s8726_s21, 5 }
  0x1a   : > { %v256_v27 = vpack.c.bf16 %v248_v26, %v247_v25  ;;  %s8559_s27 = scalar_lea.vmem %s8594_s5, %s5219_s24 }
  0x1c   : > { %5351 = vmatpush3.bf16.msra.mxu0 %v5798_v5 }
  0x1d   : > { %5398 = vmatprep.subr.bf16.mxu0 %v6127_v30 }
  0x1f   : > { %5353 = vmatmul.mubr.msk.bf16.vlgmr.msra.gmra.mrb[0].mxu0 %vm289_vm0, %v250_v11 }
  0x20   : > { %5356 = vmatprep.mubr.msk.bf16.mxu0 %vm289_vm0, %v251_v12 }
  0x27   : > { %5357 = vmatmul.mubr.msk.bf16.gmra.mrb[4].mxu0 %vm289_vm0, %v252_v17 }
  0x28   : > { %5360 = vmatprep.mubr.msk.bf16.mxu0 %vm289_vm0, %v253_v18 }
  0x2f   : > { %5361 = vmatmul.mubr.msk.bf16.gmra.mrb[8].mxu0 %vm289_vm0, %v254_v23 }
  0x30   : > { %5364 = vmatprep.mubr.msk.bf16.mxu0 %vm289_vm0, %v255_v24 }
  0x37   : > { %5365 = vmatmul.mubr.msk.bf16.gmra.mrb[12].mxu0 %vm289_vm0, %v256_v27 }
  0x38   : > { %5400 = vmatprep.mubr.msk.bf16.mxu0 %vm6129_vm1, %v6127_v30 }
  0xf2   : > { %v5354_v28 = vpop.f32.mrb[0].mxu0 }
  0xf3   : > { %v348_v29 = vpop.f32.mrb[1].mxu0 }
  0xf4   : > { %v5355_v31 = vpop.f32.mrb[2].mxu0 }
  0xf5   : > { %v351_v32 = vpop.f32.mrb[3].mxu0  ;;  %v6225_v33 = vpack.i.bf16 %v5355_v31, %v5354_v28  ;;  %v6227_v34 = vpack.c.bf16 %v5355_v31, %v5354_v28 }
  0xf6   : > { %v6229_v35 = vpack.i.bf16 %v351_v32, %v348_v29  ;;  %v6231_v36 = vpack.c.bf16 %v351_v32, %v348_v29 }
  0xf8   : > { %5676 = vrot.lane.b32.xlu0 %v6229_v35, %s6128_s9 }
  0xfa   : > { %v5358_v37 = vpop.f32.mrb[4].mxu0 }
  0xfb   : > { %v364_v38 = vpop.f32.mrb[5].mxu0 }
  0xfc   : > { %5681 = vrot.lane.b32.xlu0 %v6225_v33, %s6128_s9  ;;  %v5359_v39 = vpop.f32.mrb[6].mxu0 }
  0xfd   : > { %v367_v40 = vpop.f32.mrb[7].mxu0  ;;  %v6241_v41 = vpack.i.bf16 %v5359_v39, %v5358_v37  ;;  %v6243_v42 = vpack.c.bf16 %v5359_v39, %v5358_v37 }
  0xfe   : > { %v6245_v43 = vpack.i.bf16 %v367_v40, %v364_v38  ;;  %v6247_v44 = vpack.c.bf16 %v367_v40, %v364_v38 }
 0x100   : > { %604 = vrot.lane.b32.xlu0 %v6231_v36, %s6130_s10  ;;  %5686 = vrot.lane.b32.xlu1 %v6245_v43, %s6128_s9 }
 0x102   : > { %v5362_v45 = vpop.f32.mrb[8].mxu0 }
 0x103   : > { %v380_v46 = vpop.f32.mrb[9].mxu0 }
 0x104   : > { %5691 = vrot.lane.b32.xlu1 %v6241_v41, %s6128_s9  ;;  %v5363_v47 = vpop.f32.mrb[10].mxu0 }
 0x105   : > { %v383_v48 = vpop.f32.mrb[11].mxu0  ;;  %v6255_v49 = vpack.i.bf16 %v5363_v47, %v5362_v45  ;;  %v6257_v50 = vpack.c.bf16 %v5363_v47, %v5362_v45 }
 0x106   : > { %v6259_v51 = vpack.i.bf16 %v383_v48, %v380_v46  ;;  %v6261_v52 = vpack.c.bf16 %v383_v48, %v380_v46 }
 0x107   : > { %5696 = vrot.lane.b32.xlu0 %v6255_v49, %s6128_s9 }
 0x108   : > { %5701 = vrot.lane.b32.xlu1 %v6259_v51, %s6128_s9 }
 0x10a   : > { %v5366_v53 = vpop.f32.mrb[12].mxu0 }
 0x10b   : > { %v396_v54 = vpop.f32.mrb[13].mxu0 }
 0x10c   : > { %655 = vrot.lane.b32.xlu1 %v6227_v34, %s6130_s10  ;;  %v5367_v55 = vpop.f32.mrb[14].mxu0 }
 0x10d   : > { %v399_v56 = vpop.f32.mrb[15].mxu0  ;;  %v6269_v57 = vpack.i.bf16 %v5367_v55, %v5366_v53  ;;  %v6271_v58 = vpack.c.bf16 %v5367_v55, %v5366_v53 }
 0x10e   : > { %v6273_v59 = vpack.i.bf16 %v399_v56, %v396_v54  ;;  %v6275_v60 = vpack.c.bf16 %v399_v56, %v396_v54 }
 0x110   : > { %5706 = vrot.lane.b32.xlu1 %v6269_v57, %s6128_s9  ;;  %5711 = vrot.lane.b32.xlu0 %v6273_v59, %s6128_s9 }
 0x114   : > { %5716 = vrot.lane.b32.xlu1 %v6229_v35, %s6131_s11  ;;  %705 = vrot.lane.b32.xlu0 %v6247_v44, %s6130_s10 }
 0x118   : > { %755 = vrot.lane.b32.xlu1 %v6243_v42, %s6130_s10  ;;  %5721 = vrot.lane.b32.xlu0 %v6225_v33, %s6131_s11 }
 0x11c   : > { %5731 = vrot.lane.b32.xlu1 %v6241_v41, %s6131_s11  ;;  %5726 = vrot.lane.b32.xlu0 %v6245_v43, %s6131_s11 }
 0x120   : > { %855 = vrot.lane.b32.xlu1 %v6257_v50, %s6130_s10  ;;  %805 = vrot.lane.b32.xlu0 %v6261_v52, %s6130_s10 }
 0x124   : > { %5741 = vrot.lane.b32.xlu1 %v6255_v49, %s6131_s11  ;;  %5736 = vrot.lane.b32.xlu0 %v6259_v51, %s6131_s11 }
 0x128   : > { %955 = vrot.lane.b32.xlu1 %v6271_v58, %s6130_s10  ;;  %905 = vrot.lane.b32.xlu0 %v6275_v60, %s6130_s10 }
 0x12c   : > { %5751 = vrot.lane.b32.xlu1 %v6269_v57, %s6131_s11  ;;  %5746 = vrot.lane.b32.xlu0 %v6273_v59, %s6131_s11 }
 0x16a   : > { %v5677_v61 = vpop.permute.xlu0 %5676 }
 0x16b   : > { %v5679_v62 = vunpack.i.h.bf16 %v5677_v61  ;;  %v5678_v63 = vunpack.i.l.bf16 %v5677_v61 }
 0x16d   : > { %v6309_v0 = vpack.c.bf16 %v5679_v62, %v5678_v63 }
 0x16e   : > { %v5682_v1 = vpop.permute.xlu0 %5681 }
 0x16f   : > { %v5684_v2 = vunpack.i.h.bf16 %v5682_v1  ;;  %v5683_v3 = vunpack.i.l.bf16 %v5682_v1  ;;  %1005 = vrot.lane.b32.xlu0 %v6309_v0, %s6130_s10 }
 0x171   : > { %v6313_v4 = vpack.c.bf16 %v5684_v2, %v5683_v3 }
 0x172   : > { %v605_v5 = vpop.permute.xlu0 %604  ;;  %v5687_v6 = vpop.permute.xlu1 %5686 }
 0x173   : > { %v5689_v7 = vunpack.i.h.bf16 %v5687_v6  ;;  %v5688_v8 = vunpack.i.l.bf16 %v5687_v6  ;;  %1055 = vrot.lane.b32.xlu1 %v6313_v4, %s6130_s10  ;;  %5756 = vrot.lane.b32.xlu0 %v6229_v35, %s6132_s12  ;;  %v611_v9 = vsel %vm606_vm2, %v605_v5, 0 }
 0x174   : > { %5369 = vmatpush3.bf16.xpose.msra.mxu1 %v611_v9 }
 0x175   : > { %v6320_v10 = vpack.c.bf16 %v5689_v7, %v5688_v8  ;;  %5374 = vmatprep.subr.bf16.mxu1 %v6127_v30 }
 0x176   : > { %v5692_v11 = vpop.permute.xlu1 %5691 }
 0x177   : > { %v5694_v12 = vunpack.i.h.bf16 %v5692_v11  ;;  %v5693_v13 = vunpack.i.l.bf16 %v5692_v11  ;;  %5761 = vrot.lane.b32.xlu1 %v6225_v33, %s6132_s12  ;;  %1105 = vrot.lane.b32.xlu0 %v6320_v10, %s6130_s10 }
 0x179   : > { %v6327_v14 = vpack.c.bf16 %v5694_v12, %v5693_v13  ;;  %v5697_v15 = vpop.permute.xlu0 %5696 }
 0x17a   : > { %v5702_v16 = vpop.permute.xlu1 %5701  ;;  %v5699_v19 = vunpack.i.h.bf16 %v5697_v15  ;;  %v5698_v20 = vunpack.i.l.bf16 %v5697_v15 }
 0x17b   : > { %v5704_v17 = vunpack.i.h.bf16 %v5702_v16  ;;  %v5703_v18 = vunpack.i.l.bf16 %v5702_v16  ;;  %5371 = vmatmul.mubr.msk.bf16.vlgmr.msra.gmra.mrb[0].mxu1 %vm606_vm2, %v6231_v36  ;;  %1155 = vrot.lane.b32.xlu1 %v6327_v14, %s6130_s10 }
 0x17c   : > { %5766 = vrot.lane.b32.xlu0 %v6245_v43, %s6132_s12  ;;  %5376 = vmatprep.mubr.msk.bf16.mxu1 %vm6129_vm1, %v6127_v30  ;;  %v6342_v24 = vpack.c.bf16 %v5699_v19, %v5698_v20 }
 0x17d   : > { %v6337_v21 = vpack.c.bf16 %v5704_v17, %v5703_v18 }
 0x17e   : > { %v656_v22 = vpop.permute.xlu1 %655 }
 0x17f   : > { %v661_v23 = vsel %vm606_vm2, %v656_v22, 0  ;;  %5771 = vrot.lane.b32.xlu1 %v6241_v41, %s6132_s12 }
 0x180   : > { %1205 = vrot.lane.b32.xlu0 %v6337_v21, %s6130_s10  ;;  %5375 = vmatpush3.bf16.xpose.msra.mxu1 %v661_v23 }
 0x181   : > { %5380 = vmatprep.subr.bf16.mxu1 %v6127_v30 }
 0x182   : > { %v5707_v25 = vpop.permute.xlu1 %5706  ;;  %v5712_v26 = vpop.permute.xlu0 %5711 }
 0x183   : > { %v5709_v27 = vunpack.i.h.bf16 %v5707_v25  ;;  %v5708_v28 = vunpack.i.l.bf16 %v5707_v25  ;;  %v5714_v29 = vunpack.i.h.bf16 %v5712_v26  ;;  %v5713_v31 = vunpack.i.l.bf16 %v5712_v26  ;;  %1255 = vrot.lane.b32.xlu1 %v6342_v24, %s6130_s10 }
 0x184   : > { %5776 = vrot.lane.b32.xlu0 %v6259_v51, %s6132_s12 }
 0x185   : > { %v6351_v32 = vpack.c.bf16 %v5714_v29, %v5713_v31  ;;  %v6358_v38 = vpack.c.bf16 %v5709_v27, %v5708_v28 }
 0x186   : > { %v5717_v33 = vpop.permute.xlu1 %5716  ;;  %v706_v35 = vpop.permute.xlu0 %705 }
 0x187   : > { %v711_v37 = vsel %vm606_vm2, %v706_v35, 0  ;;  %5377 = vmatmul.mubr.msk.bf16.vlgmr.msra.gmra.mrb[4].mxu1 %vm606_vm2, %v6227_v34  ;;  %5781 = vrot.lane.b32.xlu1 %v6255_v49, %s6132_s12  ;;  %v5719_v39 = vunpack.i.h.bf16 %v5717_v33  ;;  %v5718_v40 = vunpack.i.l.bf16 %v5717_v33 }
 0x188   : > { %1305 = vrot.lane.b32.xlu0 %v6351_v32, %s6130_s10  ;;  %5381 = vmatpush3.bf16.xpose.msra.mxu1 %v711_v37 }
 0x189   : > { %5382 = vmatprep.mubr.msk.bf16.mxu1 %vm6129_vm1, %v6127_v30  ;;  %5386 = vmatprep.subr.bf16.mxu1 %v6127_v30  ;;  %v6369_v49 = vpack.c.bf16 %v5719_v39, %v5718_v40 }
 0x18a   : > { %v756_v41 = vpop.permute.xlu1 %755  ;;  %v5722_v43 = vpop.permute.xlu0 %5721 }
 0x18b   : > { %1355 = vrot.lane.b32.xlu1 %v6358_v38, %s6130_s10  ;;  %v5724_v45 = vunpack.i.h.bf16 %v5722_v43  ;;  %v5723_v46 = vunpack.i.l.bf16 %v5722_v43  ;;  %v761_v51 = vsel %vm606_vm2, %v756_v41, 0 }
 0x18c   : > { %5786 = vrot.lane.b32.xlu0 %v6273_v59, %s6132_s12 }
 0x18d   : > { %v6378_v59 = vpack.c.bf16 %v5724_v45, %v5723_v46 }
 0x18e   : > { %v5732_v47 = vpop.permute.xlu1 %5731  ;;  %v5727_v48 = vpop.permute.xlu0 %5726 }
 0x18f   : > { %v5729_v53 = vunpack.i.h.bf16 %v5727_v48  ;;  %v5728_v54 = vunpack.i.l.bf16 %v5727_v48  ;;  %5791 = vrot.lane.b32.xlu1 %v6269_v57, %s6132_s12  ;;  %5383 = vmatmul.mubr.msk.bf16.vlgmr.msra.gmra.mrb[8].mxu1 %vm606_vm2, %v6247_v44  ;;  %v5734_v55 = vunpack.i.h.bf16 %v5732_v47  ;;  %v5733_v56 = vunpack.i.l.bf16 %v5732_v47 }
 0x190   : > { %1405 = vrot.lane.b32.xlu0 %v6369_v49, %s6130_s10  ;;  %5387 = vmatpush3.bf16.xpose.msra.mxu1 %v761_v51 }
 0x191   : > { %v6380_v61 = vpack.c.bf16 %v5729_v53, %v5728_v54  ;;  %5388 = vmatprep.mubr.msk.bf16.mxu1 %vm6129_vm1, %v6127_v30  ;;  %5392 = vmatprep.subr.bf16.mxu1 %v6127_v30  ;;  %v6390_v1 = vpack.c.bf16 %v5734_v55, %v5733_v56 }
 0x192   : > { %v856_v62 = vpop.permute.xlu1 %855  ;;  %v806_v57 = vpop.permute.xlu0 %805 }
 0x193   : > { %v861_v63 = vsel %vm606_vm2, %v856_v62, 0  ;;  %1455 = vrot.lane.b32.xlu1 %v6378_v59, %s6130_s10  ;;  %v811_v2 = vsel %vm606_vm2, %v806_v57, 0 }
 0x194   : > { %1505 = vrot.lane.b32.xlu0 %v6380_v61, %s6130_s10  ;;  %5399 = vmatpush3.bf16.xpose.msra.mxu0 %v861_v63 }
 0x195   : > { %5410 = vmatprep.subr.bf16.mxu0 %v6127_v30 }
 0x196   : > { %v5742_v3 = vpop.permute.xlu1 %5741  ;;  %v5737_v5 = vpop.permute.xlu0 %5736 }
 0x197   : > { %v5744_v6 = vunpack.i.h.bf16 %v5742_v3  ;;  %v5743_v7 = vunpack.i.l.bf16 %v5742_v3  ;;  %v5739_v8 = vunpack.i.h.bf16 %v5737_v5  ;;  %v5738_v9 = vunpack.i.l.bf16 %v5737_v5  ;;  %5389 = vmatmul.mubr.msk.bf16.vlgmr.msra.gmra.mrb[12].mxu1 %vm606_vm2, %v6243_v42  ;;  %1555 = vrot.lane.b32.xlu1 %v6390_v1, %s6130_s10 }
 0x198   : > { %5393 = vmatpush3.bf16.xpose.msra.mxu1 %v811_v2  ;;  %5394 = vmatprep.mubr.msk.bf16.mxu1 %vm6129_vm1, %v6127_v30 }
 0x199   : > { %v6400_v11 = vpack.c.bf16 %v5744_v6, %v5743_v7  ;;  %v6402_v12 = vpack.c.bf16 %v5739_v8, %v5738_v9  ;;  %5404 = vmatprep.subr.bf16.mxu1 %v6127_v30 }
 0x19a   : > { %v956_v13 = vpop.permute.xlu1 %955  ;;  %v906_v15 = vpop.permute.xlu0 %905 }
 0x19b   : > { %v961_v16 = vsel %vm606_vm2, %v956_v13, 0  ;;  %5401 = vmatmul.mubr.msk.bf16.vlgmr.msra.gmra.mrb[16].mxu0 %vm606_vm2, %v6257_v50  ;;  %1655 = vrot.lane.b32.xlu1 %v6400_v11, %s6130_s10  ;;  %v911_v17 = vsel %vm606_vm2, %v906_v15, 0 }
 0x19c   : > { %1605 = vrot.lane.b32.xlu0 %v6402_v12, %s6130_s10  ;;  %5411 = vmatpush3.bf16.xpose.msra.mxu0 %v961_v16 }
 0x19d   : > { %5412 = vmatprep.mubr.msk.bf16.mxu0 %vm6129_vm1, %v6127_v30  ;;  %5422 = vmatprep.subr.bf16.mxu0 %v6127_v30 }
 0x19e   : > { %v5752_v18 = vpop.permute.xlu1 %5751  ;;  %v5747_v19 = vpop.permute.xlu0 %5746 }
 0x19f   : > { %v5754_v20 = vunpack.i.h.bf16 %v5752_v18  ;;  %v5753_v22 = vunpack.i.l.bf16 %v5752_v18  ;;  %v5749_v23 = vunpack.i.h.bf16 %v5747_v19  ;;  %v5748_v25 = vunpack.i.l.bf16 %v5747_v19  ;;  %5395 = vmatmul.mubr.msk.bf16.vlgmr.msra.gmra.mrb[16].mxu1 %vm606_vm2, %v6261_v52 }
 0x1a0   : > { %5405 = vmatpush3.bf16.xpose.msra.mxu1 %v911_v17  ;;  %5406 = vmatprep.mubr.msk.bf16.mxu1 %vm6129_vm1, %v6127_v30 }
 0x1a1   : > { %v6420_v26 = vpack.c.bf16 %v5754_v20, %v5753_v22  ;;  %v6422_v27 = vpack.c.bf16 %v5749_v23, %v5748_v25  ;;  %5416 = vmatprep.subr.bf16.mxu1 %v6127_v30 }
 0x1a3   : > { %8634 = vst [vmem:[#allocation3_spill] sm:$0xff] %v6420_v26  ;;  %8635 = vst [vmem:[#allocation4_spill] sm:$0xff] %v6422_v27  ;;  %5413 = vmatmul.mubr.msk.bf16.vlgmr.msra.gmra.mrb[20].mxu0 %vm606_vm2, %v6271_v58  ;;  %1755 = vrot.lane.b32.xlu1 %v6420_v26, %s6130_s10 }
 0x1a4   : > { %1705 = vrot.lane.b32.xlu0 %v6422_v27, %s6130_s10  ;;  %5424 = vmatprep.mubr.msk.bf16.mxu0 %vm6129_vm1, %v6127_v30 }
 0x1a7   : > { %5407 = vmatmul.mubr.msk.bf16.vlgmr.msra.gmra.mrb[20].mxu1 %vm606_vm2, %v6275_v60 }
 0x1a8   : > { %5418 = vmatprep.mubr.msk.bf16.mxu1 %vm6129_vm1, %v6127_v30 }
 0x1e1   : > { %v1006_v28 = vpop.permute.xlu0 %1005 }
 0x1e2   : > { %v1011_v29 = vsel %vm606_vm2, %v1006_v28, 0 }
 0x1e3   : > { %5417 = vmatpush3.bf16.xpose.msra.mxu1 %v1011_v29 }
 0x1e4   : > { %5428 = vmatprep.subr.bf16.mxu1 %v6127_v30 }
 0x1e5   : > { %v1056_v31 = vpop.permute.xlu1 %1055  ;;  %v5757_v33 = vpop.permute.xlu0 %5756 }
 0x1e6   : > { %v1061_v35 = vsel %vm606_vm2, %v1056_v31, 0  ;;  %v5759_v37 = vunpack.i.h.bf16 %v5757_v33  ;;  %v5758_v39 = vunpack.i.l.bf16 %v5757_v33 }
 0x1e7   : > { %5423 = vmatpush3.bf16.xpose.msra.mxu0 %v1061_v35 }
 0x1e8   : > { %v6440_v40 = vpack.c.bf16 %v5759_v37, %v5758_v39  ;;  %5434 = vmatprep.subr.bf16.mxu0 %v6127_v30 }
 0x1e9   : > { %v5762_v41 = vpop.permute.xlu1 %5761  ;;  %v1106_v43 = vpop.permute.xlu0 %1105 }
 0x1ea   : > { %v5764_v45 = vunpack.i.h.bf16 %v5762_v41  ;;  %v5763_v46 = vunpack.i.l.bf16 %v5762_v41  ;;  %v1111_v47 = vsel %vm606_vm2, %v1106_v43, 0  ;;  %5419 = vmatmul.mubr.msk.bf16.vlgmr.msra.gmra.mrb[24].mxu1 %vm606_vm2, %v6309_v0  ;;  %1805 = vrot.lane.b32.xlu0 %v6440_v40, %s6130_s10 }
 0x1eb   : > { %5429 = vmatpush3.bf16.xpose.msra.mxu1 %v1111_v47  ;;  %5430 = vmatprep.mubr.msk.bf16.mxu1 %vm6129_vm1, %v6127_v30 }
 0x1ec   : > { %v6450_v48 = vpack.c.bf16 %v5764_v45, %v5763_v46  ;;  %5440 = vmatprep.subr.bf16.mxu1 %v6127_v30 }
 0x1ed   : > { %v1156_v51 = vpop.permute.xlu1 %1155 }
 0x1ee   : > { %v1161_v53 = vsel %vm606_vm2, %v1156_v51, 0  ;;  %v5767_v54 = vpop.permute.xlu0 %5766  ;;  %5425 = vmatmul.mubr.msk.bf16.vlgmr.msra.gmra.mrb[24].mxu0 %vm606_vm2, %v6313_v4  ;;  %1855 = vrot.lane.b32.xlu1 %v6450_v48, %s6130_s10 }
 0x1ef   : > { %v5769_v0 = vunpack.i.h.bf16 %v5767_v54  ;;  %v5768_v55 = vunpack.i.l.bf16 %v5767_v54  ;;  %5435 = vmatpush3.bf16.xpose.msra.mxu0 %v1161_v53  ;;  %5436 = vmatprep.mubr.msk.bf16.mxu0 %vm6129_vm1, %v6127_v30 }
 0x1f0   : > { %5446 = vmatprep.subr.bf16.mxu0 %v6127_v30 }
 0x1f1   : > { %v5772_v56 = vpop.permute.xlu1 %5771  ;;  %v6461_v62 = vpack.c.bf16 %v5769_v0, %v5768_v55 }
 0x1f2   : > { %v5774_v57 = vunpack.i.h.bf16 %v5772_v56  ;;  %v5773_v63 = vunpack.i.l.bf16 %v5772_v56  ;;  %v1206_v2 = vpop.permute.xlu0 %1205  ;;  %5431 = vmatmul.mubr.msk.bf16.vlgmr.msra.gmra.mrb[28].mxu1 %vm606_vm2, %v6320_v10 }
 0x1f3   : > { %v1211_v4 = vsel %vm606_vm2, %v1206_v2, 0  ;;  %1905 = vrot.lane.b32.xlu0 %v6461_v62, %s6130_s10  ;;  %5442 = vmatprep.mubr.msk.bf16.mxu1 %vm6129_vm1, %v6127_v30 }
 0x1f4   : > { %5441 = vmatpush3.bf16.xpose.msra.mxu1 %v1211_v4  ;;  %v6470_v3 = vpack.c.bf16 %v5774_v57, %v5773_v63 }
 0x1f5   : > { %v1256_v5 = vpop.permute.xlu1 %1255  ;;  %5452 = vmatprep.subr.bf16.mxu1 %v6127_v30 }
 0x1f6   : > { %v1261_v6 = vsel %vm606_vm2, %v1256_v5, 0  ;;  %v5777_v7 = vpop.permute.xlu0 %5776  ;;  %5437 = vmatmul.mubr.msk.bf16.vlgmr.msra.gmra.mrb[28].mxu0 %vm606_vm2, %v6327_v14  ;;  %1955 = vrot.lane.b32.xlu1 %v6470_v3, %s6130_s10 }
 0x1f7   : > { %v5779_v10 = vunpack.i.h.bf16 %v5777_v7  ;;  %v5778_v8 = vunpack.i.l.bf16 %v5777_v7  ;;  %5447 = vmatpush3.bf16.xpose.msra.mxu0 %v1261_v6  ;;  %5448 = vmatprep.mubr.msk.bf16.mxu0 %vm6129_vm1, %v6127_v30 }
 0x1f8   : > { %5458 = vmatprep.subr.bf16.mxu0 %v6127_v30 }
 0x1f9   : > { %v5782_v9 = vpop.permute.xlu1 %5781  ;;  %v6481_v13 = vpack.c.bf16 %v5779_v10, %v5778_v8 }
 0x1fa   : > { %v5784_v15 = vunpack.i.h.bf16 %v5782_v9  ;;  %v5783_v16 = vunpack.i.l.bf16 %v5782_v9  ;;  %v1306_v17 = vpop.permute.xlu0 %1305 }
 0x1fb   : > { %v1311_v18 = vsel %vm606_vm2, %v1306_v17, 0  ;;  %5443 = vmatmul.mubr.msk.bf16.vlgmr.msra.gmra.mrb[32].mxu1 %vm606_vm2, %v6337_v21  ;;  %2005 = vrot.lane.b32.xlu0 %v6481_v13, %s6130_s10 }
 0x1fc   : > { %5453 = vmatpush3.bf16.xpose.msra.mxu1 %v1311_v18  ;;  %v6488_v14 = vpack.c.bf16 %v5784_v15, %v5783_v16  ;;  %5454 = vmatprep.mubr.msk.bf16.mxu1 %vm6129_vm1, %v6127_v30 }
 0x1fd   : > { %v1356_v19 = vpop.permute.xlu1 %1355  ;;  %5464 = vmatprep.subr.bf16.mxu1 %v6127_v30 }
 0x1fe   : > { %v1361_v20 = vsel %vm606_vm2, %v1356_v19, 0  ;;  %v5787_v22 = vpop.permute.xlu0 %5786  ;;  %5449 = vmatmul.mubr.msk.bf16.vlgmr.msra.gmra.mrb[32].mxu0 %vm606_vm2, %v6342_v24  ;;  %2055 = vrot.lane.b32.xlu1 %v6488_v14, %s6130_s10 }
 0x1ff   : > { %v5789_v21 = vunpack.i.h.bf16 %v5787_v22  ;;  %v5788_v23 = vunpack.i.l.bf16 %v5787_v22  ;;  %5459 = vmatpush3.bf16.xpose.msra.mxu0 %v1361_v20  ;;  %5460 = vmatprep.mubr.msk.bf16.mxu0 %vm6129_vm1, %v6127_v30 }
 0x200   : > { %5470 = vmatprep.subr.bf16.mxu0 %v6127_v30 }
 0x201   : > { %v5792_v25 = vpop.permute.xlu1 %5791  ;;  %v6501_v28 = vpack.c.bf16 %v5789_v21, %v5788_v23 }
 0x202   : > { %v5794_v29 = vunpack.i.h.bf16 %v5792_v25  ;;  %v5793_v31 = vunpack.i.l.bf16 %v5792_v25  ;;  %v1406_v33 = vpop.permute.xlu0 %1405 }
 0x203   : > { %v1411_v35 = vsel %vm606_vm2, %v1406_v33, 0  ;;  %5455 = vmatmul.mubr.msk.bf16.vlgmr.msra.gmra.mrb[36].mxu1 %vm606_vm2, %v6351_v32  ;;  %2105 = vrot.lane.b32.xlu0 %v6501_v28, %s6130_s10 }
 0x204   : > { %5465 = vmatpush3.bf16.xpose.msra.mxu1 %v1411_v35  ;;  %v6508_v24 = vpack.c.bf16 %v5794_v29, %v5793_v31  ;;  %5466 = vmatprep.mubr.msk.bf16.mxu1 %vm6129_vm1, %v6127_v30 }
 0x205   : > { %v1456_v37 = vpop.permute.xlu1 %1455  ;;  %5476 = vmatprep.subr.bf16.mxu1 %v6127_v30 }
 0x206   : > { %v1461_v39 = vsel %vm606_vm2, %v1456_v37, 0  ;;  %5461 = vmatmul.mubr.msk.bf16.vlgmr.msra.gmra.mrb[36].mxu0 %vm606_vm2, %v6358_v38  ;;  %2155 = vrot.lane.b32.xlu1 %v6508_v24, %s6130_s10  ;;  %v1506_v32 = vpop.permute.xlu0 %1505 }
 0x207   : > { %2999 = vrot.lane.b32.xlu0 %v6227_v34, %s6133_s13  ;;  %5471 = vmatpush3.bf16.xpose.msra.mxu0 %v1461_v39  ;;  %v1511_v41 = vsel %vm606_vm2, %v1506_v32, 0 }
 0x208   : > { %5472 = vmatprep.mubr.msk.bf16.mxu0 %vm6129_vm1, %v6127_v30  ;;  %5482 = vmatprep.subr.bf16.mxu0 %v6127_v30 }
 0x209   : > { %v1556_v38 = vpop.permute.xlu1 %1555 }
 0x20a   : > { %2941 = vrot.lane.b32.xlu1 %v6231_v36, %s6133_s13  ;;  %v1561_v34 = vsel %vm606_vm2, %v1556_v38, 0 }
 0x20b   : > { %5467 = vmatmul.mubr.msk.bf16.vlgmr.msra.gmra.mrb[40].mxu1 %vm606_vm2, %v6369_v49  ;;  %3115 = vrot.lane.b32.xlu0 %v6243_v42, %s6133_s13 }
 0x20c   : > { %5477 = vmatpush3.bf16.xpose.msra.mxu1 %v1511_v41  ;;  %5478 = vmatprep.mubr.msk.bf16.mxu1 %vm6129_vm1, %v6127_v30 }
 0x20d   : > { %5488 = vmatprep.subr.bf16.mxu1 %v6127_v30  ;;  %v1656_v42 = vpop.permute.xlu1 %1655 }
 0x20e   : > { %3057 = vrot.lane.b32.xlu1 %v6247_v44, %s6133_s13  ;;  %5473 = vmatmul.mubr.msk.bf16.vlgmr.msra.gmra.mrb[40].mxu0 %vm606_vm2, %v6378_v59  ;;  %v1606_v36 = vpop.permute.xlu0 %1605  ;;  %v1661_v44 = vsel %vm606_vm2, %v1656_v42, 0 }
 0x20f   : > { %3231 = vrot.lane.b32.xlu0 %v6257_v50, %s6133_s13  ;;  %5483 = vmatpush3.bf16.xpose.msra.mxu0 %v1561_v34  ;;  %v1611_v43 = vsel %vm606_vm2, %v1606_v36, 0 }
 0x210   : > { %5484 = vmatprep.mubr.msk.bf16.mxu0 %vm6129_vm1, %v6127_v30  ;;  %5494 = vmatprep.subr.bf16.mxu0 %v6127_v30 }
 0x212   : > { %3173 = vrot.lane.b32.xlu1 %v6261_v52, %s6133_s13 }
 0x213   : > { %5479 = vmatmul.mubr.msk.bf16.vlgmr.msra.gmra.mrb[44].mxu1 %vm606_vm2, %v6380_v61  ;;  %3347 = vrot.lane.b32.xlu0 %v6271_v58, %s6133_s13 }
 0x214   : > { %5489 = vmatpush3.bf16.xpose.msra.mxu1 %v1611_v43  ;;  %5490 = vmatprep.mubr.msk.bf16.mxu1 %vm6129_vm1, %v6127_v30 }
 0x215   : > { %5500 = vmatprep.subr.bf16.mxu1 %v6127_v30  ;;  %v1756_v52 = vpop.permute.xlu1 %1755 }
 0x216   : > { %5485 = vmatmul.mubr.msk.bf16.vlgmr.msra.gmra.mrb[44].mxu0 %vm606_vm2, %v6390_v1  ;;  %3289 = vrot.lane.b32.xlu1 %v6275_v60, %s6133_s13  ;;  %v1706_v50 = vpop.permute.xlu0 %1705  ;;  %v1761_v60 = vsel %vm606_vm2, %v1756_v52, 0 }
 0x217   : > { %3463 = vrot.lane.b32.xlu0 %v6378_v59, %s6133_s13  ;;  %5495 = vmatpush3.bf16.xpose.msra.mxu0 %v1661_v44  ;;  %v1711_v58 = vsel %vm606_vm2, %v1706_v50, 0 }
 0x218   : > { %5496 = vmatprep.mubr.msk.bf16.mxu0 %vm6129_vm1, %v6127_v30  ;;  %5506 = vmatprep.subr.bf16.mxu0 %v6127_v30 }
 0x21a   : > { %3405 = vrot.lane.b32.xlu1 %v6369_v49, %s6133_s13 }
 0x21b   : > { %5491 = vmatmul.mubr.msk.bf16.vlgmr.msra.gmra.mrb[48].mxu1 %vm606_vm2, %v6402_v12  ;;  %3637 = vrot.lane.b32.xlu0 %v6402_v12, %s6133_s13 }
 0x21c   : > { %5501 = vmatpush3.bf16.xpose.msra.mxu1 %v1711_v58  ;;  %5502 = vmatprep.mubr.msk.bf16.mxu1 %vm6129_vm1, %v6127_v30 }
 0x21d   : > { %5512 = vmatprep.subr.bf16.mxu1 %v6127_v30 }
 0x21e   : > { %5497 = vmatmul.mubr.msk.bf16.vlgmr.msra.gmra.mrb[48].mxu0 %vm606_vm2, %v6400_v11  ;;  %3521 = vrot.lane.b32.xlu1 %v6380_v61, %s6133_s13 }
 0x21f   : > { %5507 = vmatpush3.bf16.xpose.msra.mxu0 %v1761_v60  ;;  %5508 = vmatprep.mubr.msk.bf16.mxu0 %vm6129_vm1, %v6127_v30 }
 0x220   : > { %5518 = vmatprep.subr.bf16.mxu0 %v6127_v30 }
 0x222   : > { %3579 = vrot.lane.b32.xlu1 %v6390_v1, %s6133_s13 }
 0x223   : > { %5503 = vmatmul.mubr.msk.bf16.vlgmr.msra.gmra.mrb[52].mxu1 %vm606_vm2, %v6422_v27 }
 0x224   : > { %5514 = vmatprep.mubr.msk.bf16.mxu1 %vm6129_vm1, %v6127_v30 }
 0x226   : > { %5509 = vmatmul.mubr.msk.bf16.vlgmr.msra.gmra.mrb[52].mxu0 %vm606_vm2, %v6420_v26  ;;  %3695 = vrot.lane.b32.xlu1 %v6400_v11, %s6133_s13 }
 0x227   : > { %5520 = vmatprep.mubr.msk.bf16.mxu0 %vm6129_vm1, %v6127_v30 }
 0x24e   : > { %v6593_v49 = vpop.f32.mrb[0].mxu1 }
 0x24f   : > { %v5372_v59 = vpop.f32.mrb[1].mxu1  ;;  %v2205_v61 = vsel %vm2204_vm3, %v6593_v49, -inf }
 0x250   : > { %v6597_v1 = vpop.f32.mrb[2].mxu1  ;;  %2206 = vmax.xlane.f32.xlu0 %v2205_v61 }
 0x251   : > { %v5373_v12 = vpop.f32.mrb[3].mxu1  ;;  %v2208_v45 = vsel %vm2204_vm3, %v6597_v1, -inf }
 0x252   : > { %2209 = vmax.xlane.f32.xlu1 %v2208_v45 }
 0x25a   : > { %v6601_v46 = vpop.f32.mrb[4].mxu1 }
 0x25b   : > { %v5378_v11 = vpop.f32.mrb[5].mxu1  ;;  %v2211_v47 = vsel %vm2204_vm3, %v6601_v46, -inf }
 0x25c   : > { %v6605_v51 = vpop.f32.mrb[6].mxu1  ;;  %2212 = vmax.xlane.f32.xlu0 %v2211_v47  ;;  %v1806_v53 = vpop.permute.xlu0 %1805 }
 0x25d   : > { %v1811_v54 = vsel %vm606_vm2, %v1806_v53, 0  ;;  %v5379_v0 = vpop.f32.mrb[7].mxu1  ;;  %v2214_v55 = vsel %vm2204_vm3, %v6605_v51, -inf }
 0x25e   : > { %5513 = vmatpush3.bf16.xpose.msra.mxu1 %v1811_v54 }
 0x25f   : > { %5524 = vmatprep.subr.bf16.mxu1 %v6127_v30 }
 0x260   : > { %v1856_v56 = vpop.permute.xlu1 %1855  ;;  %2215 = vmax.xlane.f32.xlu0 %v2214_v55 }
 0x261   : > { %v1861_v57 = vsel %vm606_vm2, %v1856_v56, 0 }
 0x262   : > { %v6612_v63 = vpop.f32.mrb[8].mxu1  ;;  %5519 = vmatpush3.bf16.xpose.msra.mxu0 %v1861_v57 }
 0x263   : > { %v5384_v2 = vpop.f32.mrb[9].mxu1  ;;  %5530 = vmatprep.subr.bf16.mxu0 %v6127_v30  ;;  %v2217_v33 = vsel %vm2204_vm3, %v6612_v63, -inf }
 0x264   : > { %v6615_v4 = vpop.f32.mrb[10].mxu1 }
 0x265   : > { %v1906_v5 = vpop.permute.xlu0 %1905  ;;  %v5385_v6 = vpop.f32.mrb[11].mxu1  ;;  %5515 = vmatmul.mubr.msk.bf16.vlgmr.msra.gmra.mrb[56].mxu1 %vm606_vm2, %v6440_v40  ;;  %v2220_v39 = vsel %vm2204_vm3, %v6615_v4, -inf }
 0x266   : > { %v1911_v7 = vsel %vm606_vm2, %v1906_v5, 0  ;;  %5526 = vmatprep.mubr.msk.bf16.mxu1 %vm6129_vm1, %v6127_v30 }
 0x267   : > { %5525 = vmatpush3.bf16.xpose.msra.mxu1 %v1911_v7 }
 0x268   : > { %v1956_v10 = vpop.permute.xlu1 %1955  ;;  %5536 = vmatprep.subr.bf16.mxu1 %v6127_v30 }
 0x269   : > { %v1961_v8 = vsel %vm606_vm2, %v1956_v10, 0  ;;  %5521 = vmatmul.mubr.msk.bf16.vlgmr.msra.gmra.mrb[56].mxu0 %vm606_vm2, %v6450_v48 }
 0x26a   : > { %v6626_v9 = vpop.f32.mrb[12].mxu1  ;;  %5531 = vmatpush3.bf16.xpose.msra.mxu0 %v1961_v8  ;;  %5532 = vmatprep.mubr.msk.bf16.mxu0 %vm6129_vm1, %v6127_v30 }
 0x26b   : > { %v5390_v40 = vpop.f32.mrb[13].mxu1  ;;  %5542 = vmatprep.subr.bf16.mxu0 %v6127_v30  ;;  %v2223_v60 = vsel %vm2204_vm3, %v6626_v9, -inf }
 0x26c   : > { %v6631_v15 = vpop.f32.mrb[14].mxu1 }
 0x26d   : > { %v2006_v16 = vpop.permute.xlu0 %2005  ;;  %v5391_v17 = vpop.f32.mrb[15].mxu1  ;;  %v2226_v12 = vsel %vm2204_vm3, %v6631_v15, -inf }
 0x26e   : > { %v2011_v18 = vsel %vm606_vm2, %v2006_v16, 0  ;;  %5527 = vmatmul.mubr.msk.bf16.vlgmr.msra.gmra.mrb[60].mxu1 %vm606_vm2, %v6461_v62  ;;  %v6636_v19 = vpop.f32.mrb[16].mxu0 }
 0x26f   : > { %5537 = vmatpush3.bf16.xpose.msra.mxu1 %v2011_v18  ;;  %v5402_v48 = vpop.f32.mrb[17].mxu0  ;;  %v2235_v20 = vsel %vm2204_vm3, %v6636_v19, -inf  ;;  %5538 = vmatprep.mubr.msk.bf16.mxu1 %vm6129_vm1, %v6127_v30 }
 0x270   : > { %v2056_v22 = vpop.permute.xlu1 %2055  ;;  %v6642_v21 = vpop.f32.mrb[18].mxu0  ;;  %2236 = vmax.xlane.f32.xlu1 %v2235_v20  ;;  %5548 = vmatprep.subr.bf16.mxu1 %v6127_v30 }
 0x271   : > { %v2061_v23 = vsel %vm606_vm2, %v2056_v22, 0  ;;  %v5403_v25 = vpop.f32.mrb[19].mxu0  ;;  %5533 = vmatmul.mubr.msk.bf16.vlgmr.msra.gmra.mrb[60].mxu0 %vm606_vm2, %v6470_v3  ;;  %v2238_v62 = vsel %vm2204_vm3, %v6642_v21, -inf }
 0x272   : > { %v6650_v29 = vpop.f32.mrb[16].mxu1  ;;  %5543 = vmatpush3.bf16.xpose.msra.mxu0 %v2061_v23  ;;  %2239 = vmax.xlane.f32.xlu0 %v2238_v62 }
 0x273   : > { %v5396_v31 = vpop.f32.mrb[17].mxu1  ;;  %5544 = vmatprep.mubr.msk.bf16.mxu0 %vm6129_vm1, %v6127_v30  ;;  %5554 = vmatprep.subr.bf16.mxu0 %v6127_v30  ;;  %v2229_v45 = vsel %vm2204_vm3, %v6650_v29, -inf }
 0x274   : > { %v6657_v35 = vpop.f32.mrb[18].mxu1  ;;  %2218 = vmax.xlane.f32.xlu1 %v2217_v33 }
 0x275   : > { %v2106_v3 = vpop.permute.xlu0 %2105  ;;  %v5397_v37 = vpop.f32.mrb[19].mxu1 }
 0x276   : > { %v2111_v32 = vsel %vm606_vm2, %v2106_v3, 0  ;;  %5539 = vmatmul.mubr.msk.bf16.vlgmr.msra.gmra.mrb[64].mxu1 %vm606_vm2, %v6481_v13  ;;  %v6664_v41 = vpop.f32.mrb[20].mxu0  ;;  %2221 = vmax.xlane.f32.xlu0 %v2220_v39 }
 0x277   : > { %5549 = vmatpush3.bf16.xpose.msra.mxu1 %v2111_v32  ;;  %v5414_v38 = vpop.f32.mrb[21].mxu0  ;;  %v2247_v34 = vsel %vm2204_vm3, %v6664_v41, -inf  ;;  %5550 = vmatprep.mubr.msk.bf16.mxu1 %vm6129_vm1, %v6127_v30 }
 0x278   : > { %v2156_v36 = vpop.permute.xlu1 %2155  ;;  %v6670_v42 = vpop.f32.mrb[22].mxu0  ;;  %2248 = vmax.xlane.f32.xlu1 %v2247_v34 }
 0x279   : > { %v2161_v43 = vsel %vm606_vm2, %v2156_v36, 0  ;;  %v5415_v44 = vpop.f32.mrb[23].mxu0  ;;  %5545 = vmatmul.mubr.msk.bf16.vlgmr.msra.gmra.mrb[64].mxu0 %vm606_vm2, %v6488_v14  ;;  %v2250_v13 = vsel %vm2204_vm3, %v6670_v42, -inf  ;;  %v3000_v50 = vpop.permute.xlu0 %2999 }
 0x27a   : > { %v6677_v52 = vpop.f32.mrb[20].mxu1  ;;  %5555 = vmatpush3.bf16.xpose.msra.mxu0 %v2161_v43  ;;  %2251 = vmax.xlane.f32.xlu0 %v2250_v13 }
 0x27b   : > { %v5408_v58 = vpop.f32.mrb[21].mxu1  ;;  %5566 = vmatprep.subr.bf16.mxu0 %v3000_v50  ;;  %5556 = vmatprep.mubr.msk.bf16.mxu0 %vm6129_vm1, %v6127_v30  ;;  %v2232_v30 = vsel %vm2204_vm3, %v6657_v35, -inf }
 0x27c   : > { %v2942_v59 = vpop.permute.xlu1 %2941  ;;  %2224 = vmax.xlane.f32.xlu1 %v2223_v60  ;;  %v6683_v61 = vpop.f32.mrb[22].mxu1 }
 0x27d   : > { %v5409_v14 = vpop.f32.mrb[23].mxu1  ;;  %5560 = vmatprep.subr.bf16.mxu1 %v2942_v59  ;;  %v6698_v47 = vpop.permute.xlu0 %3115  ;;  %v2244_v53 = vsel %vm2204_vm3, %v6683_v61, -inf }
 0x27e   : > { %5551 = vmatmul.mubr.msk.bf16.vlgmr.msra.gmra.mrb[68].mxu1 %vm606_vm2, %v6501_v28  ;;  %2227 = vmax.xlane.f32.xlu0 %v2226_v12  ;;  %8637 = vst [vmem:[#allocation6_spill] sm:$0xff] %v6698_v47  ;;  %v2241_v28 = vsel %vm2204_vm3, %v6677_v52, -inf }
 0x27f   : > { %5561 = vmatpush3.bf16.msra.mxu1 %v2942_v59 }
 0x280   : > { %v6691_v11 = vpop.permute.xlu1 %3057  ;;  %2230 = vmax.xlane.f32.xlu1 %v2229_v45 }
 0x281   : > { %8636 = vst [vmem:[#allocation5_spill] sm:$0xff] %v6691_v11  ;;  %5557 = vmatmul.mubr.msk.bf16.vlgmr.msra.gmra.mrb[68].mxu0 %vm606_vm2, %v6508_v24  ;;  %5572 = vmatprep.subr.bf16.mxu1 %v6691_v11  ;;  %v6723_v16 = vpop.permute.xlu0 %3231 }
 0x282   : > { %2233 = vmax.xlane.f32.xlu0 %v2232_v30  ;;  %5567 = vmatpush3.bf16.msra.mxu0 %v3000_v50  ;;  %8640 = vst [vmem:[#allocation9_spill] sm:$0xff] %v6723_v16 }
 0x283   : > { %5578 = vmatprep.subr.bf16.mxu0 %v6698_v47 }
 0x284   : > { %2242 = vmax.xlane.f32.xlu1 %v2241_v28  ;;  %v6705_v24 = vpop.permute.xlu1 %3173 }
 0x285   : > { %8638 = vst [vmem:[#allocation7_spill] sm:$0xff] %v6705_v24  ;;  %v6739_v3 = vpop.permute.xlu0 %3347 }
 0x286   : > { %2245 = vmax.xlane.f32.xlu0 %v2244_v53  ;;  %8642 = vst [vmem:[#allocation11_spill] sm:$0xff] %v6739_v3 }
 0x288   : > { %v6715_v6 = vpop.permute.xlu1 %3289 }
 0x289   : > { %8639 = vst [vmem:[#allocation8_spill] sm:$0xff] %v6715_v6  ;;  %v6755_v58 = vpop.permute.xlu0 %3463 }
 0x28a   : > { %8644 = vst [vmem:[#allocation13_spill] sm:$0xff] %v6755_v58 }
 0x28c   : > { %v6731_v23 = vpop.permute.xlu1 %3405 }
 0x28d   : > { %8641 = vst [vmem:[#allocation10_spill] sm:$0xff] %v6731_v23 }
 0x290   : > { %v6747_v34 = vpop.permute.xlu1 %3521 }
 0x291   : > { %8643 = vst [vmem:[#allocation12_spill] sm:$0xff] %v6747_v34 }
 0x294   : > { %v6763_v30 = vpop.permute.xlu1 %3579 }
 0x295   : > { %8645 = vst [vmem:[#allocation14_spill] sm:$0xff] %v6763_v30 }
 0x2bd   : > { %v6707_v54 = vpop.f32.mrb[24].mxu1 }
 0x2be   : > { %v5420_v0 = vpop.f32.mrb[25].mxu1  ;;  %v2253_v18 = vsel %vm2204_vm3, %v6707_v54, -inf }
 0x2bf   : > { %v6709_v55 = vpop.f32.mrb[26].mxu1 }
 0x2c0   : > { %v5421_v56 = vpop.f32.mrb[27].mxu1  ;;  %v2256_v22 = vsel %vm2204_vm3, %v6709_v55, -inf }
 0x2c1   : > { %v6711_v57 = vpop.f32.mrb[24].mxu0  ;;  %v6769_v56 = vpop.permute.xlu0 %3637 }
 0x2c2   : > { %v5426_v2 = vpop.f32.mrb[25].mxu0  ;;  %v2259_v5 = vsel %vm2204_vm3, %v6711_v57, -inf  ;;  %8646 = vst [vmem:[#allocation15_spill] sm:$0xff] %v6769_v56 }
 0x2c3   : > { %v6717_v7 = vpop.f32.mrb[26].mxu0  ;;  %2260 = vmax.xlane.f32.xlu1 %v2259_v5 }
 0x2c4   : > { %v5427_v10 = vpop.f32.mrb[27].mxu0  ;;  %v2262_v8 = vsel %vm2204_vm3, %v6717_v7, -inf }
 0x2c5   : > { %v6721_v40 = vpop.f32.mrb[28].mxu1  ;;  %2263 = vmax.xlane.f32.xlu0 %v2262_v8 }
 0x2c6   : > { %v5432_v17 = vpop.f32.mrb[29].mxu1  ;;  %v2265_v38 = vsel %vm2204_vm3, %v6721_v40, -inf }
 0x2c7   : > { %2254 = vmax.xlane.f32.xlu1 %v2253_v18  ;;  %v6727_v48 = vpop.f32.mrb[30].mxu1 }
 0x2c8   : > { %v5433_v20 = vpop.f32.mrb[31].mxu1  ;;  %v2268_v44 = vsel %vm2204_vm3, %v6727_v48, -inf }
 0x2c9   : > { %v6733_v25 = vpop.f32.mrb[28].mxu0  ;;  %2257 = vmax.xlane.f32.xlu0 %v2256_v22  ;;  %v6779_v20 = vpop.permute.xlu1 %3695 }
 0x2ca   : > { %v5438_v62 = vpop.f32.mrb[29].mxu0  ;;  %v2271_v31 = vsel %vm2204_vm3, %v6733_v25, -inf  ;;  %8647 = vst [vmem:[#allocation16_spill] sm:$0xff] %v6779_v20 }
 0x2cb   : > { %v6737_v33 = vpop.f32.mrb[30].mxu0  ;;  %2272 = vmax.xlane.f32.xlu1 %v2271_v31 }
 0x2cc   : > { %v5439_v37 = vpop.f32.mrb[31].mxu0  ;;  %v2274_v39 = vsel %vm2204_vm3, %v6737_v33, -inf }
 0x2cd   : > { %2275 = vmax.xlane.f32.xlu0 %v2274_v39 }
 0x2ce   : > { %v6743_v32 = vpop.f32.mrb[32].mxu1 }
 0x2cf   : > { %v5444_v36 = vpop.f32.mrb[33].mxu1  ;;  %2266 = vmax.xlane.f32.xlu1 %v2265_v38  ;;  %v2277_v53 = vsel %vm2204_vm3, %v6743_v32, -inf }
 0x2d0   : > { %v6749_v43 = vpop.f32.mrb[34].mxu1 }
 0x2d1   : > { %v5445_v13 = vpop.f32.mrb[35].mxu1  ;;  %v6753_v50 = vpop.f32.mrb[32].mxu0  ;;  %2269 = vmax.xlane.f32.xlu0 %v2268_v44  ;;  %v2280_v5 = vsel %vm2204_vm3, %v6749_v43, -inf }
 0x2d2   : > { %v5450_v60 = vpop.f32.mrb[33].mxu0  ;;  %v2283_v59 = vsel %vm2204_vm3, %v6753_v50, -inf }
 0x2d3   : > { %v6759_v14 = vpop.f32.mrb[34].mxu0  ;;  %2284 = vmax.xlane.f32.xlu1 %v2283_v59 }
 0x2d4   : > { %v5451_v12 = vpop.f32.mrb[35].mxu0  ;;  %v2286_v45 = vsel %vm2204_vm3, %v6759_v14, -inf }
 0x2d5   : > { %2287 = vmax.xlane.f32.xlu0 %v2286_v45 }
 0x2d6   : > { %v6765_v28 = vpop.f32.mrb[36].mxu1 }
 0x2d7   : > { %v5456_v0 = vpop.f32.mrb[37].mxu1  ;;  %2278 = vmax.xlane.f32.xlu1 %v2277_v53  ;;  %v2289_v36 = vsel %vm2204_vm3, %v6765_v28, -inf }
 0x2d8   : > { %v6771_v2 = vpop.f32.mrb[38].mxu1 }
 0x2d9   : > { %v5457_v10 = vpop.f32.mrb[39].mxu1  ;;  %v6775_v8 = vpop.f32.mrb[36].mxu0  ;;  %2281 = vmax.xlane.f32.xlu0 %v2280_v5  ;;  %v2292_v12 = vsel %vm2204_vm3, %v6771_v2, -inf }
 0x2da   : > { %v5462_v17 = vpop.f32.mrb[37].mxu0  ;;  %v2295_v18 = vsel %vm2204_vm3, %v6775_v8, -inf }
 0x2db   : > { %v6781_v22 = vpop.f32.mrb[38].mxu0  ;;  %2296 = vmax.xlane.f32.xlu1 %v2295_v18 }
 0x2dc   : > { %v5463_v62 = vpop.f32.mrb[39].mxu0  ;;  %v2298_v31 = vsel %vm2204_vm3, %v6781_v22, -inf }
 0x2dd   : > { %2299 = vmax.xlane.f32.xlu0 %v2298_v31  ;;  %v2207_v37 = vpop.xlane.xlu0 %2206 }
 0x2de   : > { %v6785_v39 = vpop.f32.mrb[40].mxu1  ;;  %v2397_v38 = vsub.f32 %v6593_v49, %v2207_v37 }
 0x2df   : > { %v5468_v44 = vpop.f32.mrb[41].mxu1  ;;  %v2210_v13 = vpop.xlane.xlu1 %2209  ;;  %2290 = vmax.xlane.f32.xlu1 %v2289_v36  ;;  %v2301_v31 = vsel %vm2204_vm3, %v6785_v39, -inf }
 0x2e0   : > { %v2398_v60 = vsub.f32 %v6597_v1, %v2210_v13  ;;  %v6791_v59 = vpop.f32.mrb[42].mxu1  ;;  %v2461_v45 = vmul.f32 1.442695, %v2397_v38 }
 0x2e1   : > { %v5469_v53 = vpop.f32.mrb[43].mxu1  ;;  %v6795_v0 = vpop.f32.mrb[40].mxu0  ;;  %2293 = vmax.xlane.f32.xlu0 %v2292_v12  ;;  %v2304_v36 = vsel %vm2204_vm3, %v6791_v59, -inf }
 0x2e2   : > { %v5474_v5 = vpop.f32.mrb[41].mxu0  ;;  %v2307_v49 = vsel %vm2204_vm3, %v6795_v0, -inf  ;;  %v2463_v10 = vmul.f32 1.442695, %v2398_v60  ;;  %5799 = vpow2.f32 %v2461_v45 }
 0x2e3   : > { %v6799_v17 = vpop.f32.mrb[42].mxu0  ;;  %2308 = vmax.xlane.f32.xlu1 %v2307_v49 }
 0x2e4   : > { %v5475_v18 = vpop.f32.mrb[43].mxu0  ;;  %v2310_v1 = vsel %vm2204_vm3, %v6799_v17, -inf  ;;  %5801 = vpow2.f32 %v2463_v10 }
 0x2e5   : > { %2311 = vmax.xlane.f32.xlu0 %v2310_v1 }
 0x2e6   : > { %v6803_v62 = vpop.f32.mrb[44].mxu1 }
 0x2e7   : > { %v5480_v37 = vpop.f32.mrb[45].mxu1  ;;  %2302 = vmax.xlane.f32.xlu1 %v2301_v31 }
 0x2e8   : > { %v6807_v38 = vpop.f32.mrb[46].mxu1  ;;  %v2313_v37 = vsel %vm2204_vm3, %v6803_v62, -inf }
 0x2e9   : > { %v5481_v44 = vpop.f32.mrb[47].mxu1  ;;  %v6811_v13 = vpop.f32.mrb[44].mxu0  ;;  %2305 = vmax.xlane.f32.xlu0 %v2304_v36 }
 0x2ea   : > { %v2213_v60 = vpop.xlane.xlu0 %2212  ;;  %v5486_v12 = vpop.f32.mrb[45].mxu0  ;;  %v2319_v45 = vsel %vm2204_vm3, %v6811_v13, -inf }
 0x2eb   : > { %v2399_v53 = vsub.f32 %v6601_v46, %v2213_v60  ;;  %v6816_v5 = vpop.f32.mrb[46].mxu0  ;;  %2320 = vmax.xlane.f32.xlu1 %v2319_v45  ;;  %v2316_v12 = vsel %vm2204_vm3, %v6807_v38, -inf }
 0x2ec   : > { %v5487_v49 = vpop.f32.mrb[47].mxu0  ;;  %v2322_v10 = vsel %vm2204_vm3, %v6816_v5, -inf  ;;  %v6824_v36 = vpop.eup %5799 }
 0x2ed   : > { %v2465_v18 = vmul.f32 1.442695, %v2399_v53  ;;  %2323 = vmax.xlane.f32.xlu0 %v2322_v10  ;;  %v2589_v20 = vsel %vm2204_vm3, %v6824_v36, 0.0 }
 0x2ee   : > { %v6820_v1 = vpop.f32.mrb[48].mxu1  ;;  %v2216_v31 = vpop.xlane.xlu0 %2215 }
 0x2ef   : > { %v2400_v44 = vsub.f32 %v6605_v51, %v2216_v31  ;;  %v5492_v46 = vpop.f32.mrb[49].mxu1  ;;  %2314 = vmax.xlane.f32.xlu1 %v2313_v37  ;;  %v6831_v45 = vpop.eup %5801  ;;  %5803 = vpow2.f32 %v2465_v18 }
 0x2f0   : > { %v6827_v60 = vpop.f32.mrb[50].mxu1  ;;  %v2592_v37 = vsel %vm2204_vm3, %v6831_v45, 0.0 }
 0x2f1   : > { %v2467_v53 = vmul.f32 1.442695, %v2400_v44  ;;  %v5493_v49 = vpop.f32.mrb[51].mxu1  ;;  %v6833_v10 = vpop.f32.mrb[48].mxu0  ;;  %2317 = vmax.xlane.f32.xlu0 %v2316_v12 }
 0x2f2   : > { %v5498_v56 = vpop.f32.mrb[49].mxu0  ;;  %v2331_v18 = vsel %vm2204_vm3, %v6833_v10, -inf }
 0x2f3   : > { %5805 = vpow2.f32 %v2467_v53  ;;  %v6837_v51 = vpop.f32.mrb[50].mxu0  ;;  %2590 = vadd.xlane.f32.xlu1 %v2589_v20 }
 0x2f4   : > { %v5499_v31 = vpop.f32.mrb[51].mxu0  ;;  %v2334_v12 = vsel %vm2204_vm3, %v6837_v51, -inf }
 0x2f5   : > { %2593 = vadd.xlane.f32.xlu0 %v2592_v37  ;;  %v2325_v31 = vsel %vm2204_vm3, %v6820_v1, -inf }
 0x2f6   : > { %v6841_v46 = vpop.f32.mrb[52].mxu1 }
 0x2f7   : > { %v5504_v44 = vpop.f32.mrb[53].mxu1  ;;  %2332 = vmax.xlane.f32.xlu1 %v2331_v18  ;;  %v2328_v18 = vsel %vm2204_vm3, %v6827_v60, -inf }
 0x2f8   : > { %v6845_v56 = vpop.f32.mrb[54].mxu1 }
 0x2f9   : > { %v5505_v53 = vpop.f32.mrb[55].mxu1  ;;  %v6849_v49 = vpop.f32.mrb[52].mxu0  ;;  %2335 = vmax.xlane.f32.xlu0 %v2334_v12 }
 0x2fa   : > { %v5510_v20 = vpop.f32.mrb[53].mxu0  ;;  %v6853_v37 = vpop.eup %5803 }
 0x2fb   : > { %v6855_v34 = vpop.f32.mrb[54].mxu0  ;;  %2326 = vmax.xlane.f32.xlu1 %v2325_v31  ;;  %v2595_v12 = vsel %vm2204_vm3, %v6853_v37, 0.0 }
 0x2fc   : > { %v5511_v44 = vpop.f32.mrb[55].mxu0 }
 0x2fd   : > { %v6859_v30 = vpop.eup %5805  ;;  %v2237_v23 = vpop.xlane.xlu1 %2236  ;;  %2329 = vmax.xlane.f32.xlu0 %v2328_v18 }
 0x2fe   : > { %v2407_v53 = vsub.f32 %v6636_v19, %v2237_v23  ;;  %v2598_v31 = vsel %vm2204_vm3, %v6859_v30, 0.0  ;;  %v2343_v19 = vsel %vm2204_vm3, %v6849_v49, -inf }
 0x2ff   : > { %2596 = vadd.xlane.f32.xlu1 %v2595_v12  ;;  %v2240_v20 = vpop.xlane.xlu0 %2239 }
 0x300   : > { %v2481_v27 = vmul.f32 1.442695, %v2407_v53  ;;  %v2408_v58 = vsub.f32 %v6642_v21, %v2240_v20  ;;  %v2346_v21 = vsel %vm2204_vm3, %v6855_v34, -inf }
 0x301   : > { %v2219_v44 = vpop.xlane.xlu1 %2218  ;;  %2599 = vadd.xlane.f32.xlu0 %v2598_v31 }
 0x302   : > { %5807 = vpow2.f32 %v2481_v27  ;;  %v2483_v6 = vmul.f32 1.442695, %v2408_v58  ;;  %v2401_v26 = vsub.f32 %v6612_v63, %v2219_v44  ;;  %v2337_v27 = vsel %vm2204_vm3, %v6841_v46, -inf }
 0x303   : > { %2344 = vmax.xlane.f32.xlu1 %v2343_v19  ;;  %v2222_v23 = vpop.xlane.xlu0 %2221  ;;  %v2340_v63 = vsel %vm2204_vm3, %v6845_v56, -inf }
 0x304   : > { %5809 = vpow2.f32 %v2483_v6  ;;  %v2469_v18 = vmul.f32 1.442695, %v2401_v26  ;;  %v2402_v53 = vsub.f32 %v6615_v4, %v2222_v23 }
 0x305   : > { %2347 = vmax.xlane.f32.xlu0 %v2346_v21  ;;  %v2249_v23 = vpop.xlane.xlu1 %2248 }
 0x306   : > { %5811 = vpow2.f32 %v2469_v18  ;;  %v2471_v12 = vmul.f32 1.442695, %v2402_v53  ;;  %v2411_v53 = vsub.f32 %v6664_v41, %v2249_v23 }
 0x307   : > { %2338 = vmax.xlane.f32.xlu1 %v2337_v27  ;;  %v2252_v18 = vpop.xlane.xlu0 %2251 }
 0x308   : > { %5813 = vpow2.f32 %v2471_v12  ;;  %v2412_v12 = vsub.f32 %v6670_v42, %v2252_v18 }
 0x309   : > { %2341 = vmax.xlane.f32.xlu0 %v2340_v63  ;;  %v2225_v21 = vpop.xlane.xlu1 %2224  ;;  %v2489_v63 = vmul.f32 1.442695, %v2411_v53 }
 0x30b   : > { %v2228_v27 = vpop.xlane.xlu0 %2227  ;;  %5815 = vpow2.f32 %v2489_v63 }
 0x30c   : > { %v6877_v58 = vpop.eup %5807  ;;  %v2404_v3 = vsub.f32 %v6631_v15, %v2228_v27 }
 0x30d   : > { %8648 = vst [vmem:[#allocation17_spill] sm:$0xff] %v6877_v58  ;;  %v2619_v26 = vsel %vm2204_vm3, %v6877_v58, 0.0  ;;  %v2231_v42 = vpop.xlane.xlu1 %2230 }
 0x30e   : > { %v6881_v4 = vpop.eup %5809  ;;  %2620 = vadd.xlane.f32.xlu1 %v2619_v26  ;;  %v2403_v26 = vsub.f32 %v6626_v9, %v2225_v21 }
 0x30f   : > { %8649 = vst [vmem:[#allocation18_spill] sm:$0xff] %v6881_v4  ;;  %v2622_v6 = vsel %vm2204_vm3, %v6881_v4, 0.0  ;;  %v2234_v53 = vpop.xlane.xlu0 %2233 }
 0x310   : > { %v6885_v20 = vpop.eup %5811  ;;  %2623 = vadd.xlane.f32.xlu0 %v2622_v6  ;;  %v2491_v6 = vmul.f32 1.442695, %v2412_v12 }
 0x311   : > { %8650 = vst [vmem:[#allocation19_spill] sm:$0xff] %v6885_v20  ;;  %v2601_v31 = vsel %vm2204_vm3, %v6885_v20, 0.0 }
 0x312   : > { %v6889_v44 = vpop.eup %5813  ;;  %2602 = vadd.xlane.f32.xlu1 %v2601_v31  ;;  %v2473_v31 = vmul.f32 1.442695, %v2403_v26  ;;  %5817 = vpow2.f32 %v2491_v6  ;;  %v2406_v26 = vsub.f32 %v6657_v35, %v2234_v53 }
 0x313   : > { %8651 = vst [vmem:[#allocation20_spill] sm:$0xff] %v6889_v44  ;;  %v2604_v19 = vsel %vm2204_vm3, %v6889_v44, 0.0 }
 0x314   : > { %2605 = vadd.xlane.f32.xlu0 %v2604_v19  ;;  %v2475_v19 = vmul.f32 1.442695, %v2404_v3  ;;  %5819 = vpow2.f32 %v2473_v31  ;;  %v2405_v3 = vsub.f32 %v6650_v29, %v2231_v42  ;;  %v2479_v35 = vmul.f32 1.442695, %v2406_v26  ;;  %v2246_v26 = vpop.xlane.xlu0 %2245 }
 0x315   : > { %v6914_v63 = vpop.eup %5815 }
 0x316   : > { %5821 = vpow2.f32 %v2475_v19  ;;  %8653 = vst [vmem:[#allocation22_spill] sm:$0xff] %v6914_v63  ;;  %v2477_v29 = vmul.f32 1.442695, %v2405_v3  ;;  %v2243_v3 = vpop.xlane.xlu1 %2242 }
 0x318   : > { %5823 = vpow2.f32 %v2477_v29 }
 0x319   : > { %5825 = vpow2.f32 %v2479_v35  ;;  %v2410_v35 = vsub.f32 %v6683_v61, %v2246_v26 }
 0x338   : > { %v6897_v58 = vpop.f32.mrb[56].mxu1 }
 0x339   : > { %v5516_v24 = vpop.f32.mrb[57].mxu1  ;;  %v2349_v27 = vsel %vm2204_vm3, %v6897_v58, -inf }
 0x33a   : > { %v6899_v11 = vpop.f32.mrb[58].mxu1 }
 0x33b   : > { %v5517_v41 = vpop.f32.mrb[59].mxu1  ;;  %v2352_v19 = vsel %vm2204_vm3, %v6899_v11, -inf }
 0x33c   : > { %v6901_v23 = vpop.f32.mrb[56].mxu0  ;;  %v6921_v41 = vpop.eup %5817 }
 0x33d   : > { %v5522_v18 = vpop.f32.mrb[57].mxu0  ;;  %v2355_v9 = vsel %vm2204_vm3, %v6901_v23, -inf  ;;  %8655 = vst [vmem:[#allocation24_spill] sm:$0xff] %v6921_v41 }
 0x33e   : > { %v6905_v15 = vpop.f32.mrb[58].mxu0  ;;  %2356 = vmax.xlane.f32.xlu1 %v2355_v9 }
 0x33f   : > { %v5523_v21 = vpop.f32.mrb[59].mxu0  ;;  %v2358_v24 = vsel %vm2204_vm3, %v6905_v15, -inf }
 0x340   : > { %2359 = vmax.xlane.f32.xlu0 %v2358_v24  ;;  %v2631_v21 = vsel %vm2204_vm3, %v6914_v63, 0.0  ;;  %v6927_v24 = vpop.eup %5819 }
 0x341   : > { %v6910_v12 = vpop.f32.mrb[60].mxu1  ;;  %8656 = vst [vmem:[#allocation25_spill] sm:$0xff] %v6927_v24  ;;  %v6933_v4 = vpop.eup %5821 }
 0x342   : > { %8652 = vst [vmem:[#allocation21_spill] sm:$0xff] %v6910_v12  ;;  %v5528_v6 = vpop.f32.mrb[61].mxu1  ;;  %2350 = vmax.xlane.f32.xlu1 %v2349_v27  ;;  %8658 = vst [vmem:[#allocation27_spill] sm:$0xff] %v6933_v4 }
 0x343   : > { %v6917_v31 = vpop.f32.mrb[62].mxu1  ;;  %v2634_v6 = vsel %vm2204_vm3, %v6921_v41, 0.0 }
 0x344   : > { %8654 = vst [vmem:[#allocation23_spill] sm:$0xff] %v6917_v31  ;;  %v5529_v42 = vpop.f32.mrb[63].mxu1  ;;  %v6923_v18 = vpop.f32.mrb[60].mxu0  ;;  %2353 = vmax.xlane.f32.xlu0 %v2352_v19 }
 0x345   : > { %v5534_v9 = vpop.f32.mrb[61].mxu0  ;;  %v2607_v42 = vsel %vm2204_vm3, %v6927_v24, 0.0  ;;  %v2367_v16 = vsel %vm2204_vm3, %v6923_v18, -inf }
 0x346   : > { %v6929_v53 = vpop.f32.mrb[62].mxu0  ;;  %2632 = vadd.xlane.f32.xlu1 %v2631_v21  ;;  %v2610_v21 = vsel %vm2204_vm3, %v6933_v4, 0.0 }
 0x347   : > { %8657 = vst [vmem:[#allocation26_spill] sm:$0xff] %v6929_v53  ;;  %v5535_v27 = vpop.f32.mrb[63].mxu0  ;;  %v2370_v47 = vsel %vm2204_vm3, %v6929_v53, -inf }
 0x348   : > { %2635 = vadd.xlane.f32.xlu0 %v2634_v6  ;;  %v2409_v27 = vsub.f32 %v6677_v52, %v2243_v3  ;;  %v6957_v3 = vpop.eup %5823 }
 0x349   : > { %v6935_v19 = vpop.f32.mrb[64].mxu1  ;;  %8660 = vst [vmem:[#allocation29_spill] sm:$0xff] %v6957_v3 }
 0x34a   : > { %v5540_v9 = vpop.f32.mrb[65].mxu1  ;;  %2608 = vadd.xlane.f32.xlu1 %v2607_v42  ;;  %v2485_v20 = vmul.f32 1.442695, %v2409_v27 }
 0x34b   : > { %v6939_v63 = vpop.f32.mrb[66].mxu1 }
 0x34c   : > { %8659 = vst [vmem:[#allocation28_spill] sm:$0xff] %v6939_v63  ;;  %v5541_v41 = vpop.f32.mrb[67].mxu1  ;;  %v6944_v29 = vpop.f32.mrb[64].mxu0  ;;  %2611 = vadd.xlane.f32.xlu0 %v2610_v21  ;;  %v2487_v21 = vmul.f32 1.442695, %v2410_v35  ;;  %5827 = vpow2.f32 %v2485_v20  ;;  %v2613_v35 = vsel %vm2204_vm3, %v6957_v3, 0.0 }
 0x34d   : > { %v5546_v6 = vpop.f32.mrb[65].mxu0  ;;  %v2361_v41 = vsel %vm2204_vm3, %v6910_v12, -inf }
 0x34e   : > { %v6949_v9 = vpop.f32.mrb[66].mxu0  ;;  %2368 = vmax.xlane.f32.xlu1 %v2367_v16  ;;  %v2364_v16 = vsel %vm2204_vm3, %v6917_v31, -inf  ;;  %5829 = vpow2.f32 %v2487_v21 }
 0x34f   : > { %v5547_v42 = vpop.f32.mrb[67].mxu0  ;;  %v2382_v21 = vsel %vm2204_vm3, %v6949_v9, -inf }
 0x350   : > { %v2261_v44 = vpop.xlane.xlu1 %2260  ;;  %2371 = vmax.xlane.f32.xlu0 %v2370_v47  ;;  %v6963_v42 = vpop.eup %5825 }
 0x351   : > { %v6953_v52 = vpop.f32.mrb[68].mxu1  ;;  %8661 = vst [vmem:[#allocation30_spill] sm:$0xff] %v6963_v42  ;;  %v2616_v31 = vsel %vm2204_vm3, %v6963_v42, 0.0  ;;  %v2415_v20 = vsub.f32 %v6711_v57, %v2261_v44  ;;  %v2373_v57 = vsel %vm2204_vm3, %v6935_v19, -inf }
 0x352   : > { %v5552_v6 = vpop.f32.mrb[69].mxu1  ;;  %2362 = vmax.xlane.f32.xlu1 %v2361_v41  ;;  %v2264_v61 = vpop.xlane.xlu0 %2263 }
 0x353   : > { %v6959_v26 = vpop.f32.mrb[70].mxu1 }
 0x354   : > { %v5553_v47 = vpop.f32.mrb[71].mxu1  ;;  %v6965_v27 = vpop.f32.mrb[68].mxu0  ;;  %2365 = vmax.xlane.f32.xlu0 %v2364_v16  ;;  %v2379_v16 = vsel %vm2204_vm3, %v6944_v29, -inf }
 0x355   : > { %v2255_v24 = vpop.xlane.xlu1 %2254  ;;  %v5558_v4 = vpop.f32.mrb[69].mxu0 }
 0x356   : > { %v6969_v41 = vpop.f32.mrb[70].mxu0  ;;  %2614 = vadd.xlane.f32.xlu1 %v2613_v35  ;;  %v2258_v6 = vpop.xlane.xlu0 %2257  ;;  %v2416_v4 = vsub.f32 %v6717_v7, %v2264_v61  ;;  %v2497_v35 = vmul.f32 1.442695, %v2415_v20  ;;  %v2376_v61 = vsel %vm2204_vm3, %v6939_v63, -inf }
 0x357   : > { %v5559_v12 = vpop.f32.mrb[71].mxu0  ;;  %v6982_v44 = vpop.eup %5827  ;;  %v2414_v42 = vsub.f32 %v6709_v55, %v2258_v6 }
 0x358   : > { %2617 = vadd.xlane.f32.xlu0 %v2616_v31  ;;  %v2413_v12 = vsub.f32 %v6707_v54, %v2255_v24  ;;  %v2499_v31 = vmul.f32 1.442695, %v2416_v4  ;;  %5831 = vpow2.f32 %v2497_v35 }
 0x359   : > { %v2273_v47 = vpop.xlane.xlu1 %2272  ;;  %v2495_v4 = vmul.f32 1.442695, %v2414_v42 }
 0x35a   : > { %2380 = vmax.xlane.f32.xlu1 %v2379_v16  ;;  %v2276_v3 = vpop.xlane.xlu0 %2275  ;;  %v6987_v16 = vpop.eup %5829  ;;  %v2493_v20 = vmul.f32 1.442695, %v2413_v12  ;;  %v2419_v54 = vsub.f32 %v6733_v25, %v2273_v47  ;;  %5833 = vpow2.f32 %v2499_v31  ;;  %v2391_v47 = vsel %vm2204_vm3, %v6965_v27, -inf }
 0x35b   : > { %v2420_v55 = vsub.f32 %v6737_v33, %v2276_v3  ;;  %v2394_v3 = vsel %vm2204_vm3, %v6969_v41, -inf }
 0x35c   : > { %2383 = vmax.xlane.f32.xlu0 %v2382_v21  ;;  %v2625_v21 = vsel %vm2204_vm3, %v6982_v44, 0.0  ;;  %5835 = vpow2.f32 %v2493_v20  ;;  %v2505_v63 = vmul.f32 1.442695, %v2419_v54 }
 0x35d   : > { %v2267_v53 = vpop.xlane.xlu1 %2266  ;;  %5837 = vpow2.f32 %v2495_v4  ;;  %v2507_v12 = vmul.f32 1.442695, %v2420_v55 }
 0x35e   : > { %2374 = vmax.xlane.f32.xlu1 %v2373_v57  ;;  %v2270_v7 = vpop.xlane.xlu0 %2269  ;;  %v2628_v57 = vsel %vm2204_vm3, %v6987_v16, 0.0  ;;  %v2417_v35 = vsub.f32 %v6721_v40, %v2267_v53  ;;  %5839 = vpow2.f32 %v2505_v63  ;;  %v2385_v53 = vsel %vm2204_vm3, %v6953_v52, -inf }
 0x35f   : > { %v2418_v42 = vsub.f32 %v6727_v48, %v2270_v7  ;;  %5841 = vpow2.f32 %v2507_v12 }
 0x360   : > { %2377 = vmax.xlane.f32.xlu0 %v2376_v61  ;;  %v2501_v31 = vmul.f32 1.442695, %v2417_v35 }
 0x361   : > { %v2285_v24 = vpop.xlane.xlu1 %2284  ;;  %v2503_v54 = vmul.f32 1.442695, %v2418_v42 }
 0x362   : > { %2626 = vadd.xlane.f32.xlu1 %v2625_v21  ;;  %v2288_v6 = vpop.xlane.xlu0 %2287  ;;  %v2423_v61 = vsub.f32 %v6753_v50, %v2285_v24  ;;  %v7004_v20 = vpop.eup %5831  ;;  %v2388_v21 = vsel %vm2204_vm3, %v6959_v26, -inf  ;;  %5843 = vpow2.f32 %v2501_v31 }
 0x363   : > { %v2424_v48 = vsub.f32 %v6759_v14, %v2288_v6  ;;  %v2643_v55 = vsel %vm2204_vm3, %v7004_v20, 0.0  ;;  %5845 = vpow2.f32 %v2503_v54 }
 0x364   : > { %2629 = vadd.xlane.f32.xlu0 %v2628_v57  ;;  %v7009_v63 = vpop.eup %5833  ;;  %v2513_v50 = vmul.f32 1.442695, %v2423_v61 }
 0x365   : > { %v2279_v25 = vpop.xlane.xlu1 %2278  ;;  %v2515_v14 = vmul.f32 1.442695, %v2424_v48 }
 0x366   : > { %2392 = vmax.xlane.f32.xlu1 %v2391_v47  ;;  %v2282_v33 = vpop.xlane.xlu0 %2281  ;;  %v2421_v24 = vsub.f32 %v6743_v32, %v2279_v25  ;;  %v7014_v57 = vpop.eup %5835  ;;  %v2646_v47 = vsel %vm2204_vm3, %v7009_v63, 0.0  ;;  %5847 = vpow2.f32 %v2513_v50 }
 0x367   : > { %v2422_v6 = vsub.f32 %v6749_v43, %v2282_v33  ;;  %v7019_v12 = vpop.eup %5837  ;;  %5849 = vpow2.f32 %v2515_v14 }
 0x368   : > { %2395 = vmax.xlane.f32.xlu0 %v2394_v3  ;;  %v2509_v32 = vmul.f32 1.442695, %v2421_v24  ;;  %v2637_v3 = vsel %vm2204_vm3, %v7014_v57, 0.0  ;;  %v7024_v31 = vpop.eup %5839 }
 0x369   : > { %v2297_v40 = vpop.xlane.xlu1 %2296  ;;  %v2511_v43 = vmul.f32 1.442695, %v2422_v6  ;;  %v7029_v54 = vpop.eup %5841 }
 0x36a   : > { %2386 = vmax.xlane.f32.xlu1 %v2385_v53  ;;  %v2300_v7 = vpop.xlane.xlu0 %2299  ;;  %v2427_v25 = vsub.f32 %v6775_v8, %v2297_v40  ;;  %v2640_v53 = vsel %vm2204_vm3, %v7019_v12, 0.0  ;;  %5851 = vpow2.f32 %v2509_v32 }
 0x36b   : > { %v2428_v33 = vsub.f32 %v6781_v22, %v2300_v7  ;;  %5853 = vpow2.f32 %v2511_v43 }
 0x36c   : > { %2389 = vmax.xlane.f32.xlu0 %v2388_v21  ;;  %v2521_v8 = vmul.f32 1.442695, %v2427_v25  ;;  %v2655_v21 = vsel %vm2204_vm3, %v7024_v31, 0.0  ;;  %v7034_v50 = vpop.eup %5843 }
 0x36d   : > { %v2291_v4 = vpop.xlane.xlu1 %2290  ;;  %v2523_v22 = vmul.f32 1.442695, %v2428_v33  ;;  %v7039_v14 = vpop.eup %5845 }
 0x36e   : > { %2644 = vadd.xlane.f32.xlu1 %v2643_v55  ;;  %v2294_v35 = vpop.xlane.xlu0 %2293  ;;  %v2425_v40 = vsub.f32 %v6765_v28, %v2291_v4  ;;  %v2658_v55 = vsel %vm2204_vm3, %v7029_v54, 0.0  ;;  %5855 = vpow2.f32 %v2521_v8  ;;  %v2652_v43 = vsel %vm2204_vm3, %v7039_v14, 0.0 }
 0x36f   : > { %v2426_v7 = vsub.f32 %v6771_v2, %v2294_v35  ;;  %5857 = vpow2.f32 %v2523_v22 }
 0x370   : > { %2647 = vadd.xlane.f32.xlu0 %v2646_v47  ;;  %v2517_v28 = vmul.f32 1.442695, %v2425_v40  ;;  %v2649_v47 = vsel %vm2204_vm3, %v7034_v50, 0.0  ;;  %v7044_v32 = vpop.eup %5847 }
 0x371   : > { %v2309_v42 = vpop.xlane.xlu1 %2308  ;;  %v2519_v2 = vmul.f32 1.442695, %v2426_v7  ;;  %v7050_v33 = vpop.eup %5849 }
 0x372   : > { %2638 = vadd.xlane.f32.xlu1 %v2637_v3  ;;  %v2312_v61 = vpop.xlane.xlu0 %2311  ;;  %v2431_v4 = vsub.f32 %v6795_v0, %v2309_v42  ;;  %5859 = vpow2.f32 %v2517_v28 }
 0x373   : > { %v2432_v35 = vsub.f32 %v6799_v17, %v2312_v61  ;;  %5861 = vpow2.f32 %v2519_v2 }
 0x374   : > { %2641 = vadd.xlane.f32.xlu0 %v2640_v53  ;;  %v2529_v0 = vmul.f32 1.442695, %v2431_v4  ;;  %v2667_v53 = vsel %vm2204_vm3, %v7044_v32, 0.0  ;;  %v7054_v8 = vpop.eup %5851 }
 0x375   : > { %v2303_v48 = vpop.xlane.xlu1 %2302  ;;  %v2531_v17 = vmul.f32 1.442695, %v2432_v35 }
 0x376   : > { %2656 = vadd.xlane.f32.xlu1 %v2655_v21  ;;  %v2306_v24 = vpop.xlane.xlu0 %2305  ;;  %v2429_v3 = vsub.f32 %v6785_v39, %v2303_v48  ;;  %v2670_v48 = vsel %vm2204_vm3, %v7050_v33, 0.0  ;;  %v7059_v21 = vpop.eup %5853  ;;  %5863 = vpow2.f32 %v2529_v0 }
 0x377   : > { %v2430_v61 = vsub.f32 %v6791_v59, %v2306_v24  ;;  %5865 = vpow2.f32 %v2531_v17 }
 0x378   : > { %2659 = vadd.xlane.f32.xlu0 %v2658_v55  ;;  %v2525_v40 = vmul.f32 1.442695, %v2429_v3  ;;  %v2661_v55 = vsel %vm2204_vm3, %v7054_v8, 0.0  ;;  %v7064_v28 = vpop.eup %5855 }
 0x379   : > { %v2321_v6 = vpop.xlane.xlu1 %2320  ;;  %v2527_v59 = vmul.f32 1.442695, %v2430_v61  ;;  %v7069_v2 = vpop.eup %5857  ;;  %v2679_v3 = vsel %vm2204_vm3, %v7064_v28, 0.0 }
 0x37a   : > { %2650 = vadd.xlane.f32.xlu1 %v2649_v47  ;;  %v2324_v25 = vpop.xlane.xlu0 %2323  ;;  %v2435_v22 = vsub.f32 %v6811_v13, %v2321_v6  ;;  %5867 = vpow2.f32 %v2525_v40  ;;  %v2664_v47 = vsel %vm2204_vm3, %v7059_v21, 0.0 }
 0x37b   : > { %v2436_v24 = vsub.f32 %v6816_v5, %v2324_v25 }
 0x37c   : > { %2653 = vadd.xlane.f32.xlu0 %v2652_v43  ;;  %v2537_v13 = vmul.f32 1.442695, %v2435_v22  ;;  %v7074_v43 = vpop.eup %5859 }
 0x37d   : > { %v2315_v42 = vpop.xlane.xlu1 %2314  ;;  %v2539_v5 = vmul.f32 1.442695, %v2436_v24  ;;  %v2673_v40 = vsel %vm2204_vm3, %v7074_v43, 0.0 }
 0x37e   : > { %2668 = vadd.xlane.f32.xlu1 %v2667_v53  ;;  %v2318_v39 = vpop.xlane.xlu0 %2317  ;;  %v2433_v6 = vsub.f32 %v6803_v62, %v2315_v42  ;;  %v2682_v62 = vsel %vm2204_vm3, %v7069_v2, 0.0  ;;  %v7080_v42 = vpop.eup %5861 }
 0x37f   : > { %v2434_v25 = vsub.f32 %v6807_v38, %v2318_v39 }
 0x380   : > { %2671 = vadd.xlane.f32.xlu0 %v2670_v48  ;;  %v2533_v17 = vmul.f32 1.442695, %v2433_v6  ;;  %v7084_v48 = vpop.eup %5863 }
 0x381   : > { %v2591_v7 = vpop.xlane.xlu1 %2590  ;;  %v2535_v38 = vmul.f32 1.442695, %v2434_v25 }
 0x382   : > { %2662 = vadd.xlane.f32.xlu1 %v2661_v55  ;;  %v2594_v4 = vpop.xlane.xlu0 %2593  ;;  %5869 = vrcp.f32 %v2591_v7  ;;  %v2676_v7 = vsel %vm2204_vm3, %v7080_v42, 0.0  ;;  %v7089_v55 = vpop.eup %5865 }
 0x383   : > { %5871 = vrcp.f32 %v2594_v4 }
 0x384   : > { %2665 = vadd.xlane.f32.xlu0 %v2664_v47  ;;  %5873 = vpow2.f32 %v2527_v59  ;;  %v7092_v24 = vpop.eup %5867  ;;  %v2691_v47 = vsel %vm2204_vm3, %v7084_v48, 0.0 }
 0x385   : > { %v2333_v35 = vpop.xlane.xlu1 %2332  ;;  %5875 = vpow2.f32 %v2537_v13 }
 0x386   : > { %2680 = vadd.xlane.f32.xlu1 %v2679_v3  ;;  %v2336_v0 = vpop.xlane.xlu0 %2335  ;;  %v2439_v53 = vsub.f32 %v6833_v10, %v2333_v35  ;;  %5877 = vpow2.f32 %v2539_v5  ;;  %v2694_v5 = vsel %vm2204_vm3, %v7089_v55, 0.0 }
 0x387   : > { %v2440_v39 = vsub.f32 %v6837_v51, %v2336_v0  ;;  %5879 = vpow2.f32 %v2533_v17 }
 0x388   : > { %2683 = vadd.xlane.f32.xlu0 %v2682_v62  ;;  %v2545_v22 = vmul.f32 1.442695, %v2439_v53  ;;  %5881 = vpow2.f32 %v2535_v38 }
 0x389   : > { %v2327_v61 = vpop.xlane.xlu1 %2326  ;;  %v2547_v51 = vmul.f32 1.442695, %v2440_v39 }
 0x38a   : > { %2674 = vadd.xlane.f32.xlu1 %v2673_v40  ;;  %v2330_v10 = vpop.xlane.xlu0 %2329  ;;  %v2437_v59 = vsub.f32 %v6820_v1, %v2327_v61  ;;  %5883 = vpow2.f32 %v2545_v22 }
 0x38b   : > { %v2438_v6 = vsub.f32 %v6827_v60, %v2330_v10  ;;  %v2685_v60 = vsel %vm2204_vm3, %v7092_v24, 0.0 }
 0x38c   : > { %2677 = vadd.xlane.f32.xlu0 %v2676_v7  ;;  %v5870_v13 = vpop.eup %5869  ;;  %v2541_v25 = vmul.f32 1.442695, %v2437_v59 }
 0x38d   : > { %v2597_v4 = vpop.xlane.xlu1 %2596  ;;  %v5872_v3 = vpop.eup %5871  ;;  %v2845_v0 = vmul.f32 %v5870_v13, %v6824_v36  ;;  %v2543_v61 = vmul.f32 1.442695, %v2438_v6 }
 0x38e   : > { %2692 = vadd.xlane.f32.xlu1 %v2691_v47  ;;  %v2600_v35 = vpop.xlane.xlu0 %2599  ;;  %v7099_v1 = vpop.eup %5873  ;;  %5885 = vrcp.f32 %v2597_v4  ;;  %v2846_v53 = vmul.f32 %v5872_v3, %v6831_v45 }
 0x38f   : > { %5887 = vrcp.f32 %v2600_v35  ;;  %v7105_v17 = vpop.eup %5875  ;;  %v2688_v36 = vsel %vm2204_vm3, %v7099_v1, 0.0 }
 0x390   : > { %2695 = vadd.xlane.f32.xlu0 %v2694_v5  ;;  %5889 = vpow2.f32 %v2547_v51  ;;  %v2909_v38 = vpack.c.bf16 %v2846_v53, %v2845_v0  ;;  %v7111_v45 = vpop.eup %5877  ;;  %v2703_v59 = vsel %vm2204_vm3, %v7105_v17, 0.0 }
 0x391   : > { %v2345_v62 = vpop.xlane.xlu1 %2344  ;;  %5891 = vpow2.f32 %v2541_v25  ;;  %v2706_v51 = vsel %vm2204_vm3, %v7111_v45, 0.0 }
 0x392   : > { %v2443_v40 = vsub.f32 %v6849_v49, %v2345_v62  ;;  %2686 = vadd.xlane.f32.xlu1 %v2685_v60  ;;  %v2348_v39 = vpop.xlane.xlu0 %2347  ;;  %5562 = vmatprep.mubr.msk.bf16.mxu1 %vm2204_vm3, %v2909_v38  ;;  %v7116_v49 = vpop.eup %5879  ;;  %5893 = vpow2.f32 %v2543_v61 }
 0x393   : > { %v2444_v10 = vsub.f32 %v6855_v34, %v2348_v39  ;;  %v7122_v6 = vpop.eup %5881  ;;  %v2697_v5 = vsel %vm2204_vm3, %v7116_v49, 0.0 }
 0x394   : > { %v2553_v22 = vmul.f32 1.442695, %v2443_v40  ;;  %2689 = vadd.xlane.f32.xlu0 %v2688_v36  ;;  %v7124_v3 = vpop.eup %5883 }
 0x395   : > { %v2339_v7 = vpop.xlane.xlu1 %2338  ;;  %v2555_v4 = vmul.f32 1.442695, %v2444_v10  ;;  %v2715_v61 = vsel %vm2204_vm3, %v7124_v3, 0.0 }
 0x396   : > { %v2441_v34 = vsub.f32 %v6841_v46, %v2339_v7  ;;  %2704 = vadd.xlane.f32.xlu1 %v2703_v59  ;;  %v2342_v47 = vpop.xlane.xlu0 %2341  ;;  %5895 = vpow2.f32 %v2553_v22 }
 0x397   : > { %v2442_v13 = vsub.f32 %v6845_v56, %v2342_v47  ;;  %5897 = vpow2.f32 %v2555_v4  ;;  %v2700_v56 = vsel %vm2204_vm3, %v7122_v6, 0.0 }
 0x398   : > { %v2549_v35 = vmul.f32 1.442695, %v2441_v34  ;;  %2707 = vadd.xlane.f32.xlu0 %v2706_v51  ;;  %v5886_v25 = vpop.eup %5885 }
 0x399   : > { %v2551_v46 = vmul.f32 1.442695, %v2442_v13  ;;  %v5888_v0 = vpop.eup %5887  ;;  %v2847_v62 = vmul.f32 %v5886_v25, %v6853_v37 }
 0x39a   : > { %2698 = vadd.xlane.f32.xlu1 %v2697_v5  ;;  %v7130_v53 = vpop.eup %5889  ;;  %5899 = vpow2.f32 %v2549_v35  ;;  %v2848_v60 = vmul.f32 %v5888_v0, %v6859_v30 }
 0x39b   : > { %v7136_v40 = vpop.eup %5891  ;;  %5901 = vpow2.f32 %v2551_v46  ;;  %v2718_v39 = vsel %vm2204_vm3, %v7130_v53, 0.0  ;;  %v7163_v51 = vpop.xlane.xlu1 %2620 }
 0x39c   : > { %2701 = vadd.xlane.f32.xlu0 %v2700_v56  ;;  %8662 = vst [vmem:[#allocation31_spill] sm:$0xff] %v7136_v40  ;;  %v2911_v38 = vpack.c.bf16 %v2848_v60, %v2847_v62  ;;  %v7140_v10 = vpop.eup %5893  ;;  %v2709_v37 = vsel %vm2204_vm3, %v7136_v40, 0.0 }
 0x39d   : > { %v2712_v36 = vsel %vm2204_vm3, %v7140_v10, 0.0  ;;  %v7165_v35 = vpop.xlane.xlu0 %2623 }
 0x39e   : > { %2716 = vadd.xlane.f32.xlu1 %v2715_v61  ;;  %5568 = vmatprep.mubr.msk.bf16.mxu0 %vm2204_vm3, %v2911_v38 }
 0x39f   : > { %v7167_v5 = vpop.xlane.xlu1 %2602 }
 0x3a0   : > { %2719 = vadd.xlane.f32.xlu0 %v2718_v39  ;;  %v7145_v30 = vpop.eup %5895 }
 0x3a1   : > { %8663 = vst [vmem:[#allocation32_spill] sm:$0xff] %v7145_v30  ;;  %v7149_v22 = vpop.eup %5897  ;;  %v2727_v7 = vsel %vm2204_vm3, %v7145_v30, 0.0  ;;  %v7169_v25 = vpop.xlane.xlu0 %2605  ;;  %v8669_v30 = vld [vmem:[#allocation23_spill] sm:$0xff] }
 0x3a2   : > { %2710 = vadd.xlane.f32.xlu1 %v2709_v37  ;;  %8664 = vst [vmem:[#allocation33_spill] sm:$0xff] %v7149_v22  ;;  %v2730_v4 = vsel %vm2204_vm3, %v7149_v22, 0.0 }
 0x3a4   : > { %2713 = vadd.xlane.f32.xlu0 %v2712_v36  ;;  %v7153_v59 = vpop.eup %5899 }
 0x3a5   : > { %8665 = vst [vmem:[#allocation34_spill] sm:$0xff] %v7153_v59  ;;  %v7157_v34 = vpop.eup %5901  ;;  %v2721_v47 = vsel %vm2204_vm3, %v7153_v59, 0.0 }
 0x3a6   : > { %2728 = vadd.xlane.f32.xlu1 %v2727_v7  ;;  %8666 = vst [vmem:[#allocation35_spill] sm:$0xff] %v7157_v34  ;;  %v2724_v13 = vsel %vm2204_vm3, %v7157_v34, 0.0 }
 0x3a8   : > { %2731 = vadd.xlane.f32.xlu0 %v2730_v4 }
 0x3aa   : > { %2722 = vadd.xlane.f32.xlu1 %v2721_v47 }
 0x3ac   : > { %2725 = vadd.xlane.f32.xlu0 %v2724_v13 }
 0x3cb   : > { %v2357_v46 = vpop.xlane.xlu1 %2356 }
 0x3cc   : > { %v2447_v0 = vsub.f32 %v6901_v23, %v2357_v46 }
 0x3cd   : > { %v2360_v56 = vpop.xlane.xlu0 %2359 }
 0x3ce   : > { %v2561_v62 = vmul.f32 1.442695, %v2447_v0  ;;  %v2448_v60 = vsub.f32 %v6905_v15, %v2360_v56 }
 0x3cf   : > { %v2351_v61 = vpop.xlane.xlu1 %2350 }
 0x3d0   : > { %5903 = vpow2.f32 %v2561_v62  ;;  %v2563_v38 = vmul.f32 1.442695, %v2448_v60  ;;  %v2445_v39 = vsub.f32 %v6897_v58, %v2351_v61 }
 0x3d1   : > { %v2354_v37 = vpop.xlane.xlu0 %2353 }
 0x3d2   : > { %5905 = vpow2.f32 %v2563_v38  ;;  %v2557_v36 = vmul.f32 1.442695, %v2445_v39  ;;  %v2446_v7 = vsub.f32 %v6899_v11, %v2354_v37  ;;  %v8667_v39 = vld [vmem:[#allocation26_spill] sm:$0xff] }
 0x3d3   : > { %v7175_v4 = vpop.xlane.xlu1 %2632 }
 0x3d4   : > { %5907 = vpow2.f32 %v2557_v36  ;;  %v2559_v47 = vmul.f32 1.442695, %v2446_v7 }
 0x3d5   : > { %v7177_v13 = vpop.xlane.xlu0 %2635 }
 0x3d6   : > { %5909 = vpow2.f32 %v2559_v47 }
 0x3d7   : > { %v7179_v23 = vpop.xlane.xlu1 %2608 }
 0x3d9   : > { %v7181_v15 = vpop.xlane.xlu0 %2611 }
 0x3da   : > { %v7183_v46 = vpop.eup %5903 }
 0x3db   : > { %v2369_v0 = vpop.xlane.xlu1 %2368  ;;  %v2739_v58 = vsel %vm2204_vm3, %v7183_v46, 0.0 }
 0x3dc   : > { %v7187_v56 = vpop.eup %5905  ;;  %v2451_v11 = vsub.f32 %v6923_v18, %v2369_v0  ;;  %2740 = vadd.xlane.f32.xlu1 %v2739_v58  ;;  %v8668_v18 = vld [vmem:[#allocation21_spill] sm:$0xff] }
 0x3dd   : > { %v2372_v62 = vpop.xlane.xlu0 %2371  ;;  %v2742_v60 = vsel %vm2204_vm3, %v7187_v56, 0.0 }
 0x3de   : > { %v7192_v61 = vpop.eup %5907  ;;  %v2569_v38 = vmul.f32 1.442695, %v2451_v11  ;;  %v2452_v37 = vsub.f32 %v8667_v39, %v2372_v62  ;;  %2743 = vadd.xlane.f32.xlu0 %v2742_v60 }
 0x3df   : > { %v2363_v36 = vpop.xlane.xlu1 %2362  ;;  %v2733_v7 = vsel %vm2204_vm3, %v7192_v61, 0.0 }
 0x3e0   : > { %v7197_v47 = vpop.eup %5909  ;;  %5911 = vpow2.f32 %v2569_v38  ;;  %v2571_v59 = vmul.f32 1.442695, %v2452_v37  ;;  %v2449_v0 = vsub.f32 %v8668_v18, %v2363_v36  ;;  %2734 = vadd.xlane.f32.xlu1 %v2733_v7 }
 0x3e1   : > { %v2366_v58 = vpop.xlane.xlu0 %2365  ;;  %v2736_v34 = vsel %vm2204_vm3, %v7197_v47, 0.0 }
 0x3e2   : > { %5913 = vpow2.f32 %v2571_v59  ;;  %v2565_v11 = vmul.f32 1.442695, %v2449_v0  ;;  %v2450_v62 = vsub.f32 %v8669_v30, %v2366_v58  ;;  %2737 = vadd.xlane.f32.xlu0 %v2736_v34 }
 0x3e3   : > { %v7203_v60 = vpop.xlane.xlu1 %2614 }
 0x3e4   : > { %5915 = vpow2.f32 %v2565_v11  ;;  %v2567_v39 = vmul.f32 1.442695, %v2450_v62 }
 0x3e5   : > { %v7205_v22 = vpop.xlane.xlu0 %2617 }
 0x3e6   : > { %5917 = vpow2.f32 %v2567_v39 }
 0x3e7   : > { %v2381_v38 = vpop.xlane.xlu1 %2380 }
 0x3e8   : > { %v2455_v37 = vsub.f32 %v6944_v29, %v2381_v38 }
 0x3e9   : > { %v2384_v36 = vpop.xlane.xlu0 %2383 }
 0x3ea   : > { %v7208_v7 = vpop.eup %5911  ;;  %v2577_v18 = vmul.f32 1.442695, %v2455_v37  ;;  %v2456_v59 = vsub.f32 %v6949_v9, %v2384_v36  ;;  %v8670_v9 = vld [vmem:[#allocation28_spill] sm:$0xff] }
 0x3eb   : > { %v2375_v0 = vpop.xlane.xlu1 %2374  ;;  %v2751_v30 = vsel %vm2204_vm3, %v7208_v7, 0.0 }
 0x3ec   : > { %v7213_v34 = vpop.eup %5913  ;;  %5919 = vpow2.f32 %v2577_v18  ;;  %v2579_v58 = vmul.f32 1.442695, %v2456_v59  ;;  %v2453_v11 = vsub.f32 %v6935_v19, %v2375_v0  ;;  %2752 = vadd.xlane.f32.xlu1 %v2751_v30 }
 0x3ed   : > { %v2378_v62 = vpop.xlane.xlu0 %2377  ;;  %v2754_v29 = vsel %vm2204_vm3, %v7213_v34, 0.0 }
 0x3ee   : > { %v7218_v39 = vpop.eup %5915  ;;  %5921 = vpow2.f32 %v2579_v58  ;;  %v2573_v38 = vmul.f32 1.442695, %v2453_v11  ;;  %v2454_v37 = vsub.f32 %v8670_v9, %v2378_v62  ;;  %2755 = vadd.xlane.f32.xlu0 %v2754_v29 }
 0x3ef   : > { %v7221_v36 = vpop.xlane.xlu1 %2626  ;;  %v2745_v18 = vsel %vm2204_vm3, %v7218_v39, 0.0 }
 0x3f0   : > { %v7225_v59 = vpop.eup %5917  ;;  %5923 = vpow2.f32 %v2573_v38  ;;  %v2575_v19 = vmul.f32 1.442695, %v2454_v37  ;;  %2746 = vadd.xlane.f32.xlu1 %v2745_v18 }
 0x3f1   : > { %v7227_v0 = vpop.xlane.xlu0 %2629  ;;  %v2748_v30 = vsel %vm2204_vm3, %v7225_v59, 0.0 }
 0x3f2   : > { %5925 = vpow2.f32 %v2575_v19  ;;  %2749 = vadd.xlane.f32.xlu0 %v2748_v30 }
 0x3f3   : > { %v2393_v58 = vpop.xlane.xlu1 %2392  ;;  %5927 = vrcp.f32 %v7169_v25 }
 0x3f4   : > { %v2459_v11 = vsub.f32 %v6965_v27, %v2393_v58 }
 0x3f5   : > { %v2396_v62 = vpop.xlane.xlu0 %2395 }
 0x3f6   : > { %v7232_v29 = vpop.eup %5919  ;;  %v2585_v9 = vmul.f32 1.442695, %v2459_v11  ;;  %v2460_v40 = vsub.f32 %v6969_v41, %v2396_v62 }
 0x3f7   : > { %v2387_v38 = vpop.xlane.xlu1 %2386  ;;  %v2763_v37 = vsel %vm2204_vm3, %v7232_v29, 0.0 }
 0x3f8   : > { %v7238_v18 = vpop.eup %5921  ;;  %5929 = vpow2.f32 %v2585_v9  ;;  %v2587_v19 = vmul.f32 1.442695, %v2460_v40  ;;  %v2457_v30 = vsub.f32 %v6953_v52, %v2387_v38  ;;  %2764 = vadd.xlane.f32.xlu1 %v2763_v37 }
 0x3f9   : > { %5931 = vrcp.f32 %v7179_v23  ;;  %v2390_v27 = vpop.xlane.xlu0 %2389  ;;  %v2766_v58 = vsel %vm2204_vm3, %v7238_v18, 0.0 }
 0x3fa   : > { %v7244_v41 = vpop.eup %5923  ;;  %5933 = vpow2.f32 %v2587_v19  ;;  %v2581_v25 = vmul.f32 1.442695, %v2457_v30  ;;  %v2458_v11 = vsub.f32 %v6959_v26, %v2390_v27  ;;  %2767 = vadd.xlane.f32.xlu0 %v2766_v58 }
 0x3fb   : > { %8671 = vst [vmem:[#allocation26_spill] sm:$0xff] %v7244_v41  ;;  %5935 = vrcp.f32 %v7181_v15  ;;  %v2645_v62 = vpop.xlane.xlu1 %2644  ;;  %v2757_v52 = vsel %vm2204_vm3, %v7244_v41, 0.0 }
 0x3fc   : > { %v7250_v40 = vpop.eup %5925  ;;  %5937 = vpow2.f32 %v2581_v25  ;;  %v2583_v23 = vmul.f32 1.442695, %v2458_v11  ;;  %2758 = vadd.xlane.f32.xlu1 %v2757_v52 }
 0x3fd   : > { %8672 = vst [vmem:[#allocation21_spill] sm:$0xff] %v7250_v40  ;;  %5939 = vrcp.f32 %v2645_v62  ;;  %v2648_v9 = vpop.xlane.xlu0 %2647  ;;  %v2760_v38 = vsel %vm2204_vm3, %v7250_v40, 0.0  ;;  %v5928_v15 = vpop.eup %5927  ;;  %v8679_v40 = vld [vmem:[#allocation20_spill] sm:$0xff] }
 0x3fe   : > { %5941 = vpow2.f32 %v2583_v23  ;;  %2761 = vadd.xlane.f32.xlu0 %v2760_v38 }
 0x3ff   : > { %5943 = vrcp.f32 %v2648_v9  ;;  %v2639_v26 = vpop.xlane.xlu1 %2638 }
 0x400   : > { %5945 = vrcp.f32 %v2639_v26 }
 0x401   : > { %5947 = vrcp.f32 %v7167_v5  ;;  %v2642_v37 = vpop.xlane.xlu0 %2641 }
 0x402   : > { %v7255_v19 = vpop.eup %5929  ;;  %5949 = vrcp.f32 %v2642_v37 }
 0x403   : > { %8673 = vst [vmem:[#allocation23_spill] sm:$0xff] %v7255_v19  ;;  %v5932_v30 = vpop.eup %5931  ;;  %5951 = vrcp.f32 %v7165_v35  ;;  %v2657_v27 = vpop.xlane.xlu1 %2656  ;;  %v2775_v58 = vsel %vm2204_vm3, %v7255_v19, 0.0 }
 0x404   : > { %v7260_v25 = vpop.eup %5933  ;;  %5953 = vrcp.f32 %v2657_v27  ;;  %2776 = vadd.xlane.f32.xlu1 %v2775_v58  ;;  %v8677_v27 = vld [vmem:[#allocation27_spill] sm:$0xff] }
 0x405   : > { %8674 = vst [vmem:[#allocation28_spill] sm:$0xff] %v7260_v25  ;;  %v5936_v11 = vpop.eup %5935  ;;  %5955 = vrcp.f32 %v7163_v51  ;;  %v2660_v62 = vpop.xlane.xlu0 %2659  ;;  %v2778_v5 = vsel %vm2204_vm3, %v7260_v25, 0.0 }
 0x406   : > { %v7265_v52 = vpop.eup %5937  ;;  %5957 = vrcp.f32 %v2660_v62  ;;  %2779 = vadd.xlane.f32.xlu0 %v2778_v5  ;;  %v2852_v58 = vmul.f32 %v5936_v11, %v8677_v27  ;;  %v8683_v27 = vld [vmem:[#allocation18_spill] sm:$0xff] }
 0x407   : > { %8675 = vst [vmem:[#allocation36_spill] sm:$0xff] %v7265_v52  ;;  %v5940_v35 = vpop.eup %5939  ;;  %5959 = vrcp.f32 %v7205_v22  ;;  %v2651_v23 = vpop.xlane.xlu1 %2650  ;;  %v2769_v9 = vsel %vm2204_vm3, %v7265_v52, 0.0 }
 0x408   : > { %v7270_v38 = vpop.eup %5941  ;;  %5961 = vrcp.f32 %v2651_v23  ;;  %2770 = vadd.xlane.f32.xlu1 %v2769_v9  ;;  %v2863_v22 = vmul.f32 %v5940_v35, %v7004_v20  ;;  %v8678_v9 = vld [vmem:[#allocation25_spill] sm:$0xff] }
 0x409   : > { %8676 = vst [vmem:[#allocation37_spill] sm:$0xff] %v7270_v38  ;;  %v5944_v51 = vpop.eup %5943  ;;  %5963 = vrcp.f32 %v7203_v60  ;;  %v2654_v26 = vpop.xlane.xlu0 %2653  ;;  %v2772_v37 = vsel %vm2204_vm3, %v7270_v38, 0.0  ;;  %v2851_v25 = vmul.f32 %v5932_v30, %v8678_v9  ;;  %v2850_v38 = vmul.f32 %v5928_v15, %v8679_v40  ;;  %v8682_v15 = vld [vmem:[#allocation9_spill] sm:$0xff] }
 0x40a   : > { %v5946_v62 = vpop.eup %5945  ;;  %v2864_v5 = vmul.f32 %v5944_v51, %v7009_v63  ;;  %5965 = vrcp.f32 %v2654_v26  ;;  %2773 = vadd.xlane.f32.xlu0 %v2772_v37  ;;  %v8681_v37 = vld [vmem:[#allocation6_spill] sm:$0xff]  ;;  %v8686_v9 = vld [vmem:[#allocation17_spill] sm:$0xff] }
 0x40b   : > { %v5948_v52 = vpop.eup %5947  ;;  %5967 = vrcp.f32 %v7177_v13  ;;  %v2669_v23 = vpop.xlane.xlu1 %2668  ;;  %v2861_v20 = vmul.f32 %v5946_v62, %v7014_v57  ;;  %v2915_v35 = vpack.c.bf16 %v2852_v58, %v2851_v25  ;;  %v8680_v13 = vld [vmem:[#allocation19_spill] sm:$0xff] }
 0x40c   : > { %v5950_v60 = vpop.eup %5949  ;;  %5969 = vrcp.f32 %v2669_v23  ;;  %v2912_v19 = vpack.c.bf16 %v2864_v5, %v2863_v22  ;;  %v2849_v30 = vmul.f32 %v5948_v52, %v8680_v13  ;;  %v8684_v22 = vld [vmem:[#allocation5_spill] sm:$0xff] }
 0x40d   : > { %v5952_v41 = vpop.eup %5951  ;;  %5971 = vrcp.f32 %v7175_v4  ;;  %v2862_v63 = vmul.f32 %v5950_v60, %v7019_v12  ;;  %v2672_v11 = vpop.xlane.xlu0 %2671 }
 0x40e   : > { %v5954_v51 = vpop.eup %5953  ;;  %5569 = vmatmul.mubr.msk.bf16.vlgmr.msra.gmra.mrb[72].mxu0 %vm2204_vm3, %v2912_v19  ;;  %5973 = vrcp.f32 %v2672_v11  ;;  %v2913_v12 = vpack.c.bf16 %v2850_v38, %v2849_v30  ;;  %v2856_v58 = vmul.f32 %v5952_v41, %v8683_v27  ;;  %v8685_v38 = vld [vmem:[#allocation7_spill] sm:$0xff]  ;;  %v8688_v30 = vld [vmem:[#allocation29_spill] sm:$0xff] }
 0x40f   : > { %v5956_v26 = vpop.eup %5955  ;;  %5975 = vrcp.f32 %v7227_v0  ;;  %5579 = vmatpush3.bf16.msra.mxu0 %v8681_v37  ;;  %5580 = vmatprep.mubr.msk.bf16.mxu0 %vm2204_vm3, %v2915_v35  ;;  %v2663_v4 = vpop.xlane.xlu1 %2662  ;;  %v2910_v40 = vpack.c.bf16 %v2862_v63, %v2861_v20  ;;  %v2867_v19 = vmul.f32 %v5954_v51, %v7024_v31 }
 0x410   : > { %v5958_v57 = vpop.eup %5957  ;;  %5590 = vmatprep.subr.bf16.mxu0 %v8682_v15  ;;  %5977 = vrcp.f32 %v2663_v4  ;;  %v2855_v31 = vmul.f32 %v5956_v26, %v8686_v9 }
 0x411   : > { %v5960_v25 = vpop.eup %5959  ;;  %5979 = vrcp.f32 %v7221_v36  ;;  %v2868_v52 = vmul.f32 %v5958_v57, %v7029_v54  ;;  %5563 = vmatmul.mubr.msk.bf16.vlgmr.msra.gmra.mrb[72].mxu1 %vm2204_vm3, %v2910_v40  ;;  %v2666_v0 = vpop.xlane.xlu0 %2665  ;;  %v8687_v54 = vld [vmem:[#allocation30_spill] sm:$0xff] }
 0x412   : > { %v5962_v62 = vpop.eup %5961  ;;  %5573 = vmatpush3.bf16.msra.mxu1 %v8684_v22  ;;  %5981 = vrcp.f32 %v2666_v0  ;;  %5574 = vmatprep.mubr.msk.bf16.mxu1 %vm2204_vm3, %v2913_v12  ;;  %v2854_v20 = vmul.f32 %v5960_v25, %v8687_v54  ;;  %v2919_v51 = vpack.c.bf16 %v2856_v58, %v2855_v31  ;;  %v8689_v12 = vld [vmem:[#allocation11_spill] sm:$0xff]  ;;  %v8691_v0 = vld [vmem:[#allocation24_spill] sm:$0xff] }
 0x413   : > { %v5964_v5 = vpop.eup %5963  ;;  %5584 = vmatprep.subr.bf16.mxu1 %v8685_v38  ;;  %v2681_v23 = vpop.xlane.xlu1 %2680  ;;  %v2916_v36 = vpack.c.bf16 %v2868_v52, %v2867_v19  ;;  %v2865_v41 = vmul.f32 %v5962_v62, %v7034_v50  ;;  %v8690_v52 = vld [vmem:[#allocation3_spill] sm:$0xff]  ;;  %v8692_v22 = vld [vmem:[#allocation8_spill] sm:$0xff] }
 0x414   : > { %v5966_v60 = vpop.eup %5965  ;;  %5983 = vrcp.f32 %v2681_v23  ;;  %v2853_v37 = vmul.f32 %v5964_v5, %v8688_v30 }
 0x415   : > { %v5968_v63 = vpop.eup %5967  ;;  %v2866_v11 = vmul.f32 %v5966_v60, %v7039_v14  ;;  %v2684_v35 = vpop.xlane.xlu0 %2683 }
 0x416   : > { %v5970_v13 = vpop.eup %5969  ;;  %5581 = vmatmul.mubr.msk.bf16.vlgmr.msra.gmra.mrb[76].mxu0 %vm2204_vm3, %v2916_v36  ;;  %5985 = vrcp.f32 %v2684_v35  ;;  %v2917_v50 = vpack.c.bf16 %v2854_v20, %v2853_v37  ;;  %v2860_v27 = vmul.f32 %v5968_v63, %v8691_v0  ;;  %v8696_v37 = vld [vmem:[#allocation10_spill] sm:$0xff] }
 0x417   : > { %v5972_v4 = vpop.eup %5971  ;;  %5591 = vmatpush3.bf16.msra.mxu0 %v8682_v15  ;;  %5592 = vmatprep.mubr.msk.bf16.mxu0 %vm2204_vm3, %v2919_v51  ;;  %v2675_v26 = vpop.xlane.xlu1 %2674  ;;  %v2914_v40 = vpack.c.bf16 %v2866_v11, %v2865_v41  ;;  %v2871_v25 = vmul.f32 %v5970_v13, %v7044_v32 }
 0x418   : > { %v5974_v57 = vpop.eup %5973  ;;  %5602 = vmatprep.subr.bf16.mxu0 %v8689_v12  ;;  %5987 = vrcp.f32 %v2675_v26 }
 0x419   : > { %v5976_v14 = vpop.eup %5975  ;;  %v2872_v19 = vmul.f32 %v5974_v57, %v7050_v33  ;;  %3811 = vrot.lane.b32.xlu1 %v8690_v52, %s6133_s13  ;;  %5575 = vmatmul.mubr.msk.bf16.vlgmr.msra.gmra.mrb[76].mxu1 %vm2204_vm3, %v2914_v40  ;;  %v2678_v15 = vpop.xlane.xlu0 %2677  ;;  %v8693_v33 = vld [vmem:[#allocation22_spill] sm:$0xff] }
 0x41a   : > { %v5978_v58 = vpop.eup %5977  ;;  %5585 = vmatpush3.bf16.msra.mxu1 %v8685_v38  ;;  %5989 = vrcp.f32 %v2678_v15  ;;  %5586 = vmatprep.mubr.msk.bf16.mxu1 %vm2204_vm3, %v2917_v50  ;;  %v2859_v23 = vmul.f32 %v5972_v4, %v8693_v33  ;;  %v2858_v9 = vmul.f32 %v5976_v14, %v6987_v16  ;;  %v8694_v16 = vld [vmem:[#allocation13_spill] sm:$0xff]  ;;  %v8697_v50 = vld [vmem:[#allocation14_spill] sm:$0xff] }
 0x41b   : > { %v5980_v62 = vpop.eup %5979  ;;  %5596 = vmatprep.subr.bf16.mxu1 %v8692_v22  ;;  %v2693_v32 = vpop.xlane.xlu1 %2692  ;;  %v2920_v5 = vpack.c.bf16 %v2872_v19, %v2871_v25  ;;  %v2869_v31 = vmul.f32 %v5978_v58, %v7054_v8  ;;  %v8695_v8 = vld [vmem:[#allocation4_spill] sm:$0xff] }
 0x41c   : > { %v5982_v36 = vpop.eup %5981  ;;  %5991 = vrcp.f32 %v2693_v32  ;;  %v2923_v38 = vpack.c.bf16 %v2860_v27, %v2859_v23  ;;  %v2857_v63 = vmul.f32 %v5980_v62, %v6982_v44 }
 0x41d   : > { %v2870_v60 = vmul.f32 %v5982_v36, %v7059_v21  ;;  %v2696_v54 = vpop.xlane.xlu0 %2695 }
 0x41e   : > { %v5984_v20 = vpop.eup %5983  ;;  %5593 = vmatmul.mubr.msk.bf16.vlgmr.msra.gmra.mrb[80].mxu0 %vm2204_vm3, %v2920_v5  ;;  %5993 = vrcp.f32 %v2696_v54  ;;  %v2921_v21 = vpack.c.bf16 %v2858_v9, %v2857_v63 }
 0x41f   : > { %5603 = vmatpush3.bf16.msra.mxu0 %v8689_v12  ;;  %5604 = vmatprep.mubr.msk.bf16.mxu0 %vm2204_vm3, %v2923_v38  ;;  %v2687_v41 = vpop.xlane.xlu1 %2686  ;;  %v2918_v11 = vpack.c.bf16 %v2870_v60, %v2869_v31  ;;  %v2875_v51 = vmul.f32 %v5984_v20, %v7064_v28 }
 0x420   : > { %v5986_v35 = vpop.eup %5985  ;;  %5614 = vmatprep.subr.bf16.mxu0 %v8694_v16  ;;  %5995 = vrcp.f32 %v2687_v41  ;;  %3753 = vrot.lane.b32.xlu0 %v8695_v8, %s6133_s13 }
 0x421   : > { %v2876_v13 = vmul.f32 %v5986_v35, %v7069_v2  ;;  %5587 = vmatmul.mubr.msk.bf16.vlgmr.msra.gmra.mrb[80].mxu1 %vm2204_vm3, %v2918_v11  ;;  %v2690_v44 = vpop.xlane.xlu0 %2689 }
 0x422   : > { %v5988_v30 = vpop.eup %5987  ;;  %5597 = vmatpush3.bf16.msra.mxu1 %v8692_v22  ;;  %5997 = vrcp.f32 %v2690_v44  ;;  %5598 = vmatprep.mubr.msk.bf16.mxu1 %vm2204_vm3, %v2921_v21 }
 0x423   : > { %5608 = vmatprep.subr.bf16.mxu1 %v8696_v37  ;;  %v2924_v4 = vpack.c.bf16 %v2876_v13, %v2875_v51  ;;  %v2873_v40 = vmul.f32 %v5988_v30, %v7074_v43  ;;  %v8698_v43 = vld [vmem:[#allocation12_spill] sm:$0xff]  ;;  %v2705_v58 = vpop.xlane.xlu1 %2704 }
 0x424   : > { %v5990_v26 = vpop.eup %5989 }
 0x425   : > { %v2874_v57 = vmul.f32 %v5990_v26, %v7080_v42 }
 0x426   : > { %v5992_v28 = vpop.eup %5991  ;;  %5605 = vmatmul.mubr.msk.bf16.vlgmr.msra.gmra.mrb[84].mxu0 %vm2204_vm3, %v2924_v4 }
 0x427   : > { %5615 = vmatpush3.bf16.msra.mxu0 %v8694_v16  ;;  %v2922_v2 = vpack.c.bf16 %v2874_v57, %v2873_v40  ;;  %v2879_v14 = vmul.f32 %v5992_v28, %v7084_v48  ;;  %v2708_v48 = vpop.xlane.xlu0 %2707  ;;  %v2699_v62 = vpop.xlane.xlu1 %2698 }
 0x428   : > { %v5994_v12 = vpop.eup %5993  ;;  %5626 = vmatprep.subr.bf16.mxu0 %v8697_v50  ;;  %5999 = vrcp.f32 %v2708_v48 }
 0x429   : > { %5599 = vmatmul.mubr.msk.bf16.vlgmr.msra.gmra.mrb[84].mxu1 %vm2204_vm3, %v2922_v2  ;;  %v2880_v25 = vmul.f32 %v5994_v12, %v7089_v55 }
 0x42a   : > { %v5996_v19 = vpop.eup %5995  ;;  %5609 = vmatpush3.bf16.msra.mxu1 %v8696_v37 }
 0x42b   : > { %5620 = vmatprep.subr.bf16.mxu1 %v8698_v43  ;;  %v2927_v42 = vpack.c.bf16 %v2880_v25, %v2879_v14  ;;  %v2877_v15 = vmul.f32 %v5996_v19, %v7092_v24  ;;  %v2702_v55 = vpop.xlane.xlu0 %2701  ;;  %v2717_v22 = vpop.xlane.xlu1 %2716 }
 0x42c   : > { %v5998_v52 = vpop.eup %5997 }
 0x42d   : > { %5616 = vmatprep.mubr.msk.bf16.mxu0 %vm2204_vm3, %v2927_v42  ;;  %v2878_v0 = vmul.f32 %v5998_v52, %v7099_v1 }
 0x42f   : > { %v2925_v27 = vpack.c.bf16 %v2878_v0, %v2877_v15  ;;  %v2720_v32 = vpop.xlane.xlu0 %2719  ;;  %v2711_v5 = vpop.xlane.xlu1 %2710 }
 0x431   : > { %5610 = vmatprep.mubr.msk.bf16.mxu1 %vm2204_vm3, %v2925_v27 }
 0x432   : > { %v6000_v38 = vpop.eup %5999 }
 0x433   : > { %v2714_v33 = vpop.xlane.xlu0 %2713  ;;  %v7347_v23 = vpop.xlane.xlu1 %2728  ;;  %v2884_v11 = vmul.f32 %v6000_v38, %v7111_v45 }
 0x437   : > { %v2732_v36 = vpop.xlane.xlu0 %2731  ;;  %v7349_v9 = vpop.xlane.xlu1 %2722 }
 0x43b   : > { %v7351_v31 = vpop.xlane.xlu0 %2725 }
 0x469   : > { %v2741_v24 = vpop.xlane.xlu1 %2740 }
 0x46a   : > { %6001 = vrcp.f32 %v2741_v24 }
 0x46b   : > { %6003 = vrcp.f32 %v2705_v58  ;;  %v2744_v1 = vpop.xlane.xlu0 %2743 }
 0x46c   : > { %6005 = vrcp.f32 %v2744_v1 }
 0x46d   : > { %6007 = vrcp.f32 %v2702_v55  ;;  %v2735_v60 = vpop.xlane.xlu1 %2734 }
 0x46e   : > { %6009 = vrcp.f32 %v2735_v60 }
 0x46f   : > { %6011 = vrcp.f32 %v2699_v62  ;;  %v2738_v54 = vpop.xlane.xlu0 %2737 }
 0x470   : > { %6013 = vrcp.f32 %v2738_v54 }
 0x471   : > { %6015 = vrcp.f32 %v2720_v32 }
 0x474   : > { %v6002_v20 = vpop.eup %6001 }
 0x475   : > { %v6004_v63 = vpop.eup %6003  ;;  %v2895_v16 = vmul.f32 %v6002_v20, %v7183_v46  ;;  %v8703_v20 = vld [vmem:[#allocation32_spill] sm:$0xff] }
 0x476   : > { %v6006_v41 = vpop.eup %6005  ;;  %v2883_v51 = vmul.f32 %v6004_v63, %v7105_v17 }
 0x477   : > { %v6008_v35 = vpop.eup %6007  ;;  %v2896_v8 = vmul.f32 %v6006_v41, %v7187_v56  ;;  %v8699_v56 = vld [vmem:[#allocation16_spill] sm:$0xff] }
 0x478   : > { %v6010_v21 = vpop.eup %6009  ;;  %v2931_v4 = vpack.c.bf16 %v2884_v11, %v2883_v51  ;;  %v2882_v26 = vmul.f32 %v6008_v35, %v7122_v6 }
 0x479   : > { %v6012_v13 = vpop.eup %6011  ;;  %v2753_v44 = vpop.xlane.xlu1 %2752  ;;  %v2928_v30 = vpack.c.bf16 %v2896_v8, %v2895_v16  ;;  %v2893_v45 = vmul.f32 %v6010_v21, %v7192_v61  ;;  %v8704_v21 = vld [vmem:[#allocation35_spill] sm:$0xff] }
 0x47a   : > { %v6014_v37 = vpop.eup %6013  ;;  %6017 = vrcp.f32 %v2753_v44  ;;  %v2881_v17 = vmul.f32 %v6012_v13, %v7116_v49  ;;  %v8705_v13 = vld [vmem:[#allocation26_spill] sm:$0xff] }
 0x47b   : > { %6019 = vrcp.f32 %v2717_v22  ;;  %v2894_v40 = vmul.f32 %v6014_v37, %v7197_v47  ;;  %5617 = vmatmul.mubr.msk.bf16.vlgmr.msra.gmra.mrb[88].mxu0 %vm2204_vm3, %v2928_v30  ;;  %v2756_v46 = vpop.xlane.xlu0 %2755  ;;  %v8700_v47 = vld [vmem:[#allocation15_spill] sm:$0xff]  ;;  %v6016_v2 = vpop.eup %6015  ;;  %v8706_v30 = vld [vmem:[#allocation21_spill] sm:$0xff] }
 0x47c   : > { %5627 = vmatpush3.bf16.msra.mxu0 %v8697_v50  ;;  %6021 = vrcp.f32 %v2756_v46  ;;  %5628 = vmatprep.mubr.msk.bf16.mxu0 %vm2204_vm3, %v2931_v4  ;;  %v2929_v28 = vpack.c.bf16 %v2882_v26, %v2881_v17  ;;  %v2888_v25 = vmul.f32 %v6016_v2, %v7130_v53 }
 0x47d   : > { %6023 = vrcp.f32 %v2714_v33  ;;  %5638 = vmatprep.subr.bf16.mxu0 %v8699_v56  ;;  %v2747_v57 = vpop.xlane.xlu1 %2746  ;;  %v2926_v6 = vpack.c.bf16 %v2894_v40, %v2893_v45 }
 0x47e   : > { %6025 = vrcp.f32 %v2747_v57  ;;  %v8708_v57 = vld [vmem:[#allocation23_spill] sm:$0xff] }
 0x47f   : > { %6027 = vrcp.f32 %v2711_v5  ;;  %5611 = vmatmul.mubr.msk.bf16.vlgmr.msra.gmra.mrb[88].mxu1 %vm2204_vm3, %v2926_v6  ;;  %v2750_v61 = vpop.xlane.xlu0 %2749 }
 0x480   : > { %5621 = vmatpush3.bf16.msra.mxu1 %v8698_v43  ;;  %6029 = vrcp.f32 %v2750_v61  ;;  %5622 = vmatprep.mubr.msk.bf16.mxu1 %vm2204_vm3, %v2929_v28  ;;  %v8709_v28 = vld [vmem:[#allocation28_spill] sm:$0xff] }
 0x481   : > { %5632 = vmatprep.subr.bf16.mxu1 %v8700_v47  ;;  %6031 = vrcp.f32 %v2732_v36 }
 0x484   : > { %v6018_v49 = vpop.eup %6017 }
 0x485   : > { %v6020_v12 = vpop.eup %6019  ;;  %v2765_v50 = vpop.xlane.xlu1 %2764  ;;  %v2899_v42 = vmul.f32 %v6018_v49, %v7208_v7 }
 0x486   : > { %v6022_v14 = vpop.eup %6021  ;;  %6033 = vrcp.f32 %v2765_v50  ;;  %v2887_v0 = vmul.f32 %v6020_v12, %v7124_v3  ;;  %v8701_v3 = vld [vmem:[#allocation31_spill] sm:$0xff]  ;;  %v8710_v12 = vld [vmem:[#allocation36_spill] sm:$0xff] }
 0x487   : > { %v6024_v19 = vpop.eup %6023  ;;  %6035 = vrcp.f32 %v7347_v23  ;;  %v2900_v43 = vmul.f32 %v6022_v14, %v7213_v34  ;;  %v2768_v52 = vpop.xlane.xlu0 %2767  ;;  %v8711_v14 = vld [vmem:[#allocation37_spill] sm:$0xff] }
 0x488   : > { %v6026_v15 = vpop.eup %6025  ;;  %6037 = vrcp.f32 %v2768_v52  ;;  %v2935_v53 = vpack.c.bf16 %v2888_v25, %v2887_v0  ;;  %v2886_v55 = vmul.f32 %v6024_v19, %v7140_v10 }
 0x489   : > { %v6028_v27 = vpop.eup %6027  ;;  %6039 = vrcp.f32 %v7351_v31  ;;  %v2759_v58 = vpop.xlane.xlu1 %2758  ;;  %v2932_v48 = vpack.c.bf16 %v2900_v43, %v2899_v42  ;;  %v2897_v7 = vmul.f32 %v6026_v15, %v7218_v39  ;;  %v7404_v42 = vstv %s232_s14 }
 0x48a   : > { %v6030_v62 = vpop.eup %6029  ;;  %6041 = vrcp.f32 %v2759_v58  ;;  %v2885_v32 = vmul.f32 %v6028_v27, %v8701_v3 }
 0x48b   : > { %6043 = vrcp.f32 %v7349_v9  ;;  %v2898_v34 = vmul.f32 %v6030_v62, %v7225_v59  ;;  %5629 = vmatmul.mubr.msk.bf16.vlgmr.msra.gmra.mrb[92].mxu0 %vm2204_vm3, %v2932_v48  ;;  %v2762_v22 = vpop.xlane.xlu0 %2761  ;;  %v6032_v23 = vpop.eup %6031  ;;  %v8702_v9 = vld [vmem:[#allocation33_spill] sm:$0xff] }
 0x48c   : > { %5639 = vmatpush3.bf16.msra.mxu0 %v8699_v56  ;;  %6045 = vrcp.f32 %v2762_v22  ;;  %5640 = vmatprep.mubr.msk.bf16.mxu0 %vm2204_vm3, %v2935_v53  ;;  %v2933_v33 = vpack.c.bf16 %v2886_v55, %v2885_v32  ;;  %v2892_v31 = vmul.f32 %v6032_v23, %v8702_v9 }
 0x48d   : > { %v2930_v5 = vpack.c.bf16 %v2898_v34, %v2897_v7 }
 0x48f   : > { %5623 = vmatmul.mubr.msk.bf16.vlgmr.msra.gmra.mrb[92].mxu1 %vm2204_vm3, %v2930_v5 }
 0x490   : > { %v6034_v10 = vpop.eup %6033  ;;  %5633 = vmatpush3.bf16.msra.mxu1 %v8700_v47  ;;  %5634 = vmatprep.mubr.msk.bf16.mxu1 %vm2204_vm3, %v2933_v33 }
 0x491   : > { %v6036_v39 = vpop.eup %6035  ;;  %v2777_v59 = vpop.xlane.xlu1 %2776  ;;  %v2903_v1 = vmul.f32 %v6034_v10, %v7232_v29 }
 0x492   : > { %v6038_v36 = vpop.eup %6037  ;;  %6047 = vrcp.f32 %v2777_v59  ;;  %v2891_v63 = vmul.f32 %v6036_v39, %v8703_v20 }
 0x493   : > { %v6040_v24 = vpop.eup %6039  ;;  %v2904_v60 = vmul.f32 %v6038_v36, %v7238_v18  ;;  %v2780_v54 = vpop.xlane.xlu0 %2779  ;;  %v8707_v18 = vld [vmem:[#allocation34_spill] sm:$0xff] }
 0x494   : > { %v6042_v38 = vpop.eup %6041  ;;  %6049 = vrcp.f32 %v2780_v54  ;;  %v2939_v8 = vpack.c.bf16 %v2892_v31, %v2891_v63  ;;  %v2890_v51 = vmul.f32 %v6040_v24, %v8704_v21 }
 0x495   : > { %v6044_v41 = vpop.eup %6043  ;;  %v2771_v11 = vpop.xlane.xlu1 %2770  ;;  %v2936_v35 = vpack.c.bf16 %v2904_v60, %v2903_v1  ;;  %v2901_v44 = vmul.f32 %v6042_v38, %v8705_v13 }
 0x496   : > { %v6046_v16 = vpop.eup %6045  ;;  %6051 = vrcp.f32 %v2771_v11  ;;  %v2889_v4 = vmul.f32 %v6044_v41, %v8707_v18 }
 0x497   : > { %v2902_v37 = vmul.f32 %v6046_v16, %v8706_v30  ;;  %5641 = vmatmul.mubr.msk.bf16.vlgmr.msra.gmra.mrb[96].mxu0 %vm2204_vm3, %v2936_v35  ;;  %v2774_v29 = vpop.xlane.xlu0 %2773 }
 0x498   : > { %6053 = vrcp.f32 %v2774_v29  ;;  %5652 = vmatprep.mubr.msk.bf16.mxu0 %vm2204_vm3, %v2939_v8  ;;  %v2937_v40 = vpack.c.bf16 %v2890_v51, %v2889_v4 }
 0x499   : > { %v3812_v26 = vpop.permute.xlu1 %3811  ;;  %v2934_v45 = vpack.c.bf16 %v2902_v37, %v2901_v44 }
 0x49a   : > { %5650 = vmatprep.subr.bf16.mxu0 %v3812_v26 }
 0x49b   : > { %5635 = vmatmul.mubr.msk.bf16.vlgmr.msra.gmra.mrb[96].mxu1 %vm2204_vm3, %v2934_v45  ;;  %5651 = vmatpush3.bf16.msra.mxu0 %v3812_v26  ;;  %v3754_v46 = vpop.permute.xlu0 %3753 }
 0x49c   : > { %v6048_v17 = vpop.eup %6047  ;;  %5644 = vmatprep.subr.bf16.mxu1 %v3754_v46  ;;  %5646 = vmatprep.mubr.msk.bf16.mxu1 %vm2204_vm3, %v2937_v40 }
 0x49d   : > { %5645 = vmatpush3.bf16.msra.mxu1 %v3754_v46  ;;  %v2907_v6 = vmul.f32 %v6048_v17, %v8708_v57 }
 0x49e   : > { %v6050_v56 = vpop.eup %6049 }
 0x49f   : > { %v2908_v61 = vmul.f32 %v6050_v56, %v8709_v28 }
 0x4a0   : > { %v6052_v47 = vpop.eup %6051 }
 0x4a1   : > { %v2940_v2 = vpack.c.bf16 %v2908_v61, %v2907_v6  ;;  %v2905_v50 = vmul.f32 %v6052_v47, %v8710_v12 }
 0x4a2   : > { %v6054_v49 = vpop.eup %6053 }
 0x4a3   : > { %v2906_v25 = vmul.f32 %v6054_v49, %v8711_v14  ;;  %5653 = vmatmul.mubr.msk.bf16.vlgmr.msra.gmra.mrb[100].mxu0 %vm2204_vm3, %v2940_v2 }
 0x4a5   : > { %v2938_v19 = vpack.c.bf16 %v2906_v25, %v2905_v50 }
 0x4a7   : > { %5647 = vmatmul.mubr.msk.bf16.vlgmr.msra.gmra.mrb[100].mxu1 %vm2204_vm3, %v2938_v19 }
 0x4e1   : > { %v5570_v43 = vpop.f32.mrb[72].mxu0 }
 0x4e2   : > { %v3872_v52 = vmul.f32 %v5570_v43, %v7404_v42  ;;  %v3042_v15 = vpop.f32.mrb[73].mxu0 }
 0x4e3   : > { %v5571_v0 = vpop.f32.mrb[74].mxu0 }
 0x4e4   : > { %v7407_v27 = vsub.f32 %v3042_v15, %v3872_v52  ;;  %v3873_v58 = vmul.f32 %v5571_v0, %v7404_v42  ;;  %v3045_v48 = vpop.f32.mrb[75].mxu0  ;;  %v5564_v62 = vpop.f32.mrb[72].mxu1 }
 0x4e5   : > { %v3870_v53 = vmul.f32 %v5564_v62, %v7404_v42  ;;  %v2984_v55 = vpop.f32.mrb[73].mxu1 }
 0x4e6   : > { %v7411_v7 = vsub.f32 %v3045_v48, %v3873_v58  ;;  %v3940_v34 = vsel %vm2204_vm3, %v7407_v27, 0.0  ;;  %v5565_v22 = vpop.f32.mrb[74].mxu1 }
 0x4e7   : > { %v7415_v3 = vsub.f32 %v2984_v55, %v3870_v53  ;;  %3941 = vadd.xlane.f32.xlu1 %v3940_v34  ;;  %v3871_v32 = vmul.f32 %v5565_v22, %v7404_v42  ;;  %v2987_v5 = vpop.f32.mrb[75].mxu1 }
 0x4e8   : > { %v3943_v33 = vsel %vm2204_vm3, %v7411_v7, 0.0 }
 0x4e9   : > { %v7420_v23 = vsub.f32 %v2987_v5, %v3871_v32  ;;  %3944 = vadd.xlane.f32.xlu0 %v3943_v33  ;;  %v5582_v10 = vpop.f32.mrb[76].mxu0  ;;  %v3934_v39 = vsel %vm2204_vm3, %v7415_v3, 0.0 }
 0x4ea   : > { %v3876_v59 = vmul.f32 %v5582_v10, %v7404_v42  ;;  %v3158_v36 = vpop.f32.mrb[77].mxu0 }
 0x4eb   : > { %3935 = vadd.xlane.f32.xlu1 %v3934_v39  ;;  %v5583_v9 = vpop.f32.mrb[78].mxu0  ;;  %v3937_v31 = vsel %vm2204_vm3, %v7420_v23, 0.0 }
 0x4ec   : > { %v7427_v24 = vsub.f32 %v3158_v36, %v3876_v59  ;;  %v3877_v1 = vmul.f32 %v5583_v9, %v7404_v42  ;;  %v3161_v60 = vpop.f32.mrb[79].mxu0  ;;  %v5576_v54 = vpop.f32.mrb[76].mxu1 }
 0x4ed   : > { %3938 = vadd.xlane.f32.xlu0 %v3937_v31  ;;  %v3874_v38 = vmul.f32 %v5576_v54, %v7404_v42  ;;  %v3100_v20 = vpop.f32.mrb[77].mxu1 }
 0x4ee   : > { %v7431_v63 = vsub.f32 %v3161_v60, %v3877_v1  ;;  %v3952_v41 = vsel %vm2204_vm3, %v7427_v24, 0.0  ;;  %v5577_v11 = vpop.f32.mrb[78].mxu1 }
 0x4ef   : > { %v7435_v35 = vsub.f32 %v3100_v20, %v3874_v38  ;;  %3953 = vadd.xlane.f32.xlu1 %v3952_v41  ;;  %v3875_v16 = vmul.f32 %v5577_v11, %v7404_v42  ;;  %v3103_v8 = vpop.f32.mrb[79].mxu1 }
 0x4f0   : > { %v3955_v21 = vsel %vm2204_vm3, %v7431_v63, 0.0 }
 0x4f1   : > { %v7440_v51 = vsub.f32 %v3103_v8, %v3875_v16  ;;  %3956 = vadd.xlane.f32.xlu0 %v3955_v21  ;;  %v5594_v13 = vpop.f32.mrb[80].mxu0  ;;  %v3946_v44 = vsel %vm2204_vm3, %v7435_v35, 0.0 }
 0x4f2   : > { %v3880_v30 = vmul.f32 %v5594_v13, %v7404_v42  ;;  %v3274_v37 = vpop.f32.mrb[81].mxu0 }
 0x4f3   : > { %3947 = vadd.xlane.f32.xlu1 %v3946_v44  ;;  %v5595_v29 = vpop.f32.mrb[82].mxu0  ;;  %v3949_v18 = vsel %vm2204_vm3, %v7440_v51, 0.0 }
 0x4f4   : > { %v7447_v4 = vsub.f32 %v3274_v37, %v3880_v30  ;;  %v3881_v26 = vmul.f32 %v5595_v29, %v7404_v42  ;;  %v3277_v45 = vpop.f32.mrb[83].mxu0  ;;  %v5588_v40 = vpop.f32.mrb[80].mxu1 }
 0x4f5   : > { %3950 = vadd.xlane.f32.xlu0 %v3949_v18  ;;  %v3878_v46 = vmul.f32 %v5588_v40, %v7404_v42  ;;  %v3216_v17 = vpop.f32.mrb[81].mxu1 }
 0x4f6   : > { %v7451_v56 = vsub.f32 %v3277_v45, %v3881_v26  ;;  %v3964_v57 = vsel %vm2204_vm3, %v7447_v4, 0.0  ;;  %v5589_v6 = vpop.f32.mrb[82].mxu1 }
 0x4f7   : > { %v7455_v28 = vsub.f32 %v3216_v17, %v3878_v46  ;;  %3965 = vadd.xlane.f32.xlu1 %v3964_v57  ;;  %v3879_v61 = vmul.f32 %v5589_v6, %v7404_v42  ;;  %v3219_v47 = vpop.f32.mrb[83].mxu1 }
 0x4f8   : > { %v3967_v2 = vsel %vm2204_vm3, %v7451_v56, 0.0 }
 0x4f9   : > { %v7460_v49 = vsub.f32 %v3219_v47, %v3879_v61  ;;  %3968 = vadd.xlane.f32.xlu0 %v3967_v2  ;;  %v5606_v12 = vpop.f32.mrb[84].mxu0  ;;  %v3958_v50 = vsel %vm2204_vm3, %v7455_v28, 0.0 }
 0x4fa   : > { %v3884_v14 = vmul.f32 %v5606_v12, %v7404_v42  ;;  %v3390_v25 = vpop.f32.mrb[85].mxu0 }
 0x4fb   : > { %3959 = vadd.xlane.f32.xlu1 %v3958_v50  ;;  %v5607_v19 = vpop.f32.mrb[86].mxu0  ;;  %v3961_v43 = vsel %vm2204_vm3, %v7460_v49, 0.0 }
 0x4fc   : > { %v7467_v52 = vsub.f32 %v3390_v25, %v3884_v14  ;;  %v3885_v15 = vmul.f32 %v5607_v19, %v7404_v42  ;;  %v3393_v0 = vpop.f32.mrb[87].mxu0  ;;  %v5600_v58 = vpop.f32.mrb[84].mxu1 }
 0x4fd   : > { %3962 = vadd.xlane.f32.xlu0 %v3961_v43  ;;  %v3882_v48 = vmul.f32 %v5600_v58, %v7404_v42  ;;  %v3332_v62 = vpop.f32.mrb[85].mxu1 }
 0x4fe   : > { %v7471_v53 = vsub.f32 %v3393_v0, %v3885_v15  ;;  %v5601_v55 = vpop.f32.mrb[86].mxu1 }
 0x4ff   : > { %v7473_v34 = vsub.f32 %v3332_v62, %v3882_v48  ;;  %v3883_v22 = vmul.f32 %v5601_v55, %v7404_v42  ;;  %v3335_v32 = vpop.f32.mrb[87].mxu1 }
 0x501   : > { %v7476_v5 = vsub.f32 %v3335_v32, %v3883_v22  ;;  %v3970_v33 = vsel %vm2204_vm3, %v7473_v34, 0.0 }
 0x502   : > { %3971 = vadd.xlane.f32.xlu1 %v3970_v33 }
 0x503   : > { %v3973_v10 = vsel %vm2204_vm3, %v7476_v5, 0.0 }
 0x504   : > { %3974 = vadd.xlane.f32.xlu0 %v3973_v10 }
 0x54e   : > { %v5618_v39 = vpop.f32.mrb[88].mxu0 }
 0x54f   : > { %v3888_v59 = vmul.f32 %v5618_v39, %v7404_v42  ;;  %v3506_v36 = vpop.f32.mrb[89].mxu0 }
 0x550   : > { %v5619_v9 = vpop.f32.mrb[90].mxu0 }
 0x551   : > { %v7483_v31 = vsub.f32 %v3506_v36, %v3888_v59  ;;  %v3889_v1 = vmul.f32 %v5619_v9, %v7404_v42  ;;  %v3509_v60 = vpop.f32.mrb[91].mxu0 }
 0x552   : > { %v5612_v54 = vpop.f32.mrb[88].mxu1 }
 0x553   : > { %v7486_v38 = vsub.f32 %v3509_v60, %v3889_v1  ;;  %v3886_v20 = vmul.f32 %v5612_v54, %v7404_v42  ;;  %v3448_v41 = vpop.f32.mrb[89].mxu1  ;;  %v3988_v11 = vsel %vm2204_vm3, %v7483_v31, 0.0 }
 0x554   : > { %3989 = vadd.xlane.f32.xlu0 %v3988_v11  ;;  %v5613_v16 = vpop.f32.mrb[90].mxu1 }
 0x555   : > { %v7491_v8 = vsub.f32 %v3448_v41, %v3886_v20  ;;  %v3887_v21 = vmul.f32 %v5613_v16, %v7404_v42  ;;  %v3451_v13 = vpop.f32.mrb[91].mxu1  ;;  %v3991_v29 = vsel %vm2204_vm3, %v7486_v38, 0.0 }
 0x557   : > { %v7494_v44 = vsub.f32 %v3451_v13, %v3887_v21  ;;  %v3982_v30 = vsel %vm2204_vm3, %v7491_v8, 0.0 }
 0x558   : > { %3983 = vadd.xlane.f32.xlu0 %v3982_v30 }
 0x559   : > { %v3985_v37 = vsel %vm2204_vm3, %v7494_v44, 0.0 }
 0x55a   : > { %3986 = vadd.xlane.f32.xlu1 %v3985_v37 }
 0x55c   : > { %3992 = vadd.xlane.f32.xlu0 %v3991_v29 }
 0x55e   : > { %v5630_v18 = vpop.f32.mrb[92].mxu0 }
 0x55f   : > { %v3892_v26 = vmul.f32 %v5630_v18, %v7404_v42  ;;  %v3622_v45 = vpop.f32.mrb[93].mxu0 }
 0x560   : > { %v5631_v40 = vpop.f32.mrb[94].mxu0 }
 0x561   : > { %v7503_v46 = vsub.f32 %v3622_v45, %v3892_v26  ;;  %v3893_v17 = vmul.f32 %v5631_v40, %v7404_v42  ;;  %v3625_v57 = vpop.f32.mrb[95].mxu0 }
 0x562   : > { %v5624_v6 = vpop.f32.mrb[92].mxu1 }
 0x563   : > { %v7506_v61 = vsub.f32 %v3625_v57, %v3893_v17  ;;  %v3890_v47 = vmul.f32 %v5624_v6, %v7404_v42  ;;  %v3564_v2 = vpop.f32.mrb[93].mxu1  ;;  %v4000_v12 = vsel %vm2204_vm3, %v7503_v46, 0.0 }
 0x564   : > { %4001 = vadd.xlane.f32.xlu1 %v4000_v12  ;;  %v5625_v50 = vpop.f32.mrb[94].mxu1 }
 0x565   : > { %v7511_v14 = vsub.f32 %v3564_v2, %v3890_v47  ;;  %v3891_v25 = vmul.f32 %v5625_v50, %v7404_v42  ;;  %v3567_v19 = vpop.f32.mrb[95].mxu1  ;;  %v4003_v43 = vsel %vm2204_vm3, %v7506_v61, 0.0 }
 0x566   : > { %4004 = vadd.xlane.f32.xlu0 %v4003_v43 }
 0x567   : > { %v7516_v15 = vsub.f32 %v3567_v19, %v3891_v25  ;;  %v3994_v0 = vsel %vm2204_vm3, %v7511_v14, 0.0 }
 0x568   : > { %3995 = vadd.xlane.f32.xlu1 %v3994_v0 }
 0x569   : > { %v3997_v58 = vsel %vm2204_vm3, %v7516_v15, 0.0 }
 0x56a   : > { %3998 = vadd.xlane.f32.xlu0 %v3997_v58  ;;  %v5642_v48 = vpop.f32.mrb[96].mxu0 }
 0x56b   : > { %v3896_v62 = vmul.f32 %v5642_v48, %v7404_v42  ;;  %v3738_v55 = vpop.f32.mrb[97].mxu0 }
 0x56c   : > { %v5643_v22 = vpop.f32.mrb[98].mxu0 }
 0x56d   : > { %v7523_v32 = vsub.f32 %v3738_v55, %v3896_v62  ;;  %v3897_v33 = vmul.f32 %v5643_v22, %v7404_v42  ;;  %v3741_v10 = vpop.f32.mrb[99].mxu0 }
 0x56e   : > { %v5636_v39 = vpop.f32.mrb[96].mxu1 }
 0x56f   : > { %v7526_v59 = vsub.f32 %v3741_v10, %v3897_v33  ;;  %v3894_v36 = vmul.f32 %v5636_v39, %v7404_v42  ;;  %v3680_v9 = vpop.f32.mrb[97].mxu1  ;;  %v4012_v1 = vsel %vm2204_vm3, %v7523_v32, 0.0 }
 0x570   : > { %4013 = vadd.xlane.f32.xlu1 %v4012_v1  ;;  %v5637_v60 = vpop.f32.mrb[98].mxu1 }
 0x571   : > { %v7531_v54 = vsub.f32 %v3680_v9, %v3894_v36  ;;  %v3895_v20 = vmul.f32 %v5637_v60, %v7404_v42  ;;  %v3683_v41 = vpop.f32.mrb[99].mxu1  ;;  %v4015_v11 = vsel %vm2204_vm3, %v7526_v59, 0.0 }
 0x572   : > { %4016 = vadd.xlane.f32.xlu0 %v4015_v11 }
 0x573   : > { %v7536_v16 = vsub.f32 %v3683_v41, %v3895_v20  ;;  %v4006_v21 = vsel %vm2204_vm3, %v7531_v54, 0.0 }
 0x574   : > { %v3942_v13 = vpop.xlane.xlu1 %3941  ;;  %4007 = vadd.xlane.f32.xlu1 %v4006_v21 }
 0x575   : > { %v4009_v30 = vsel %vm2204_vm3, %v7536_v16, 0.0  ;;  %v4033_v19 = vmul.f32 0.0625, %v3942_v13 }
 0x576   : > { %v3945_v37 = vpop.xlane.xlu0 %3944  ;;  %4010 = vadd.xlane.f32.xlu0 %v4009_v30  ;;  %v5654_v29 = vpop.f32.mrb[100].mxu0 }
 0x577   : > { %v3900_v18 = vmul.f32 %v5654_v29, %v7404_v42  ;;  %v3854_v26 = vpop.f32.mrb[101].mxu0  ;;  %v4034_v22 = vmul.f32 0.0625, %v3945_v37  ;;  %v7561_v9 = vsub.f32 %v7407_v27, %v4033_v19  ;;  %v3976_v27 = vsel %vm2204_vm3, %v7467_v52, 0.0 }
 0x578   : > { %v3936_v45 = vpop.xlane.xlu1 %3935  ;;  %v5655_v40 = vpop.f32.mrb[102].mxu0 }
 0x579   : > { %v7543_v17 = vsub.f32 %v3854_v26, %v3900_v18  ;;  %v3901_v57 = vmul.f32 %v5655_v40, %v7404_v42  ;;  %v3857_v6 = vpop.f32.mrb[103].mxu0  ;;  %v4031_v1 = vmul.f32 0.0625, %v3936_v45  ;;  %v7566_v20 = vsub.f32 %v7411_v7, %v4034_v22 }
 0x57a   : > { %v3939_v47 = vpop.xlane.xlu0 %3938  ;;  %v5648_v2 = vpop.f32.mrb[100].mxu1  ;;  %v4097_v30 = vmul.f32 %v7561_v9, %v7561_v9  ;;  %v3979_v7 = vsel %vm2204_vm3, %v7471_v53, 0.0 }
 0x57b   : > { %v7546_v12 = vsub.f32 %v3857_v6, %v3901_v57  ;;  %v3898_v50 = vmul.f32 %v5648_v2, %v7404_v42  ;;  %v3796_v25 = vpop.f32.mrb[101].mxu1  ;;  %v4024_v0 = vsel %vm2204_vm3, %v7543_v17, 0.0  ;;  %v4032_v41 = vmul.f32 0.0625, %v3939_v47 }
 0x57c   : > { %v3954_v43 = vpop.xlane.xlu1 %3953  ;;  %v5649_v58 = vpop.f32.mrb[102].mxu1  ;;  %4025 = vadd.xlane.f32.xlu1 %v4024_v0  ;;  %v7569_v21 = vsub.f32 %v7415_v3, %v4031_v1  ;;  %v4098_v18 = vmul.f32 %v7566_v20, %v7566_v20  ;;  %v4133_v40 = vsel %vm2204_vm3, %v4097_v30, 0.0 }
 0x57d   : > { %v7551_v48 = vsub.f32 %v3796_v25, %v3898_v50  ;;  %v3899_v62 = vmul.f32 %v5649_v58, %v7404_v42  ;;  %v3799_v55 = vpop.f32.mrb[103].mxu1  ;;  %v4027_v10 = vsel %vm2204_vm3, %v7546_v12, 0.0  ;;  %v4037_v13 = vmul.f32 0.0625, %v3954_v43 }
 0x57e   : > { %v3957_v33 = vpop.xlane.xlu0 %3956  ;;  %4028 = vadd.xlane.f32.xlu0 %v4027_v10  ;;  %v7576_v37 = vsub.f32 %v7420_v23, %v4032_v41  ;;  %v4095_v57 = vmul.f32 %v7569_v21, %v7569_v21  ;;  %v4136_v2 = vsel %vm2204_vm3, %v4098_v18, 0.0 }
 0x57f   : > { %v7556_v39 = vsub.f32 %v3799_v55, %v3899_v62  ;;  %v4018_v36 = vsel %vm2204_vm3, %v7551_v48, 0.0  ;;  %v4038_v29 = vmul.f32 0.0625, %v3957_v33  ;;  %v7583_v26 = vsub.f32 %v7427_v24, %v4037_v13 }
 0x580   : > { %v3948_v60 = vpop.xlane.xlu1 %3947  ;;  %4019 = vadd.xlane.f32.xlu1 %v4018_v36  ;;  %v4096_v50 = vmul.f32 %v7576_v37, %v7576_v37  ;;  %v4127_v19 = vsel %vm2204_vm3, %v4095_v57, 0.0 }
 0x581   : > { %v4021_v42 = vsel %vm2204_vm3, %v7556_v39, 0.0  ;;  %v4035_v45 = vmul.f32 0.0625, %v3948_v60  ;;  %v7589_v6 = vsub.f32 %v7431_v63, %v4038_v29  ;;  %v4101_v43 = vmul.f32 %v7583_v26, %v7583_v26 }
 0x582   : > { %v3951_v11 = vpop.xlane.xlu0 %3950  ;;  %4022 = vadd.xlane.f32.xlu0 %v4021_v42  ;;  %v4130_v62 = vsel %vm2204_vm3, %v4096_v50, 0.0 }
 0x583   : > { %v4036_v47 = vmul.f32 0.0625, %v3951_v11  ;;  %v7595_v24 = vsub.f32 %v7435_v35, %v4035_v45  ;;  %v4102_v55 = vmul.f32 %v7589_v6, %v7589_v6  ;;  %v4145_v10 = vsel %vm2204_vm3, %v4101_v43, 0.0 }
 0x584   : > { %3977 = vadd.xlane.f32.xlu1 %v3976_v27  ;;  %v3966_v3 = vpop.xlane.xlu1 %3965 }
 0x585   : > { %v4041_v25 = vmul.f32 0.0625, %v3966_v3  ;;  %v7601_v63 = vsub.f32 %v7440_v51, %v4036_v47  ;;  %v4099_v36 = vmul.f32 %v7595_v24, %v7595_v24  ;;  %v4148_v42 = vsel %vm2204_vm3, %v4102_v55, 0.0 }
 0x586   : > { %3980 = vadd.xlane.f32.xlu0 %v3979_v7  ;;  %v3969_v23 = vpop.xlane.xlu0 %3968 }
 0x587   : > { %v4042_v58 = vmul.f32 0.0625, %v3969_v23  ;;  %v7607_v35 = vsub.f32 %v7447_v4, %v4041_v25  ;;  %v4100_v41 = vmul.f32 %v7601_v63, %v7601_v63  ;;  %v4139_v27 = vsel %vm2204_vm3, %v4099_v36, 0.0 }
 0x588   : > { %4134 = vadd.xlane.f32.xlu1 %v4133_v40  ;;  %v3960_v0 = vpop.xlane.xlu1 %3959 }
 0x589   : > { %v4039_v33 = vmul.f32 0.0625, %v3960_v0  ;;  %v7613_v51 = vsub.f32 %v7451_v56, %v4042_v58  ;;  %v4105_v30 = vmul.f32 %v7607_v35, %v7607_v35  ;;  %v4142_v7 = vsel %vm2204_vm3, %v4100_v41, 0.0 }
 0x58a   : > { %4137 = vadd.xlane.f32.xlu0 %v4136_v2  ;;  %v3963_v22 = vpop.xlane.xlu0 %3962 }
 0x58b   : > { %v4040_v60 = vmul.f32 0.0625, %v3963_v22  ;;  %v7619_v4 = vsub.f32 %v7455_v28, %v4039_v33  ;;  %v4106_v18 = vmul.f32 %v7613_v51, %v7613_v51  ;;  %v4157_v3 = vsel %vm2204_vm3, %v4105_v30, 0.0 }
 0x58c   : > { %4128 = vadd.xlane.f32.xlu1 %v4127_v19 }
 0x58d   : > { %v7625_v56 = vsub.f32 %v7460_v49, %v4040_v60  ;;  %v4103_v45 = vmul.f32 %v7619_v4, %v7619_v4  ;;  %v4160_v49 = vsel %vm2204_vm3, %v4106_v18, 0.0 }
 0x58e   : > { %4131 = vadd.xlane.f32.xlu0 %v4130_v62 }
 0x58f   : > { %v3972_v1 = vpop.xlane.xlu1 %3971  ;;  %v4104_v57 = vmul.f32 %v7625_v56, %v7625_v56  ;;  %v4151_v23 = vsel %vm2204_vm3, %v4103_v45, 0.0 }
 0x590   : > { %4146 = vadd.xlane.f32.xlu1 %v4145_v10  ;;  %v4043_v13 = vmul.f32 0.0625, %v3972_v1 }
 0x591   : > { %v3975_v11 = vpop.xlane.xlu0 %3974  ;;  %v4154_v47 = vsel %vm2204_vm3, %v4104_v57, 0.0 }
 0x592   : > { %4149 = vadd.xlane.f32.xlu0 %v4148_v42  ;;  %v4044_v29 = vmul.f32 0.0625, %v3975_v11  ;;  %v7631_v28 = vsub.f32 %v7473_v34, %v4043_v13 }
 0x594   : > { %4140 = vadd.xlane.f32.xlu1 %v4139_v27  ;;  %v7637_v40 = vsub.f32 %v7476_v5, %v4044_v29  ;;  %v4107_v34 = vmul.f32 %v7631_v28, %v7631_v28 }
 0x596   : > { %4143 = vadd.xlane.f32.xlu0 %v4142_v7  ;;  %v4108_v2 = vmul.f32 %v7637_v40, %v7637_v40  ;;  %v4163_v5 = vsel %vm2204_vm3, %v4107_v34, 0.0 }
 0x598   : > { %4158 = vadd.xlane.f32.xlu1 %v4157_v3  ;;  %v4166_v50 = vsel %vm2204_vm3, %v4108_v2, 0.0 }
 0x59a   : > { %4161 = vadd.xlane.f32.xlu0 %v4160_v49 }
 0x59c   : > { %4152 = vadd.xlane.f32.xlu1 %v4151_v23 }
 0x59e   : > { %4155 = vadd.xlane.f32.xlu0 %v4154_v47 }
 0x5a0   : > { %4164 = vadd.xlane.f32.xlu1 %v4163_v5 }
 0x5a2   : > { %4167 = vadd.xlane.f32.xlu0 %v4166_v50 }
 0x5e1   : > { %v3990_v25 = vpop.xlane.xlu0 %3989 }
 0x5e2   : > { %v4049_v19 = vmul.f32 0.0625, %v3990_v25 }
 0x5e4   : > { %v7651_v43 = vsub.f32 %v7483_v31, %v4049_v19 }
 0x5e5   : > { %v3984_v0 = vpop.xlane.xlu0 %3983 }
 0x5e6   : > { %v4047_v58 = vmul.f32 0.0625, %v3984_v0  ;;  %v4113_v62 = vmul.f32 %v7651_v43, %v7651_v43 }
 0x5e7   : > { %v3987_v55 = vpop.xlane.xlu1 %3986 }
 0x5e8   : > { %v7656_v22 = vsub.f32 %v7491_v8, %v4047_v58  ;;  %v4048_v33 = vmul.f32 0.0625, %v3987_v55  ;;  %v4181_v10 = vsel %vm2204_vm3, %v4113_v62, 0.0 }
 0x5e9   : > { %4182 = vadd.xlane.f32.xlu1 %v4181_v10  ;;  %v3993_v36 = vpop.xlane.xlu0 %3992 }
 0x5ea   : > { %v4050_v1 = vmul.f32 0.0625, %v3993_v36  ;;  %v4111_v60 = vmul.f32 %v7656_v22, %v7656_v22  ;;  %v7662_v31 = vsub.f32 %v7494_v44, %v4048_v33 }
 0x5ec   : > { %v7665_v42 = vsub.f32 %v7486_v38, %v4050_v1  ;;  %v4175_v41 = vsel %vm2204_vm3, %v4111_v60, 0.0  ;;  %v4112_v13 = vmul.f32 %v7662_v31, %v7662_v31 }
 0x5ed   : > { %4176 = vadd.xlane.f32.xlu1 %v4175_v41 }
 0x5ee   : > { %v4114_v8 = vmul.f32 %v7665_v42, %v7665_v42  ;;  %v4178_v7 = vsel %vm2204_vm3, %v4112_v13, 0.0 }
 0x5f0   : > { %v4184_v11 = vsel %vm2204_vm3, %v4114_v8, 0.0 }
 0x5f1   : > { %v4002_v27 = vpop.xlane.xlu1 %4001  ;;  %4185 = vadd.xlane.f32.xlu0 %v4184_v11 }
 0x5f2   : > { %v4053_v30 = vmul.f32 0.0625, %v4002_v27 }
 0x5f3   : > { %v4005_v29 = vpop.xlane.xlu0 %4004 }
 0x5f4   : > { %v7674_v44 = vsub.f32 %v7503_v46, %v4053_v30  ;;  %v4054_v38 = vmul.f32 0.0625, %v4005_v29 }
 0x5f5   : > { %v3996_v18 = vpop.xlane.xlu1 %3995  ;;  %4179 = vadd.xlane.f32.xlu0 %v4178_v7 }
 0x5f6   : > { %v7678_v3 = vsub.f32 %v7506_v61, %v4054_v38  ;;  %v4051_v45 = vmul.f32 0.0625, %v3996_v18  ;;  %v4117_v49 = vmul.f32 %v7674_v44, %v7674_v44 }
 0x5f7   : > { %v3999_v57 = vpop.xlane.xlu0 %3998 }
 0x5f8   : > { %v7683_v23 = vsub.f32 %v7511_v14, %v4051_v45  ;;  %v4052_v34 = vmul.f32 0.0625, %v3999_v57  ;;  %v4193_v46 = vsel %vm2204_vm3, %v4117_v49, 0.0  ;;  %v4118_v47 = vmul.f32 %v7678_v3, %v7678_v3 }
 0x5f9   : > { %4194 = vadd.xlane.f32.xlu1 %v4193_v46 }
 0x5fa   : > { %v7689_v2 = vsub.f32 %v7516_v15, %v4052_v34  ;;  %v4196_v61 = vsel %vm2204_vm3, %v4118_v47, 0.0  ;;  %v4115_v5 = vmul.f32 %v7683_v23, %v7683_v23 }
 0x5fb   : > { %4197 = vadd.xlane.f32.xlu0 %v4196_v61 }
 0x5fc   : > { %v4187_v50 = vsel %vm2204_vm3, %v4115_v5, 0.0  ;;  %v4116_v14 = vmul.f32 %v7689_v2, %v7689_v2 }
 0x5fd   : > { %v4014_v25 = vpop.xlane.xlu1 %4013  ;;  %4188 = vadd.xlane.f32.xlu1 %v4187_v50 }
 0x5fe   : > { %v4057_v19 = vmul.f32 0.0625, %v4014_v25  ;;  %v4190_v0 = vsel %vm2204_vm3, %v4116_v14, 0.0 }
 0x5ff   : > { %4191 = vadd.xlane.f32.xlu0 %v4190_v0  ;;  %v4017_v58 = vpop.xlane.xlu0 %4016 }
 0x600   : > { %v7699_v15 = vsub.f32 %v7523_v32, %v4057_v19  ;;  %v4058_v62 = vmul.f32 0.0625, %v4017_v58 }
 0x601   : > { %v4008_v55 = vpop.xlane.xlu1 %4007 }
 0x602   : > { %v7702_v33 = vsub.f32 %v7526_v59, %v4058_v62  ;;  %v4055_v10 = vmul.f32 0.0625, %v4008_v55  ;;  %v4121_v36 = vmul.f32 %v7699_v15, %v7699_v15 }
 0x603   : > { %v4011_v1 = vpop.xlane.xlu0 %4010 }
 0x604   : > { %v7707_v60 = vsub.f32 %v7531_v54, %v4055_v10  ;;  %v4056_v41 = vmul.f32 0.0625, %v4011_v1  ;;  %v4205_v8 = vsel %vm2204_vm3, %v4121_v36, 0.0  ;;  %v4122_v32 = vmul.f32 %v7702_v33, %v7702_v33 }
 0x605   : > { %4206 = vadd.xlane.f32.xlu1 %v4205_v8 }
 0x606   : > { %v7713_v11 = vsub.f32 %v7536_v16, %v4056_v41  ;;  %v4208_v59 = vsel %vm2204_vm3, %v4122_v32, 0.0  ;;  %v4119_v13 = vmul.f32 %v7707_v60, %v7707_v60 }
 0x607   : > { %4209 = vadd.xlane.f32.xlu0 %v4208_v59 }
 0x608   : > { %v4199_v27 = vsel %vm2204_vm3, %v4119_v13, 0.0  ;;  %v4120_v54 = vmul.f32 %v7713_v11, %v7713_v11 }
 0x609   : > { %4200 = vadd.xlane.f32.xlu1 %v4199_v27  ;;  %v4026_v30 = vpop.xlane.xlu1 %4025 }
 0x60a   : > { %v4202_v29 = vsel %vm2204_vm3, %v4120_v54, 0.0  ;;  %v4061_v38 = vmul.f32 0.0625, %v4026_v30 }
 0x60b   : > { %4203 = vadd.xlane.f32.xlu0 %v4202_v29  ;;  %v4029_v7 = vpop.xlane.xlu0 %4028 }
 0x60c   : > { %v7723_v16 = vsub.f32 %v7543_v17, %v4061_v38  ;;  %v4062_v18 = vmul.f32 0.0625, %v4029_v7 }
 0x60d   : > { %v4020_v45 = vpop.xlane.xlu1 %4019 }
 0x60e   : > { %v7726_v49 = vsub.f32 %v7546_v12, %v4062_v18  ;;  %v4059_v57 = vmul.f32 0.0625, %v4020_v45  ;;  %v4125_v34 = vmul.f32 %v7723_v16, %v7723_v16 }
 0x60f   : > { %v4023_v46 = vpop.xlane.xlu0 %4022 }
 0x610   : > { %v7731_v47 = vsub.f32 %v7551_v48, %v4059_v57  ;;  %v4060_v61 = vmul.f32 0.0625, %v4023_v46  ;;  %v4217_v5 = vsel %vm2204_vm3, %v4125_v34, 0.0  ;;  %v4126_v17 = vmul.f32 %v7726_v49, %v7726_v49 }
 0x611   : > { %v3978_v50 = vpop.xlane.xlu1 %3977  ;;  %4218 = vadd.xlane.f32.xlu1 %v4217_v5 }
 0x612   : > { %v7737_v14 = vsub.f32 %v7556_v39, %v4060_v61  ;;  %v4045_v12 = vmul.f32 0.0625, %v3978_v50  ;;  %v4220_v25 = vsel %vm2204_vm3, %v4126_v17, 0.0  ;;  %v4123_v19 = vmul.f32 %v7731_v47, %v7731_v47 }
 0x613   : > { %4221 = vadd.xlane.f32.xlu0 %v4220_v25  ;;  %v3981_v48 = vpop.xlane.xlu0 %3980 }
 0x614   : > { %v7743_v0 = vsub.f32 %v7467_v52, %v4045_v12  ;;  %v4046_v58 = vmul.f32 0.0625, %v3981_v48  ;;  %v4211_v62 = vsel %vm2204_vm3, %v4123_v19, 0.0  ;;  %v4124_v55 = vmul.f32 %v7737_v14, %v7737_v14 }
 0x615   : > { %v4135_v10 = vpop.xlane.xlu1 %4134  ;;  %4212 = vadd.xlane.f32.xlu1 %v4211_v62 }
 0x616   : > { %v7749_v39 = vsub.f32 %v7471_v53, %v4046_v58  ;;  %v4214_v36 = vsel %vm2204_vm3, %v4124_v55, 0.0  ;;  %v4109_v1 = vmul.f32 %v7743_v0, %v7743_v0  ;;  %v4225_v7 = vmul.f32 0.0625, %v4135_v10 }
 0x617   : > { %4215 = vadd.xlane.f32.xlu0 %v4214_v36  ;;  %v4138_v41 = vpop.xlane.xlu0 %4137 }
 0x618   : > { %v4169_v52 = vsel %vm2204_vm3, %v4109_v1, 0.0  ;;  %v4110_v8 = vmul.f32 %v7749_v39, %v7749_v39  ;;  %v4226_v18 = vmul.f32 0.0625, %v4138_v41  ;;  %v4259_v46 = vadd.f32 1e-05, %v4225_v7 }
 0x619   : > { %4170 = vadd.xlane.f32.xlu1 %v4169_v52  ;;  %v4129_v59 = vpop.xlane.xlu1 %4128 }
 0x61a   : > { %v4172_v32 = vsel %vm2204_vm3, %v4110_v8, 0.0  ;;  %v4223_v57 = vmul.f32 0.0625, %v4129_v59  ;;  %v4260_v17 = vadd.f32 1e-05, %v4226_v18  ;;  %6055 = vrsqrt.f32 %v4259_v46 }
 0x61b   : > { %4173 = vadd.xlane.f32.xlu0 %v4172_v32  ;;  %v4132_v13 = vpop.xlane.xlu0 %4131 }
 0x61c   : > { %v4224_v34 = vmul.f32 0.0625, %v4132_v13  ;;  %v4257_v12 = vadd.f32 1e-05, %v4223_v57  ;;  %6057 = vrsqrt.f32 %v4260_v17 }
 0x61d   : > { %v4147_v53 = vpop.xlane.xlu1 %4146 }
 0x61e   : > { %v4229_v61 = vmul.f32 0.0625, %v4147_v53  ;;  %v4258_v19 = vadd.f32 1e-05, %v4224_v34  ;;  %6059 = vrsqrt.f32 %v4257_v12 }
 0x61f   : > { %v4150_v27 = vpop.xlane.xlu0 %4149 }
 0x620   : > { %v4230_v50 = vmul.f32 0.0625, %v4150_v27  ;;  %v4263_v62 = vadd.f32 1e-05, %v4229_v61  ;;  %6061 = vrsqrt.f32 %v4258_v19 }
 0x621   : > { %v4141_v54 = vpop.xlane.xlu1 %4140 }
 0x622   : > { %v4227_v25 = vmul.f32 0.0625, %v4141_v54  ;;  %v4264_v36 = vadd.f32 1e-05, %v4230_v50  ;;  %6063 = vrsqrt.f32 %v4263_v62 }
 0x623   : > { %v4144_v30 = vpop.xlane.xlu0 %4143 }
 0x624   : > { %v4228_v48 = vmul.f32 0.0625, %v4144_v30  ;;  %v4261_v1 = vadd.f32 1e-05, %v4227_v25  ;;  %6065 = vrsqrt.f32 %v4264_v36  ;;  %v6056_v7 = vpop.eup %6055 }
 0x625   : > { %v4159_v29 = vpop.xlane.xlu1 %4158  ;;  %v4323_v25 = vmul.f32 %v6056_v7, %v7561_v9 }
 0x626   : > { %v4233_v55 = vmul.f32 0.0625, %v4159_v29  ;;  %v4262_v8 = vadd.f32 1e-05, %v4228_v48  ;;  %6067 = vrsqrt.f32 %v4261_v1  ;;  %v6058_v18 = vpop.eup %6057 }
 0x627   : > { %v4162_v38 = vpop.xlane.xlu0 %4161  ;;  %v4324_v36 = vmul.f32 %v6058_v18, %v7566_v20  ;;  %v7779_v20 = vld [vmem:[%s8593_s4] ss:$0 sm:$0xff] }
 0x628   : > { %v4234_v10 = vmul.f32 0.0625, %v4162_v38  ;;  %v4267_v59 = vadd.f32 1e-05, %v4233_v55  ;;  %6069 = vrsqrt.f32 %v4262_v8  ;;  %v6060_v57 = vpop.eup %6059 }
 0x629   : > { %v4153_v45 = vpop.xlane.xlu1 %4152  ;;  %v4321_v19 = vmul.f32 %v6060_v57, %v7569_v21 }
 0x62a   : > { %v4231_v32 = vmul.f32 0.0625, %v4153_v45  ;;  %v4268_v53 = vadd.f32 1e-05, %v4234_v10  ;;  %6071 = vrsqrt.f32 %v4267_v59  ;;  %v6062_v45 = vpop.eup %6061 }
 0x62b   : > { %v4156_v5 = vpop.xlane.xlu0 %4155  ;;  %v4322_v10 = vmul.f32 %v6062_v45, %v7576_v37 }
 0x62c   : > { %v4232_v13 = vmul.f32 0.0625, %v4156_v5  ;;  %v4265_v30 = vadd.f32 1e-05, %v4231_v32  ;;  %6073 = vrsqrt.f32 %v4268_v53  ;;  %v6064_v34 = vpop.eup %6063 }
 0x62d   : > { %v4165_v58 = vpop.xlane.xlu1 %4164  ;;  %v4327_v1 = vmul.f32 %v6064_v34, %v7583_v26 }
 0x62e   : > { %v4235_v41 = vmul.f32 0.0625, %v4165_v58  ;;  %v4266_v29 = vadd.f32 1e-05, %v4232_v13  ;;  %v6066_v46 = vpop.eup %6065  ;;  %v7763_v58 = vld [vmem:[%s8592_s3] ss:$0 sm:$0xff] }
 0x62f   : > { %v4168_v52 = vpop.xlane.xlu0 %4167  ;;  %v4328_v9 = vmul.f32 %v6066_v46, %v7589_v6  ;;  %v4361_v8 = vmul.f32 %v7763_v58, %v4323_v25  ;;  %v4359_v32 = vmul.f32 %v7763_v58, %v4321_v19  ;;  %v4365_v13 = vmul.f32 %v7763_v58, %v4327_v1 }
 0x630   : > { %v4236_v27 = vmul.f32 0.0625, %v4168_v52  ;;  %v4269_v54 = vadd.f32 1e-05, %v4235_v41  ;;  %v6068_v61 = vpop.eup %6067 }
 0x631   : > { %v4325_v62 = vmul.f32 %v6068_v61, %v7595_v24  ;;  %v4403_v57 = vadd.f32 %v7779_v20, %v4365_v13 }
 0x632   : > { %v4270_v38 = vadd.f32 1e-05, %v4236_v27  ;;  %6075 = vrsqrt.f32 %v4269_v54  ;;  %v6070_v5 = vpop.eup %6069  ;;  %v4399_v54 = vadd.f32 %v7779_v20, %v4361_v8 }
 0x633   : > { %6077 = vrsqrt.f32 %v4265_v30  ;;  %v4326_v24 = vmul.f32 %v6070_v5, %v7601_v63  ;;  %v4363_v37 = vmul.f32 %v7763_v58, %v4325_v62 }
 0x634   : > { %6079 = vrsqrt.f32 %v4266_v29  ;;  %v6072_v17 = vpop.eup %6071  ;;  %v7805_v5 = vmul.f32 0.8, %v4399_v54 }
 0x635   : > { %6081 = vrsqrt.f32 %v4270_v38  ;;  %v4331_v21 = vmul.f32 %v6072_v17, %v7607_v35  ;;  %v4362_v35 = vmul.f32 %v7763_v58, %v4324_v36  ;;  %v4401_v29 = vadd.f32 %v7779_v20, %v4363_v37 }
 0x636   : > { %v6074_v50 = vpop.eup %6073  ;;  %v7819_v36 = vmul.f32 0.8, %v4403_v57 }
 0x637   : > { %v4332_v26 = vmul.f32 %v6074_v50, %v7613_v51  ;;  %v4369_v53 = vmul.f32 %v7763_v58, %v4331_v21  ;;  %v4397_v51 = vadd.f32 %v7779_v20, %v4359_v32  ;;  %v4400_v7 = vadd.f32 %v7779_v20, %v4362_v35 }
 0x638   : > { %v7811_v25 = vmul.f32 0.8, %v4401_v29  ;;  %v4619_v32 = vrot.slane %v7805_v5, 3  ;;  %v4623_v35 = vrot.slane %v7819_v36, 1 }
 0x639   : > { %v4370_v38 = vmul.f32 %v7763_v58, %v4332_v26  ;;  %v4407_v46 = vadd.f32 %v7779_v20, %v4369_v53  ;;  %v7807_v17 = vmul.f32 0.8, %v4397_v51  ;;  %v7815_v62 = vmul.f32 0.8, %v4400_v7 }
 0x63a   : > { %v4621_v37 = vrot.slane %v7811_v25, 2  ;;  %v4472_v53 = vrot.slane %v7811_v25, 6  ;;  %v4475_v51 = vrot.slane %v7819_v36, 5 }
 0x63b   : > { %v4408_v19 = vadd.f32 %v7779_v20, %v4370_v38  ;;  %v4618_v8 = vrot.slane %v7807_v17, 4  ;;  %v4779_v57 = vrot.slane %v7815_v62, 7 }
 0x63c   : > { %v6076_v12 = vpop.eup %6075 }
 0x63d   : > { %v6078_v48 = vpop.eup %6077  ;;  %v4333_v52 = vmul.f32 %v6076_v12, %v7631_v28  ;;  %v4360_v28 = vmul.f32 %v7763_v58, %v4322_v10 }
 0x63e   : > { %v6080_v55 = vpop.eup %6079  ;;  %v4329_v59 = vmul.f32 %v6078_v48, %v7619_v4  ;;  %v4366_v4 = vmul.f32 %v7763_v58, %v4328_v9 }
 0x63f   : > { %v6082_v41 = vpop.eup %6081  ;;  %v4330_v6 = vmul.f32 %v6080_v55, %v7625_v56  ;;  %v4371_v27 = vmul.f32 %v7763_v58, %v4333_v52  ;;  %v4364_v56 = vmul.f32 %v7763_v58, %v4326_v24  ;;  %v4398_v18 = vadd.f32 %v7779_v20, %v4360_v28 }
 0x640   : > { %v4334_v63 = vmul.f32 %v6082_v41, %v7637_v40  ;;  %v4367_v30 = vmul.f32 %v7763_v58, %v4329_v59  ;;  %v4404_v34 = vadd.f32 %v7779_v20, %v4366_v4  ;;  %v7824_v41 = vmul.f32 0.8, %v4407_v46 }
 0x641   : > { %v4368_v40 = vmul.f32 %v7763_v58, %v4330_v6  ;;  %v4409_v61 = vadd.f32 %v7779_v20, %v4371_v27  ;;  %v4402_v50 = vadd.f32 %v7779_v20, %v4364_v56  ;;  %v7817_v55 = vmul.f32 0.8, %v4398_v18 }
 0x642   : > { %v4372_v45 = vmul.f32 %v7763_v58, %v4334_v63  ;;  %v4405_v12 = vadd.f32 %v7779_v20, %v4367_v30  ;;  %v7822_v1 = vmul.f32 0.8, %v4404_v34  ;;  %v7834_v24 = vmul.f32 0.8, %v4408_v19 }
 0x643   : > { %v4406_v48 = vadd.f32 %v7779_v20, %v4368_v40  ;;  %v7826_v9 = vmul.f32 0.8, %v4409_v61  ;;  %v7828_v21 = vmul.f32 0.8, %v4402_v50  ;;  %v4620_v6 = vsel %vm4470_vm4, %v4619_v32, %v4618_v8 }
 0x644   : > { %v4410_v10 = vadd.f32 %v7779_v20, %v4372_v45  ;;  %v7830_v52 = vmul.f32 0.8, %v4405_v12  ;;  %v4469_v28 = vrot.slane %v7805_v5, 7  ;;  %v4622_v13 = vsel %vm4473_vm5, %v4621_v37, %v4620_v6 }
 0x645   : > { %v7836_v59 = vmul.f32 0.8, %v4406_v48  ;;  %v4626_v63 = vrot.slane %v7824_v41, 7  ;;  %v4628_v4 = vrot.slane %v7826_v9, 6  ;;  %v4624_v27 = vsel %vm4476_vm6, %v4623_v35, %v4622_v13 }
 0x646   : > { %v7839_v26 = vmul.f32 0.8, %v4410_v10  ;;  %v4471_v54 = vsel %vm4470_vm4, %v4469_v28, %v7807_v17  ;;  %v4478_v56 = vrot.slane %v7830_v52, 4  ;;  %v4625_v30 = vsel %vm4479_vm7, %v7830_v52, %v4624_v27 }
 0x647   : > { %v4474_v29 = vsel %vm4473_vm5, %v4472_v53, %v4471_v54  ;;  %v4481_v38 = vrot.slane %v7824_v41, 3  ;;  %v4484_v40 = vrot.slane %v7826_v9, 2  ;;  %v4627_v7 = vsel %vm4482_vm8, %v4626_v63, %v4625_v30 }
 0x648   : > { %v4477_v18 = vsel %vm4476_vm6, %v4475_v51, %v4474_v29  ;;  %v4781_v45 = vrot.slane %v7828_v21, 6  ;;  %v7863_v34 = vsel %vm4485_vm9, %v4628_v4, %v4627_v7  ;;  %v4785_v61 = vrot.slane %v7836_v59, 4 }
 0x649   : > { %8712 = vst [vmem:[#allocation27_spill] sm:$0xff] %v7863_v34  ;;  %v4480_v46 = vsel %vm4479_vm7, %v4478_v56, %v4477_v18  ;;  %v4780_v12 = vsel %vm4470_vm4, %v4779_v57, %v7817_v55  ;;  %v4783_v19 = vrot.slane %v7822_v1, 5  ;;  %v4789_v48 = vrot.slane %v7839_v26, 2 }
 0x64a   : > { %v4483_v50 = vsel %vm4482_vm8, %v4481_v38, %v4480_v46  ;;  %v4782_v8 = vsel %vm4473_vm5, %v4781_v45, %v4780_v12  ;;  %v4921_v32 = vrot.slane %v7817_v55, 4  ;;  %v4922_v37 = vrot.slane %v7815_v62, 3 }
 0x64b   : > { %v7873_v10 = vsel %vm4485_vm9, %v4484_v40, %v4483_v50  ;;  %v4784_v6 = vsel %vm4476_vm6, %v4783_v19, %v4782_v8  ;;  %v4787_v35 = vrot.slane %v7834_v24, 3  ;;  %v4924_v28 = vrot.slane %v7828_v21, 2 }
 0x64c   : > { %8713 = vst [vmem:[#allocation25_spill] sm:$0xff] %v7873_v10  ;;  %v4786_v13 = vsel %vm4479_vm7, %v4785_v61, %v4784_v6  ;;  %v4923_v63 = vsel %vm4470_vm4, %v4922_v37, %v4921_v32  ;;  %v4926_v4 = vrot.slane %v7822_v1, 1  ;;  %v4931_v54 = vrot.slane %v7839_v26, 6 }
 0x64d   : > { %v4788_v53 = vsel %vm4482_vm8, %v4787_v35, %v4786_v13  ;;  %v4925_v27 = vsel %vm4473_vm5, %v4924_v28, %v4923_v63  ;;  %v4929_v30 = vrot.slane %v7834_v24, 7  ;;  %v4684_v29 = vrot.slane %v7807_v17, 6 }
 0x64e   : > { %v7888_v51 = vsel %vm4485_vm9, %v4789_v48, %v4788_v53  ;;  %v4927_v56 = vsel %vm4476_vm6, %v4926_v4, %v4925_v27  ;;  %v4687_v40 = vrot.slane %v7811_v25, 4  ;;  %v4685_v18 = vrot.slane %v7805_v5, 5 }
 0x64f   : > { %8714 = vst [vmem:[#allocation20_spill] sm:$0xff] %v7888_v51  ;;  %v4928_v38 = vsel %vm4479_vm7, %v7836_v59, %v4927_v56  ;;  %v4516_v57 = vrot.slane %v7807_v17, 1  ;;  %v4518_v46 = vrot.slane %v7811_v25, 7  ;;  %v4650_v61 = vrot.slane %v7807_v17, 5 }
 0x650   : > { %v4930_v7 = vsel %vm4482_vm8, %v4929_v30, %v4928_v38  ;;  %v4686_v50 = vsel %vm4470_vm4, %v4685_v18, %v4684_v29  ;;  %v4653_v12 = vrot.slane %v7811_v25, 3  ;;  %v4550_v19 = vrot.slane %v7807_v17, 2 }
 0x651   : > { %v7900_v45 = vsel %vm4485_vm9, %v4931_v54, %v4930_v7  ;;  %v4688_v48 = vsel %vm4473_vm5, %v4687_v40, %v4686_v50  ;;  %v4691_v8 = vrot.slane %v7830_v52, 2  ;;  %v4651_v32 = vrot.slane %v7805_v5, 4 }
 0x652   : > { %8715 = vst [vmem:[#allocation19_spill] sm:$0xff] %v7900_v45  ;;  %v4689_v37 = vrot.slane %v7819_v36, 3  ;;  %v4517_v6 = vsel %vm4470_vm4, %v7805_v5, %v4516_v57  ;;  %v4551_v35 = vrot.slane %v7805_v5, 1  ;;  %v4520_v13 = vrot.slane %v7819_v36, 6 }
 0x653   : > { %v4519_v28 = vsel %vm4473_vm5, %v4518_v46, %v4517_v6  ;;  %v4652_v63 = vsel %vm4470_vm4, %v4651_v32, %v4650_v61  ;;  %v4655_v4 = vrot.slane %v7819_v36, 2  ;;  %v4584_v56 = vrot.slane %v7807_v17, 3 }
 0x654   : > { %v4690_v53 = vsel %vm4476_vm6, %v4689_v37, %v4688_v48  ;;  %v4654_v27 = vsel %vm4473_vm5, %v4653_v12, %v4652_v63  ;;  %v4552_v54 = vsel %vm4470_vm4, %v4551_v35, %v4550_v19  ;;  %v4522_v38 = vrot.slane %v7830_v52, 5 }
 0x655   : > { %v4692_v29 = vsel %vm4479_vm7, %v4691_v8, %v4690_v53  ;;  %v4657_v40 = vrot.slane %v7830_v52, 1  ;;  %v4553_v7 = vsel %vm4473_vm5, %v7811_v25, %v4552_v54  ;;  %v4693_v18 = vrot.slane %v7824_v41, 1 }
 0x656   : > { %v4521_v57 = vsel %vm4476_vm6, %v4520_v13, %v4519_v28  ;;  %v4554_v46 = vrot.slane %v7819_v36, 7  ;;  %v4556_v61 = vrot.slane %v7830_v52, 6  ;;  %v4524_v50 = vrot.slane %v7824_v41, 4 }
 0x657   : > { %v4656_v12 = vsel %vm4476_vm6, %v4655_v4, %v4654_v27  ;;  %v4585_v19 = vrot.slane %v7805_v5, 2  ;;  %v4587_v48 = vrot.slane %v7811_v25, 1  ;;  %v4694_v8 = vsel %vm4482_vm8, %v4693_v18, %v4692_v29 }
 0x658   : > { %v4555_v32 = vsel %vm4476_vm6, %v4554_v46, %v4553_v7  ;;  %v4558_v37 = vrot.slane %v7824_v41, 5  ;;  %v4987_v6 = vrot.slane %v7817_v55, 6  ;;  %v4523_v28 = vsel %vm4479_vm7, %v4522_v38, %v4521_v57 }
 0x659   : > { %v4658_v13 = vsel %vm4479_vm7, %v4657_v40, %v4656_v12  ;;  %v4586_v63 = vsel %vm4470_vm4, %v4585_v19, %v4584_v56  ;;  %v4990_v4 = vrot.slane %v7828_v21, 4  ;;  %v4526_v27 = vrot.slane %v7826_v9, 3 }
 0x65a   : > { %v4557_v54 = vsel %vm4479_vm7, %v4556_v61, %v4555_v32  ;;  %v4988_v29 = vrot.slane %v7815_v62, 5  ;;  %v7948_v7 = vsel %vm4485_vm9, %v7826_v9, %v4694_v8  ;;  %v4660_v18 = vrot.slane %v7826_v9, 7 }
 0x65b   : > { %v4588_v38 = vsel %vm4473_vm5, %v4587_v48, %v4586_v63  ;;  %v4590_v40 = vrot.slane %v7830_v52, 7  ;;  %v4525_v57 = vsel %vm4482_vm8, %v4524_v50, %v4523_v28  ;;  %v4559_v12 = vsel %vm4482_vm8, %v4558_v37, %v4557_v54 }
 0x65c   : > { %v4989_v46 = vsel %vm4470_vm4, %v4988_v29, %v4987_v6  ;;  %v4560_v19 = vrot.slane %v7826_v9, 4  ;;  %v4994_v32 = vrot.slane %v7836_v59, 2  ;;  %v7962_v63 = vsel %vm4485_vm9, %v4526_v27, %v4525_v57 }
 0x65d   : > { %v4991_v8 = vsel %vm4473_vm5, %v4990_v4, %v4989_v46  ;;  %v4589_v50 = vsel %vm4476_vm6, %v7819_v36, %v4588_v38  ;;  %v4592_v28 = vrot.slane %v7824_v41, 6  ;;  %v4721_v27 = vrot.slane %v7811_v25, 5 }
 0x65e   : > { %v4591_v37 = vsel %vm4479_vm7, %v4590_v40, %v4589_v50  ;;  %v4819_v54 = vrot.slane %v7817_v55, 1 }
 0x65f   : > { %v4593_v40 = vsel %vm4482_vm8, %v4592_v28, %v4591_v37  ;;  %v4825_v28 = vrot.slane %v7836_v59, 5 }
 0x676   : > { %v4183_v30 = vpop.xlane.xlu1 %4182 }
 0x677   : > { %v4241_v53 = vmul.f32 0.0625, %v4183_v30  ;;  %v4659_v30 = vsel %vm4482_vm8, %v7824_v41, %v4658_v13  ;;  %v4718_v13 = vrot.slane %v7807_v17, 7  ;;  %v4594_v17 = vrot.slane %v7826_v9, 5 }
 0x678   : > { %v7968_v6 = vsel %vm4485_vm9, %v4660_v18, %v4659_v30  ;;  %v4719_v18 = vrot.slane %v7805_v5, 6  ;;  %v4821_v30 = vrot.slane %v7828_v21, 7 }
 0x679   : > { %v4275_v48 = vadd.f32 1e-05, %v4241_v53 }
 0x67a   : > { %v4177_v35 = vpop.xlane.xlu1 %4176  ;;  %v4720_v25 = vsel %vm4470_vm4, %v4719_v18, %v4718_v13  ;;  %v4953_v13 = vrot.slane %v7817_v55, 5 }
 0x67b   : > { %v4239_v56 = vmul.f32 0.0625, %v4177_v35  ;;  %v4992_v35 = vrot.slane %v7822_v1, 3  ;;  %6083 = vrsqrt.f32 %v4275_v48  ;;  %v4722_v5 = vsel %vm4473_vm5, %v4721_v27, %v4720_v25 }
 0x67c   : > { %v4820_v48 = vsel %vm4470_vm4, %v7815_v62, %v4819_v54  ;;  %v4827_v25 = vrot.slane %v7834_v24, 4 }
 0x67d   : > { %v4273_v4 = vadd.f32 1e-05, %v4239_v56  ;;  %v4993_v53 = vsel %vm4476_vm6, %v4992_v35, %v4991_v8  ;;  %v4996_v56 = vrot.slane %v7834_v24, 1  ;;  %v4723_v8 = vrot.slane %v7819_v36, 4 }
 0x67e   : > { %v4186_v61 = vpop.xlane.xlu0 %4185  ;;  %v4995_v57 = vsel %vm4479_vm7, %v4994_v32, %v4993_v53  ;;  %v4822_v37 = vsel %vm4473_vm5, %v4821_v30, %v4820_v48  ;;  %v7993_v36 = vsel %vm4485_vm9, %v4560_v19, %v4559_v12  ;;  %v4956_v53 = vrot.slane %v7828_v21, 3 }
 0x67f   : > { %v4242_v29 = vmul.f32 0.0625, %v4186_v61  ;;  %v4725_v61 = vrot.slane %v7830_v52, 3  ;;  %6085 = vrsqrt.f32 %v4273_v4  ;;  %v4997_v32 = vsel %vm4482_vm8, %v4996_v56, %v4995_v57 }
 0x680   : > { %v7996_v52 = vsel %vm4485_vm9, %v4594_v17, %v4593_v40  ;;  %v4823_v4 = vrot.slane %v7822_v1, 6  ;;  %v4724_v54 = vsel %vm4476_vm6, %v4723_v8, %v4722_v5  ;;  %v8005_v57 = vsel %vm4485_vm9, %v7839_v26, %v4997_v32 }
 0x681   : > { %v4276_v50 = vadd.f32 1e-05, %v4242_v29  ;;  %v4727_v29 = vrot.slane %v7824_v41, 2  ;;  %v4726_v12 = vsel %vm4479_vm7, %v4725_v61, %v4724_v54  ;;  %v4729_v19 = vrot.slane %v7826_v9, 1 }
 0x682   : > { %v4180_v38 = vpop.xlane.xlu0 %4179  ;;  %v4824_v18 = vsel %vm4476_vm6, %v4823_v4, %v4822_v37  ;;  %v4829_v17 = vrot.slane %v7839_v26, 3  ;;  %v4960_v61 = vrot.slane %v7836_v59, 1  ;;  %v4958_v5 = vrot.slane %v7822_v1, 2 }
 0x683   : > { %v4240_v46 = vmul.f32 0.0625, %v4180_v38  ;;  %v4954_v38 = vrot.slane %v7815_v62, 4  ;;  %6087 = vrsqrt.f32 %v4276_v50  ;;  %v4826_v40 = vsel %vm4479_vm7, %v4825_v28, %v4824_v18 }
 0x684   : > { %v4728_v32 = vsel %vm4482_vm8, %v4727_v29, %v4726_v12  ;;  %v4828_v37 = vsel %vm4482_vm8, %v4827_v25, %v4826_v40  ;;  %v4853_v28 = vrot.slane %v7817_v55, 2  ;;  %v4859_v40 = vrot.slane %v7836_v59, 6 }
 0x685   : > { %v4274_v27 = vadd.f32 1e-05, %v4240_v46  ;;  %v4955_v41 = vsel %vm4470_vm4, %v4954_v38, %v4953_v13  ;;  %v6084_v48 = vpop.eup %6083  ;;  %v8019_v50 = vsel %vm4485_vm9, %v4729_v19, %v4728_v32  ;;  %v8025_v13 = vsel %vm4485_vm9, %v4829_v17, %v4828_v37 }
 0x686   : > { %v4195_v35 = vpop.xlane.xlu1 %4194  ;;  %v4957_v8 = vsel %vm4473_vm5, %v4956_v53, %v4955_v41  ;;  %v4854_v53 = vrot.slane %v7815_v62, 1  ;;  %v5021_v19 = vrot.slane %v7817_v55, 7  ;;  %v4339_v18 = vmul.f32 %v6084_v48, %v7651_v43 }
 0x687   : > { %v4245_v56 = vmul.f32 0.0625, %v4195_v35  ;;  %6089 = vrsqrt.f32 %v4274_v27  ;;  %v4963_v35 = vrot.slane %v7839_v26, 7  ;;  %v4959_v4 = vsel %vm4476_vm6, %v4958_v5, %v4957_v8 }
 0x688   : > { %v4198_v46 = vpop.xlane.xlu0 %4197  ;;  %v4857_v27 = vrot.slane %v7822_v1, 7  ;;  %v4961_v12 = vsel %vm4479_vm7, %v4960_v61, %v4959_v4  ;;  %v4861_v17 = vrot.slane %v7834_v24, 5  ;;  %v4855_v25 = vsel %vm4470_vm4, %v4854_v53, %v4853_v28 }
 0x689   : > { %v6086_v54 = vpop.eup %6085  ;;  %v4279_v29 = vadd.f32 1e-05, %v4245_v56  ;;  %v4246_v38 = vmul.f32 0.0625, %v4198_v46  ;;  %v5022_v32 = vrot.slane %v7815_v62, 6  ;;  %v5024_v56 = vrot.slane %v7828_v21, 5 }
 0x68a   : > { %v4189_v30 = vpop.xlane.xlu1 %4188  ;;  %v4337_v46 = vmul.f32 %v6086_v54, %v7656_v22  ;;  %v4962_v43 = vsel %vm4482_vm8, %v7834_v24, %v4961_v12  ;;  %v4887_v5 = vrot.slane %v7817_v55, 3  ;;  %v4890_v28 = vrot.slane %v7828_v21, 1 }
 0x68b   : > { %v4243_v9 = vmul.f32 0.0625, %v4189_v30  ;;  %6091 = vrsqrt.f32 %v4279_v29  ;;  %v4280_v48 = vadd.f32 1e-05, %v4246_v38  ;;  %v5023_v37 = vsel %vm4470_vm4, %v5022_v32, %v5021_v19 }
 0x68c   : > { %v4192_v41 = vpop.xlane.xlu0 %4191  ;;  %v4377_v53 = vmul.f32 %v7763_v58, %v4339_v18  ;;  %v4888_v54 = vrot.slane %v7815_v62, 2  ;;  %v5026_v55 = vrot.slane %v7822_v1, 4  ;;  %v5028_v29 = vrot.slane %v7836_v59, 3 }
 0x68d   : > { %v4277_v30 = vadd.f32 1e-05, %v4243_v9  ;;  %v4856_v9 = vsel %vm4473_vm5, %v7828_v21, %v4855_v25  ;;  %v6088_v4 = vpop.eup %6087  ;;  %v5025_v25 = vsel %vm4473_vm5, %v5024_v56, %v5023_v37  ;;  %v4375_v19 = vmul.f32 %v7763_v58, %v4337_v46 }
 0x68e   : > { %v4858_v12 = vsel %vm4476_vm6, %v4857_v27, %v4856_v9  ;;  %v4244_v21 = vmul.f32 0.0625, %v4192_v41  ;;  %v4889_v18 = vsel %vm4470_vm4, %v4888_v54, %v4887_v5  ;;  %v4340_v62 = vmul.f32 %v6088_v4, %v7665_v42 }
 0x68f   : > { %6093 = vrsqrt.f32 %v4277_v30  ;;  %v4893_v30 = vrot.slane %v7836_v59, 7  ;;  %v4891_v27 = vsel %vm4473_vm5, %v4890_v28, %v4889_v18  ;;  %v4415_v56 = vadd.f32 %v7779_v20, %v4377_v53 }
 0x690   : > { %6095 = vrsqrt.f32 %v4280_v48  ;;  %v8060_v37 = vsel %vm4485_vm9, %v4963_v35, %v4962_v43  ;;  %v4860_v46 = vsel %vm4479_vm7, %v4859_v40, %v4858_v12  ;;  %v5027_v5 = vsel %vm4476_vm6, %v5026_v55, %v5025_v25 }
 0x691   : > { %v6090_v38 = vpop.eup %6089  ;;  %v5030_v59 = vrot.slane %v7834_v24, 2  ;;  %v4413_v42 = vadd.f32 %v7779_v20, %v4375_v19  ;;  %v4278_v48 = vadd.f32 1e-05, %v4244_v21  ;;  %v5029_v28 = vsel %vm4479_vm7, %v5028_v29, %v5027_v5 }
 0x692   : > { %v4207_v61 = vpop.xlane.xlu1 %4206  ;;  %v4338_v41 = vmul.f32 %v6090_v38, %v7662_v31  ;;  %v4892_v4 = vsel %vm4476_vm6, %v7822_v1, %v4891_v27  ;;  %v4378_v35 = vmul.f32 %v7763_v58, %v4340_v62  ;;  %v5032_v40 = vrot.slane %v7839_v26, 1 }
 0x693   : > { %v4249_v22 = vmul.f32 0.0625, %v4207_v61  ;;  %v4894_v31 = vsel %vm4479_vm7, %v4893_v30, %v4892_v4  ;;  %v4897_v53 = vrot.slane %v7839_v26, 5  ;;  %v4895_v12 = vrot.slane %v7834_v24, 6 }
 0x694   : > { %v4210_v8 = vpop.xlane.xlu0 %4209  ;;  %v4376_v55 = vmul.f32 %v7763_v58, %v4338_v41  ;;  %v4862_v1 = vsel %vm4482_vm8, %v4861_v17, %v4860_v46  ;;  %v5031_v29 = vsel %vm4482_vm8, %v5030_v59, %v5029_v28  ;;  %v8080_v19 = vmul.f32 0.8, %v4413_v42 }
 0x695   : > { %v4283_v9 = vadd.f32 1e-05, %v4249_v22  ;;  %v8074_v22 = vmul.f32 0.8, %v4415_v56  ;;  %v4250_v54 = vmul.f32 0.0625, %v4210_v8  ;;  %v6092_v25 = vpop.eup %6091  ;;  %v4416_v18 = vadd.f32 %v7779_v20, %v4378_v35 }
 0x696   : > { %v4201_v32 = vpop.xlane.xlu1 %4200  ;;  %v8716_v24 = vrot.slane %v7839_v26, 4  ;;  %v4414_v46 = vadd.f32 %v7779_v20, %v4376_v55  ;;  %v4343_v26 = vmul.f32 %v6092_v25, %v7674_v44  ;;  %v4633_v28 = vrot.slane %v8080_v19, 4 }
 0x697   : > { %v4247_v61 = vmul.f32 0.0625, %v4201_v32  ;;  %6097 = vrsqrt.f32 %v4283_v9  ;;  %v4896_v32 = vsel %vm4482_vm8, %v4895_v12, %v4894_v31  ;;  %v4284_v62 = vadd.f32 1e-05, %v4250_v54 }
 0x698   : > { %v4204_v43 = vpop.xlane.xlu0 %4203  ;;  %v8087_v30 = vsel %vm4485_vm9, %v8716_v24, %v4862_v1  ;;  %v8093_v17 = vsel %vm4485_vm9, %v4897_v53, %v4896_v32  ;;  %v4634_v27 = vrot.slane %v8074_v22, 3  ;;  %v4499_v56 = vrot.slane %v8074_v22, 7 }
 0x699   : > { %v4281_v45 = vadd.f32 1e-05, %v4247_v61  ;;  %v6094_v38 = vpop.eup %6093  ;;  %v4248_v21 = vmul.f32 0.0625, %v4204_v43  ;;  %8717 = vst [vmem:[#allocation6_spill] sm:$0xff] %v8093_v17  ;;  %v4702_v61 = vrot.slane %v8074_v22, 5  ;;  %v4668_v59 = vrot.slane %v8074_v22, 4 }
 0x69a   : > { %v6096_v9 = vpop.eup %6095  ;;  %v4341_v41 = vmul.f32 %v6094_v38, %v7683_v23  ;;  %v4533_v4 = vrot.slane %v8080_v19, 1  ;;  %v8105_v35 = vmul.f32 0.8, %v4416_v18  ;;  %v4568_v31 = vrot.slane %v8074_v22, 1 }
 0x69b   : > { %6099 = vrsqrt.f32 %v4281_v45  ;;  %v8090_v45 = vsel %vm4485_vm9, %v5032_v40, %v5031_v29  ;;  %v4282_v42 = vadd.f32 1e-05, %v4248_v21  ;;  %v4667_v40 = vrot.slane %v8080_v19, 5 }
 0x69c   : > { %6101 = vrsqrt.f32 %v4278_v48  ;;  %v4701_v48 = vrot.slane %v8080_v19, 6  ;;  %v4602_v44 = vrot.slane %v8074_v22, 2  ;;  %v4344_v23 = vmul.f32 %v6096_v9, %v7678_v3 }
 0x69d   : > { %6103 = vrsqrt.f32 %v4284_v62  ;;  %v4736_v54 = vrot.slane %v8074_v22, 6  ;;  %v8112_v12 = vmul.f32 0.8, %v4414_v46  ;;  %v4381_v25 = vmul.f32 %v7763_v58, %v4343_v26 }
 0x69e   : > { %v4219_v8 = vpop.xlane.xlu1 %4218  ;;  %v4379_v55 = vmul.f32 %v7763_v58, %v4341_v41  ;;  %v8118_v29 = vsel %vm4470_vm4, %v4499_v56, %v8080_v19  ;;  %6105 = vrsqrt.f32 %v4282_v42  ;;  %v8121_v21 = vsel %vm4470_vm4, %v4702_v61, %v4701_v48 }
 0x69f   : > { %v4253_v53 = vmul.f32 0.0625, %v4219_v8  ;;  %v8124_v3 = vsel %vm4470_vm4, %v4634_v27, %v4633_v28  ;;  %v8128_v32 = vsel %vm4470_vm4, %v8074_v22, %v4533_v4  ;;  %v8131_v62 = vsel %vm4470_vm4, %v4668_v59, %v4667_v40 }
 0x6a0   : > { %v4222_v5 = vpop.xlane.xlu0 %4221  ;;  %v4567_v56 = vrot.slane %v8080_v19, 2  ;;  %v5005_v9 = vrot.slane %v8105_v35, 5  ;;  %v4382_v61 = vmul.f32 %v7763_v58, %v4344_v23  ;;  %v4601_v41 = vrot.slane %v8080_v19, 3 }
 0x6a1   : > { %v6098_v38 = vpop.eup %6097  ;;  %v4287_v26 = vadd.f32 1e-05, %v4253_v53  ;;  %v4254_v27 = vmul.f32 0.0625, %v4222_v5  ;;  %v4419_v22 = vadd.f32 %v7779_v20, %v4381_v25  ;;  %v4417_v42 = vadd.f32 %v7779_v20, %v4379_v55 }
 0x6a2   : > { %v4213_v43 = vpop.xlane.xlu1 %4212  ;;  %v5004_v59 = vrot.slane %v8112_v12, 6  ;;  %v4347_v4 = vmul.f32 %v6098_v38, %v7699_v15  ;;  %v4735_v51 = vrot.slane %v8080_v19, 7  ;;  %v4836_v10 = vrot.slane %v8112_v12, 1 }
 0x6a3   : > { %v4251_v8 = vmul.f32 0.0625, %v4213_v43  ;;  %v4420_v25 = vadd.f32 %v7779_v20, %v4382_v61  ;;  %6107 = vrsqrt.f32 %v4287_v26  ;;  %v4288_v55 = vadd.f32 1e-05, %v4254_v27 }
 0x6a4   : > { %v4216_v1 = vpop.xlane.xlu0 %4215  ;;  %v8146_v34 = vmul.f32 0.8, %v4419_v22  ;;  %v8148_v17 = vmul.f32 0.8, %v4417_v42  ;;  %v8151_v15 = vsel %vm4470_vm4, %v4568_v31, %v4567_v56  ;;  %v8165_v31 = vsel %vm4470_vm4, %v4736_v54, %v4735_v51 }
 0x6a5   : > { %v6100_v18 = vpop.eup %6099  ;;  %v4285_v5 = vadd.f32 1e-05, %v4251_v8  ;;  %v4252_v38 = vmul.f32 0.0625, %v4216_v1  ;;  %v8157_v8 = vsel %vm4470_vm4, %v5005_v9, %v5004_v59  ;;  %v8162_v26 = vmul.f32 0.8, %v4420_v25 }
 0x6a6   : > { %v4171_v24 = vpop.xlane.xlu1 %4170  ;;  %v6102_v46 = vpop.eup %6101  ;;  %v4345_v43 = vmul.f32 %v6100_v18, %v7707_v60  ;;  %v8169_v1 = vsel %vm4470_vm4, %v8105_v35, %v4836_v10  ;;  %v4704_v27 = vrot.slane %v8148_v17, 4  ;;  %v4706_v9 = vrot.slane %v8146_v34, 3 }
 0x6a7   : > { %v4237_v48 = vmul.f32 0.0625, %v4171_v24  ;;  %v4342_v23 = vmul.f32 %v6102_v46, %v7689_v2  ;;  %v6104_v60 = vpop.eup %6103  ;;  %v4385_v2 = vmul.f32 %v7763_v58, %v4347_v4  ;;  %v8160_v46 = vsel %vm4470_vm4, %v4602_v44, %v4601_v41 }
 0x6a8   : > { %v4174_v28 = vpop.xlane.xlu0 %4173  ;;  %v4383_v19 = vmul.f32 %v7763_v58, %v4345_v43  ;;  %v6106_v61 = vpop.eup %6105  ;;  %v4348_v56 = vmul.f32 %v6104_v60, %v7702_v33  ;;  %v4636_v44 = vrot.slane %v8148_v17, 2  ;;  %v4286_v42 = vadd.f32 1e-05, %v4252_v38 }
 0x6a9   : > { %v4238_v40 = vmul.f32 0.0625, %v4174_v28  ;;  %v4271_v53 = vadd.f32 1e-05, %v4237_v48  ;;  %v4380_v18 = vmul.f32 %v7763_v58, %v4342_v23  ;;  %v4423_v41 = vadd.f32 %v7779_v20, %v4385_v2 }
 0x6aa   : > { %v4421_v22 = vadd.f32 %v7779_v20, %v4383_v19  ;;  %v4501_v51 = vrot.slane %v8148_v17, 6  ;;  %v4346_v10 = vmul.f32 %v6106_v61, %v7713_v11  ;;  %v4638_v48 = vrot.slane %v8146_v34, 1 }
 0x6ab   : > { %v4272_v24 = vadd.f32 1e-05, %v4238_v40  ;;  %6109 = vrsqrt.f32 %v4271_v53  ;;  %v4418_v54 = vadd.f32 %v7779_v20, %v4380_v18  ;;  %v4503_v33 = vrot.slane %v8146_v34, 5 }
 0x6ac   : > { %v4537_v28 = vrot.slane %v8146_v34, 6  ;;  %v4672_v59 = vrot.slane %v8146_v34, 2  ;;  %v4571_v4 = vrot.slane %v8146_v34, 7  ;;  %v5009_v43 = vrot.slane %v8162_v26, 3 }
 0x6ad   : > { %6111 = vrsqrt.f32 %v4272_v24  ;;  %v4386_v40 = vmul.f32 %v7763_v58, %v4348_v56  ;;  %v4705_v23 = vsel %vm4473_vm5, %v4704_v27, %v8121_v21  ;;  %v4637_v11 = vsel %vm4473_vm5, %v4636_v44, %v8124_v3  ;;  %v6108_v53 = vpop.eup %6107 }
 0x6ae   : > { %6113 = vrsqrt.f32 %v4285_v5  ;;  %v4740_v5 = vrot.slane %v8146_v34, 4  ;;  %v8192_v25 = vmul.f32 0.8, %v4423_v41  ;;  %v4502_v24 = vsel %vm4473_vm5, %v4501_v51, %v8118_v29 }
 0x6af   : > { %6115 = vrsqrt.f32 %v4288_v55  ;;  %v8194_v55 = vmul.f32 0.8, %v4421_v22  ;;  %v8198_v2 = vmul.f32 0.8, %v4418_v54  ;;  %v4384_v19 = vmul.f32 %v7763_v58, %v4346_v10 }
 0x6b0   : > { %6117 = vrsqrt.f32 %v4286_v42  ;;  %v4840_v21 = vrot.slane %v8162_v26, 6  ;;  %v4802_v3 = vrot.slane %v8105_v35, 7  ;;  %v4707_v61 = vsel %vm4476_vm6, %v4706_v9, %v4705_v23 }
 0x6b1   : > { %v4639_v56 = vsel %vm4476_vm6, %v4638_v48, %v4637_v11  ;;  %v4535_v27 = vrot.slane %v8148_v17, 7  ;;  %v4424_v29 = vadd.f32 %v7779_v20, %v4386_v40  ;;  %v4351_v41 = vmul.f32 %v6108_v53, %v7723_v16 }
 0x6b2   : > { %v4504_v42 = vsel %vm4476_vm6, %v4503_v33, %v4502_v24  ;;  %v4710_v9 = vrot.slane %v8192_v25, 1  ;;  %v4641_v10 = vrot.slane %v8192_v25, 7  ;;  %v4422_v48 = vadd.f32 %v7779_v20, %v4384_v19 }
 0x6b3   : > { %v4640_v16 = vsel %vm4479_vm7, %v8194_v55, %v4639_v56  ;;  %v4505_v11 = vrot.slane %v8194_v55, 4  ;;  %v4536_v53 = vsel %vm4473_vm5, %v4535_v27, %v8128_v32  ;;  %v4389_v24 = vmul.f32 %v7763_v58, %v4351_v41 }
 0x6b4   : > { %v4539_v32 = vrot.slane %v8194_v55, 5  ;;  %v4674_v27 = vrot.slane %v8194_v55, 1 }
 0x6b5   : > { %v6110_v60 = vpop.eup %6109 }
 0x6b6   : > { %v4335_v18 = vmul.f32 %v6110_v60, %v7743_v0  ;;  %v4708_v0 = vrot.slane %v8194_v55, 2 }
 0x6b7   : > { %v6112_v38 = vpop.eup %6111 }
 0x6b8   : > { %v6114_v44 = vpop.eup %6113  ;;  %v4336_v22 = vmul.f32 %v6112_v38, %v7749_v39  ;;  %v4373_v54 = vmul.f32 %v7763_v58, %v4335_v18  ;;  %v4670_v39 = vrot.slane %v8148_v17, 3  ;;  %v4507_v38 = vrot.slane %v8192_v25, 3 }
 0x6b9   : > { %v6116_v51 = vpop.eup %6115  ;;  %v4349_v33 = vmul.f32 %v6114_v44, %v7731_v47  ;;  %v4709_v56 = vsel %vm4479_vm7, %v4708_v0, %v4707_v61  ;;  %v8233_v47 = vsel %vm4482_vm8, %v4641_v10, %v4640_v16  ;;  %v4541_v44 = vrot.slane %v8192_v25, 4 }
 0x6ba   : > { %v4374_v40 = vmul.f32 %v7763_v58, %v4336_v22  ;;  %v4411_v23 = vadd.f32 %v7779_v20, %v4373_v54  ;;  %v4352_v60 = vmul.f32 %v6116_v51, %v7726_v49  ;;  %v4538_v22 = vsel %vm4476_vm6, %v4537_v28, %v4536_v53  ;;  %v6118_v41 = vpop.eup %6117 }
 0x6bb   : > { %v4671_v49 = vsel %vm4473_vm5, %v4670_v39, %v8131_v62  ;;  %v4387_v51 = vmul.f32 %v7763_v58, %v4349_v33  ;;  %v4506_v0 = vsel %vm4479_vm7, %v4505_v11, %v4504_v42  ;;  %v4427_v10 = vadd.f32 %v7779_v20, %v4389_v24 }
 0x6bc   : > { %v4412_v19 = vadd.f32 %v7779_v20, %v4374_v40  ;;  %v8229_v18 = vmul.f32 0.8, %v4411_v23  ;;  %v4390_v28 = vmul.f32 %v7763_v58, %v4352_v60  ;;  %v4711_v16 = vsel %vm4482_vm8, %v4710_v9, %v4709_v56 }
 0x6bd   : > { %v8256_v53 = vmul.f32 0.8, %v4422_v48  ;;  %v4350_v42 = vmul.f32 %v6118_v41, %v7737_v14  ;;  %v4508_v9 = vsel %vm4482_vm8, %v4507_v38, %v4506_v0  ;;  %v4425_v11 = vadd.f32 %v7779_v20, %v4387_v51 }
 0x6be   : > { %v4696_v54 = vrot.slane %v8229_v18, 7  ;;  %v4528_v61 = vrot.slane %v8229_v18, 2  ;;  %v8247_v40 = vmul.f32 0.8, %v4412_v19  ;;  %v4662_v33 = vrot.slane %v8229_v18, 6 }
 0x6bf   : > { %v4562_v23 = vrot.slane %v8229_v18, 3  ;;  %v4570_v48 = vsel %vm4473_vm5, %v8148_v17, %v8151_v15  ;;  %v4573_v14 = vrot.slane %v8194_v55, 6  ;;  %v8271_v24 = vmul.f32 0.8, %v4427_v10 }
 0x6c0   : > { %v4697_v62 = vsel %vm4488_vm10, %v4696_v54, %v7948_v7  ;;  %v4529_v39 = vsel %vm4488_vm10, %v4528_v61, %v7962_v63  ;;  %v4540_v7 = vsel %vm4479_vm7, %v4539_v32, %v4538_v22  ;;  %v4673_v63 = vsel %vm4476_vm6, %v4672_v59, %v4671_v49 }
 0x6c1   : > { %4698 = vrot.lane.b32.xlu1 %v4697_v62, %s6133_s13  ;;  %4530 = vrot.lane.b32.xlu0 %v4529_v39, %s6134_s19  ;;  %v4428_v60 = vadd.f32 %v7779_v20, %v4390_v28  ;;  %v4675_v19 = vsel %vm4479_vm7, %v4674_v27, %v4673_v63  ;;  %v5007_v38 = vrot.slane %v8198_v2, 4  ;;  %v4663_v56 = vsel %vm4488_vm10, %v4662_v33, %v7968_v6 }
 0x6c2   : > { %v4563_v59 = vsel %vm4488_vm10, %v4562_v23, %v7993_v36  ;;  %v4596_v22 = vrot.slane %v8229_v18, 4  ;;  %v4999_v15 = vrot.slane %v8247_v40, 7  ;;  %v8282_v32 = vmul.f32 0.8, %v4424_v29 }
 0x6c3   : > { %v4388_v49 = vmul.f32 %v7763_v58, %v4350_v42  ;;  %v4542_v27 = vsel %vm4482_vm8, %v4541_v44, %v4540_v7  ;;  %v4572_v6 = vsel %vm4476_vm6, %v4571_v4, %v4570_v48  ;;  %v8291_v41 = vmul.f32 0.8, %v4425_v11 }
 0x6c4   : > { %v4676_v36 = vsel %vm4482_vm8, %v8192_v25, %v4675_v19  ;;  %v4574_v29 = vsel %vm4479_vm7, %v4573_v14, %v4572_v6  ;;  %v4575_v51 = vrot.slane %v8192_v25, 5  ;;  %v8297_v58 = vmul.f32 0.8, %v4428_v60 }
 0x6c5   : > { %4664 = vrot.lane.b32.xlu1 %v4663_v56, %s6134_s19  ;;  %4564 = vrot.lane.b32.xlu0 %v4563_v59, %s6133_s13  ;;  %v4713_v54 = vrot.slane %v8271_v24, 7  ;;  %v5008_v44 = vsel %vm4473_vm5, %v5007_v38, %v8157_v8  ;;  %v5011_v61 = vrot.slane %v8256_v53, 2  ;;  %v4597_v4 = vsel %vm4488_vm10, %v4596_v22, %v7996_v52 }
 0x6c6   : > { %v5000_v0 = vsel %vm4488_vm10, %v4999_v15, %v8005_v57  ;;  %v4831_v10 = vrot.slane %v8247_v40, 2  ;;  %v4645_v28 = vrot.slane %v8271_v24, 5  ;;  %v4426_v62 = vadd.f32 %v7779_v20, %v4388_v49 }
 0x6c7   : > { %v4511_v8 = vrot.slane %v8271_v24, 1  ;;  %v4545_v39 = vrot.slane %v8271_v24, 2  ;;  %v4679_v33 = vrot.slane %v8271_v24, 6  ;;  %v4643_v52 = vrot.slane %v8291_v41, 6 }
 0x6c8   : > { %v4576_v57 = vsel %vm4482_vm8, %v4575_v51, %v4574_v29  ;;  %v4579_v23 = vrot.slane %v8271_v24, 3  ;;  %v5010_v20 = vsel %vm4476_vm6, %v5009_v43, %v5008_v44  ;;  %v4731_v42 = vsel %vm4488_vm10, %v8229_v18, %v8019_v50 }
 0x6c9   : > { %4598 = vrot.lane.b32.xlu0 %v4597_v4, %s6130_s10  ;;  %5001 = vrot.lane.b32.xlu1 %v5000_v0, %s6133_s13  ;;  %v4712_v7 = vsel %vm4485_vm9, %v8291_v41, %v4711_v16  ;;  %v4509_v11 = vrot.slane %v8291_v41, 2  ;;  %v4543_v63 = vrot.slane %v8291_v41, 3  ;;  %v4832_v48 = vsel %vm4488_vm10, %v4831_v10, %v8025_v13 }
 0x6ca   : > { %v4965_v14 = vrot.slane %v8247_v40, 6  ;;  %v4865_v60 = vrot.slane %v8247_v40, 3  ;;  %v4604_v43 = vrot.slane %v8148_v17, 1  ;;  %v8333_v19 = vmul.f32 0.8, %v4426_v62  ;;  %v8718_v62 = vld [vmem:[#allocation6_spill] sm:$0xff] }
 0x6cb   : > { %v5013_v50 = vrot.slane %v8282_v32, 1  ;;  %v5016_v16 = vrot.slane %v8297_v58, 7  ;;  %v4738_v38 = vrot.slane %v8148_v17, 5  ;;  %v4714_v13 = vsel %vm4488_vm10, %v4713_v54, %v4712_v7 }
 0x6cc   : > { %v4644_v56 = vsel %vm4485_vm9, %v4643_v52, %v8233_v47  ;;  %v4677_v59 = vrot.slane %v8291_v41, 7  ;;  %v4577_v22 = vrot.slane %v8291_v41, 4  ;;  %v4899_v15 = vrot.slane %v8247_v40, 4 }
 0x6cd   : > { %4732 = vrot.lane.b32.xlu1 %v4731_v42, %s6130_s10  ;;  %4833 = vrot.lane.b32.xlu0 %v4832_v48, %s6134_s19  ;;  %v4510_v49 = vsel %vm4485_vm9, %v4509_v11, %v4508_v9  ;;  %v4544_v6 = vsel %vm4485_vm9, %v4543_v63, %v4542_v27  ;;  %v4838_v29 = vrot.slane %v8198_v2, 7  ;;  %v4966_v17 = vsel %vm4488_vm10, %v4965_v14, %v8060_v37 }
 0x6ce   : > { %v4866_v51 = vsel %vm4488_vm10, %v4865_v60, %v8087_v30  ;;  %v4605_v47 = vsel %vm4473_vm5, %v4604_v43, %v8160_v46  ;;  %v4607_v54 = vrot.slane %v8194_v55, 7  ;;  %v5034_v9 = vsel %vm4488_vm10, %v8247_v40, %v8090_v45 }
 0x6cf   : > { %v4646_v27 = vsel %vm4488_vm10, %v4645_v28, %v4644_v56  ;;  %v4739_v37 = vsel %vm4473_vm5, %v4738_v38, %v8165_v31  ;;  %v4742_v30 = vrot.slane %v8194_v55, 3  ;;  %v4512_v44 = vsel %vm4488_vm10, %v4511_v8, %v4510_v49 }
 0x6d0   : > { %v4546_v46 = vsel %vm4488_vm10, %v4545_v39, %v4544_v6  ;;  %v4678_v4 = vsel %vm4485_vm9, %v4677_v59, %v4676_v36  ;;  %v4578_v0 = vsel %vm4485_vm9, %v4577_v22, %v4576_v57  ;;  %v5012_v10 = vsel %vm4479_vm7, %v5011_v61, %v5010_v20 }
 0x6d1   : > { %4967 = vrot.lane.b32.xlu1 %v4966_v17, %s6134_s19  ;;  %4867 = vrot.lane.b32.xlu0 %v4866_v51, %s6133_s13  ;;  %v4606_v45 = vsel %vm4476_vm6, %v8146_v34, %v4605_v47  ;;  %v4839_v28 = vsel %vm4473_vm5, %v4838_v29, %v8169_v1  ;;  %v4842_v31 = vrot.slane %v8256_v53, 5  ;;  %v4900_v55 = vsel %vm4488_vm10, %v4899_v15, %v8718_v62 }
 0x6d2   : > { %v4608_v8 = vsel %vm4479_vm7, %v4607_v54, %v4606_v45  ;;  %v4611_v39 = vrot.slane %v8291_v41, 5  ;;  %v4741_v36 = vsel %vm4476_vm6, %v4740_v5, %v4739_v37  ;;  %v4609_v61 = vrot.slane %v8192_v25, 6 }
 0x6d3   : > { %v4743_v1 = vsel %vm4479_vm7, %v4742_v30, %v4741_v36  ;;  %v4746_v52 = vrot.slane %v8291_v41, 1  ;;  %v4804_v57 = vrot.slane %v8198_v2, 6  ;;  %v4680_v20 = vsel %vm4488_vm10, %v4679_v33, %v4678_v4 }
 0x6d4   : > { %v5014_v42 = vsel %vm4482_vm8, %v5013_v50, %v5012_v10  ;;  %v4744_v34 = vrot.slane %v8192_v25, 2  ;;  %v4841_v5 = vsel %vm4476_vm6, %v4840_v21, %v4839_v28  ;;  %v4610_v11 = vsel %vm4482_vm8, %v4609_v61, %v4608_v8 }
 0x6d5   : > { %5035 = vrot.lane.b32.xlu1 %v5034_v9, %s6130_s10  ;;  %4901 = vrot.lane.b32.xlu0 %v4900_v55, %s6130_s10  ;;  %v5015_v7 = vsel %vm4485_vm9, %v8333_v19, %v5014_v42  ;;  %v4843_v63 = vsel %vm4479_vm7, %v4842_v31, %v4841_v5  ;;  %v4846_v41 = vrot.slane %v8333_v19, 3  ;;  %v4612_v48 = vsel %vm4485_vm9, %v4611_v39, %v4610_v11 }
 0x6d6   : > { %v4745_v33 = vsel %vm4482_vm8, %v4744_v34, %v4743_v1  ;;  %v4844_v14 = vrot.slane %v8282_v32, 4  ;;  %v4803_v25 = vsel %vm4470_vm4, %v4802_v3, %v8112_v12  ;;  %v4808_v43 = vrot.slane %v8256_v53, 4  ;;  %v8719_v1 = vld [vmem:[#allocation27_spill] sm:$0xff]  ;;  %v8720_v34 = vld [vmem:[#allocation25_spill] sm:$0xff] }
 0x6d7   : > { %v4747_v21 = vsel %vm4485_vm9, %v4746_v52, %v4745_v33  ;;  %v4805_v60 = vsel %vm4473_vm5, %v4804_v57, %v4803_v25  ;;  %v4870_v50 = vrot.slane %v8112_v12, 2  ;;  %v4580_v38 = vsel %vm4488_vm10, %v4579_v23, %v4578_v0 }
 0x6d8   : > { %v4613_v3 = vrot.slane %v8271_v24, 4  ;;  %v4845_v56 = vsel %vm4482_vm8, %v4844_v14, %v4843_v63  ;;  %v5017_v59 = vsel %vm4488_vm10, %v5016_v16, %v5015_v7  ;;  %v4848_v15 = vrot.slane %v8297_v58, 2 }
 0x6d9   : > { %4715 = vrot.lane.b32.xlu1 %v4714_v13, %s6135_s22  ;;  %4647 = vrot.lane.b32.xlu0 %v4646_v27, %s6136_s23  ;;  %v4806_v13 = vrot.slane %v8162_v26, 5  ;;  %v4847_v22 = vsel %vm4485_vm9, %v4846_v41, %v4845_v56  ;;  %v4871_v49 = vrot.slane %v8105_v35, 1  ;;  %v4748_v23 = vsel %vm4488_vm10, %v8271_v24, %v4747_v21 }
 0x6da   : > { %v4614_v6 = vsel %vm4488_vm10, %v4613_v3, %v4612_v48  ;;  %v4810_v17 = vrot.slane %v8282_v32, 3  ;;  %v4812_v51 = vrot.slane %v8333_v19, 2  ;;  %v4814_v47 = vrot.slane %v8297_v58, 1 }
 0x6db   : > { %v4807_v29 = vsel %vm4476_vm6, %v4806_v13, %v4805_v60  ;;  %v4872_v54 = vsel %vm4470_vm4, %v4871_v49, %v4870_v50  ;;  %v4849_v9 = vsel %vm4488_vm10, %v4848_v15, %v4847_v22  ;;  %v4876_v27 = vrot.slane %v8256_v53, 6  ;;  %v8721_v60 = vld [vmem:[#allocation20_spill] sm:$0xff] }
 0x6dc   : > { %v4809_v16 = vsel %vm4479_vm7, %v4808_v43, %v4807_v29  ;;  %v4873_v24 = vsel %vm4473_vm5, %v8198_v2, %v4872_v54  ;;  %v4936_v37 = vrot.slane %v8112_v12, 4  ;;  %v4874_v30 = vrot.slane %v8162_v26, 7 }
 0x6dd   : > { %4513 = vrot.lane.b32.xlu1 %v4512_v44, %s6136_s23  ;;  %4547 = vrot.lane.b32.xlu0 %v4546_v46, %s6137_s0  ;;  %v4878_v44 = vrot.slane %v8282_v32, 5  ;;  %v4880_v46 = vrot.slane %v8333_v19, 4  ;;  %v4939_v4 = vrot.slane %v8198_v2, 2  ;;  %v4811_v0 = vsel %vm4482_vm8, %v4810_v17, %v4809_v16 }
 0x6de   : > { %v4937_v10 = vrot.slane %v8105_v35, 3  ;;  %v4904_v45 = vrot.slane %v8112_v12, 3  ;;  %v4630_v28 = vrot.slane %v8229_v18, 5  ;;  %v4875_v31 = vsel %vm4476_vm6, %v4874_v30, %v4873_v24 }
 0x6df   : > { %v4882_v62 = vrot.slane %v8297_v58, 3  ;;  %v4907_v55 = vrot.slane %v8198_v2, 1  ;;  %v4487_v8 = vrot.slane %v8229_v18, 1  ;;  %v4877_v39 = vsel %vm4479_vm7, %v4876_v27, %v4875_v31 }
 0x6e0   : > { %v4938_v36 = vsel %vm4470_vm4, %v4937_v10, %v4936_v37  ;;  %v4905_v61 = vrot.slane %v8105_v35, 2  ;;  %v8459_v52 = vsel %vm4488_vm10, %v4630_v28, %v8719_v1  ;;  %v4813_v57 = vsel %vm4485_vm9, %v4812_v51, %v4811_v0 }
 0x6e1   : > { %4681 = vrot.lane.b32.xlu1 %v4680_v20, %s6137_s0  ;;  %4581 = vrot.lane.b32.xlu0 %v4580_v38, %s6135_s22  ;;  %v4940_v20 = vsel %vm4473_vm5, %v4939_v4, %v4938_v36  ;;  %v4941_v42 = vrot.slane %v8162_v26, 1  ;;  %v8466_v5 = vsel %vm4488_vm10, %v4487_v8, %v8720_v34  ;;  %v4970_v7 = vrot.slane %v8112_v12, 5 }
 0x6e2   : > { %v4906_v18 = vsel %vm4470_vm4, %v4905_v61, %v4904_v45  ;;  %v4791_v11 = vrot.slane %v8247_v40, 1  ;;  %v4933_v63 = vrot.slane %v8247_v40, 5  ;;  %v4879_v41 = vsel %vm4482_vm8, %v4878_v44, %v4877_v39  ;;  %v8722_v40 = vld [vmem:[#allocation19_spill] sm:$0xff] }
 0x6e3   : > { %v4908_v48 = vsel %vm4473_vm5, %v4907_v55, %v4906_v18  ;;  %v4910_v33 = vrot.slane %v8256_v53, 7  ;;  %v4973_v14 = vrot.slane %v8198_v2, 3  ;;  %v4942_v25 = vsel %vm4476_vm6, %v4941_v42, %v4940_v20 }
 0x6e4   : > { %v4971_v21 = vrot.slane %v8105_v35, 4  ;;  %v8482_v43 = vsel %vm4488_vm10, %v4791_v11, %v8721_v60  ;;  %v8486_v50 = vsel %vm4488_vm10, %v4933_v63, %v8722_v40  ;;  %v4881_v38 = vsel %vm4485_vm9, %v4880_v46, %v4879_v41 }
 0x6e5   : > { %5018 = vrot.lane.b32.xlu1 %v5017_v59, %s6135_s22  ;;  %4615 = vrot.lane.b32.xlu0 %v4614_v6, %s6131_s11  ;;  %v4943_v3 = vsel %vm4479_vm7, %v8256_v53, %v4942_v25  ;;  %v4944_v56 = vrot.slane %v8282_v32, 7  ;;  %v4946_v13 = vrot.slane %v8333_v19, 6  ;;  %v4909_v59 = vsel %vm4476_vm6, %v8162_v26, %v4908_v48 }
 0x6e6   : > { %v4914_v22 = vrot.slane %v8333_v19, 5  ;;  %v4972_v15 = vsel %vm4470_vm4, %v4971_v21, %v4970_v7  ;;  %v5038_v49 = vrot.slane %v8112_v12, 7  ;;  %v4911_v6 = vsel %vm4479_vm7, %v4910_v33, %v4909_v59 }
 0x6e7   : > { %v4974_v29 = vsel %vm4473_vm5, %v4973_v14, %v4972_v15  ;;  %v4977_v17 = vrot.slane %v8256_v53, 1  ;;  %v5041_v16 = vrot.slane %v8198_v2, 5  ;;  %v4945_v51 = vsel %vm4482_vm8, %v4944_v56, %v4943_v3 }
 0x6e8   : > { %v4912_v54 = vrot.slane %v8282_v32, 6  ;;  %v4975_v24 = vrot.slane %v8162_v26, 2  ;;  %v5039_v12 = vrot.slane %v8105_v35, 6  ;;  %v4947_v27 = vsel %vm4485_vm9, %v4946_v13, %v4945_v51 }
 0x6e9   : > { %4749 = vrot.lane.b32.xlu1 %v4748_v23, %s6131_s11  ;;  %4850 = vrot.lane.b32.xlu0 %v4849_v9, %s6137_s0  ;;  %v4815_v23 = vsel %vm4488_vm10, %v4814_v47, %v4813_v57  ;;  %v4883_v9 = vsel %vm4488_vm10, %v4882_v62, %v4881_v38  ;;  %v4980_v2 = vrot.slane %v8333_v19, 7  ;;  %v5045_v4 = vrot.slane %v8256_v53, 3 }
 0x6ea   : > { %v4913_v37 = vsel %vm4482_vm8, %v4912_v54, %v4911_v6  ;;  %v4976_v30 = vsel %vm4476_vm6, %v4975_v24, %v4974_v29  ;;  %v5040_v44 = vsel %vm4470_vm4, %v5039_v12, %v5038_v49  ;;  %v4948_v0 = vrot.slane %v8297_v58, 5 }
 0x6eb   : > { %v4915_v35 = vsel %vm4485_vm9, %v4914_v22, %v4913_v37  ;;  %v4978_v47 = vsel %vm4479_vm7, %v4977_v17, %v4976_v30  ;;  %v5042_v46 = vsel %vm4473_vm5, %v5041_v16, %v5040_v44  ;;  %v4916_v10 = vrot.slane %v8297_v58, 4 }
 0x6ec   : > { %v5043_v45 = vrot.slane %v8162_v26, 4  ;;  %v4949_v28 = vsel %vm4488_vm10, %v4948_v0, %v4947_v27  ;;  %v4979_v62 = vsel %vm4482_vm8, %v8282_v32, %v4978_v47  ;;  %v5049_v39 = vrot.slane %v8333_v19, 1 }
 0x6ed   : > { %4816 = vrot.lane.b32.xlu1 %v4815_v23, %s6136_s23  ;;  %4884 = vrot.lane.b32.xlu0 %v4883_v9, %s6135_s22  ;;  %v4917_v31 = vsel %vm4488_vm10, %v4916_v10, %v4915_v35  ;;  %v4981_v53 = vsel %vm4485_vm9, %v4980_v2, %v4979_v62  ;;  %v4982_v26 = vrot.slane %v8297_v58, 6  ;;  %v5047_v36 = vrot.slane %v8282_v32, 2 }
 0x6ee   : > { %v5044_v55 = vsel %vm4476_vm6, %v5043_v45, %v5042_v46 }
 0x6ef   : > { %v5046_v8 = vsel %vm4479_vm7, %v5045_v4, %v5044_v55  ;;  %v4983_v61 = vsel %vm4488_vm10, %v4982_v26, %v4981_v53 }
 0x6f0   : > { %v5048_v1 = vsel %vm4482_vm8, %v5047_v36, %v5046_v8 }
 0x6f1   : > { %4950 = vrot.lane.b32.xlu1 %v4949_v28, %s6136_s23  ;;  %4918 = vrot.lane.b32.xlu0 %v4917_v31, %s6131_s11  ;;  %v5050_v57 = vsel %vm4485_vm9, %v5049_v39, %v5048_v1 }
 0x6f2   : > { %v5051_v20 = vsel %vm4488_vm10, %v8297_v58, %v5050_v57 }
 0x6f5   : > { %4984 = vrot.lane.b32.xlu1 %v4983_v61, %s6137_s0 }
 0x6f9   : > { %5052 = vrot.lane.b32.xlu1 %v5051_v20, %s6131_s11 }
 0x733   : > { %v4699_v42 = vpop.permute.xlu1 %4698  ;;  %v4531_v19 = vpop.permute.xlu0 %4530 }
 0x737   : > { %v4665_v34 = vpop.permute.xlu1 %4664  ;;  %v4565_v18 = vpop.permute.xlu0 %4564 }
 0x73b   : > { %v5002_v32 = vpop.permute.xlu1 %5001  ;;  %v4599_v7 = vpop.permute.xlu0 %4598 }
 0x73f   : > { %v4733_v11 = vpop.permute.xlu1 %4732  ;;  %v4834_v63 = vpop.permute.xlu0 %4833 }
 0x743   : > { %v4968_v41 = vpop.permute.xlu1 %4967  ;;  %v4868_v48 = vpop.permute.xlu0 %4867 }
 0x747   : > { %v5036_v33 = vpop.permute.xlu1 %5035  ;;  %v4902_v14 = vpop.permute.xlu0 %4901 }
 0x74b   : > { %v4716_v25 = vpop.permute.xlu1 %4715  ;;  %v4648_v21 = vpop.permute.xlu0 %4647 }
 0x74c   : > { %v4764_v40 = vsel %vm2204_vm3, %v8459_v52, %v4648_v21 }
 0x74d   : > { %v4765_v59 = vsel %vm4753_vm12, %v4764_v40, %v4665_v34 }
 0x74f   : > { %v4514_v58 = vpop.permute.xlu1 %4513  ;;  %v4548_v60 = vpop.permute.xlu0 %4547 }
 0x750   : > { %v4752_v38 = vsel %vm2204_vm3, %v8466_v5, %v4514_v58 }
 0x751   : > { %v4754_v3 = vsel %vm4753_vm12, %v4752_v38, %v4531_v19 }
 0x752   : > { %v4756_v56 = vsel %vm4755_vm11, %v4754_v3, %v4548_v60 }
 0x753   : > { %v4682_v13 = vpop.permute.xlu1 %4681  ;;  %v4757_v22 = vsel %vm289_vm0, %v4756_v56, %v4565_v18  ;;  %v4582_v15 = vpop.permute.xlu0 %4581 }
 0x754   : > { %v4766_v49 = vsel %vm4755_vm11, %v4765_v59, %v4682_v13  ;;  %v4759_v52 = vsel %vm4758_vm13, %v4757_v22, %v4582_v15 }
 0x755   : > { %v4767_v5 = vsel %vm289_vm0, %v4766_v49, %v4699_v42  ;;  %v4761_v29 = vsel %vm4760_vm14, %v4759_v52, %v4599_v7 }
 0x756   : > { %v4768_v51 = vsel %vm4758_vm13, %v4767_v5, %v4716_v25 }
 0x757   : > { %v5019_v6 = vpop.permute.xlu1 %5018  ;;  %v4616_v17 = vpop.permute.xlu0 %4615  ;;  %v4769_v24 = vsel %vm4760_vm14, %v4768_v51, %v4733_v11 }
 0x758   : > { %v4763_v16 = vsel %vm4762_vm15, %v4761_v29, %v4616_v17 }
 0x759   : > { %5069 = vst [vmem:[%s8559_s27] sm:$0xff] %v4763_v16 }
 0x75b   : > { %v4750_v54 = vpop.permute.xlu1 %4749  ;;  %v4851_v12 = vpop.permute.xlu0 %4850 }
 0x75c   : > { %v4770_v23 = vsel %vm4762_vm15, %v4769_v24, %v4750_v54 }
 0x75d   : > { %5070 = vst [vmem:[%s8559_s27 + $0x8] sm:$0xff] %v4770_v23 }
 0x75f   : > { %v4817_v9 = vpop.permute.xlu1 %4816  ;;  %v4885_v27 = vpop.permute.xlu0 %4884 }
 0x760   : > { %v5055_v37 = vsel %vm2204_vm3, %v8482_v43, %v4817_v9 }
 0x761   : > { %v5056_v30 = vsel %vm4753_vm12, %v5055_v37, %v4834_v63 }
 0x762   : > { %v5057_v2 = vsel %vm4755_vm11, %v5056_v30, %v4851_v12 }
 0x763   : > { %v5058_v44 = vsel %vm289_vm0, %v5057_v2, %v4868_v48  ;;  %v4951_v35 = vpop.permute.xlu1 %4950  ;;  %v4919_v0 = vpop.permute.xlu0 %4918 }
 0x764   : > { %v5059_v47 = vsel %vm4758_vm13, %v5058_v44, %v4885_v27  ;;  %v5062_v46 = vsel %vm2204_vm3, %v8486_v50, %v4951_v35 }
 0x765   : > { %v5060_v4 = vsel %vm4760_vm14, %v5059_v47, %v4902_v14  ;;  %v5063_v45 = vsel %vm4753_vm12, %v5062_v46, %v4968_v41 }
 0x766   : > { %v5061_v10 = vsel %vm4762_vm15, %v5060_v4, %v4919_v0 }
 0x767   : > { %5071 = vst [vmem:[%s8559_s27 + $0x10] sm:$0xff] %v5061_v10  ;;  %v4985_v43 = vpop.permute.xlu1 %4984 }
 0x768   : > { %v5064_v28 = vsel %vm4755_vm11, %v5063_v45, %v4985_v43 }
 0x769   : > { %v5065_v31 = vsel %vm289_vm0, %v5064_v28, %v5002_v32 }
 0x76a   : > { %v5066_v62 = vsel %vm4758_vm13, %v5065_v31, %v5019_v6 }
 0x76b   : > { %v5053_v55 = vpop.permute.xlu1 %5052  ;;  %v5067_v53 = vsel %vm4760_vm14, %v5066_v62, %v5036_v33 }
 0x76c   : > { %v5068_v50 = vsel %vm4762_vm15, %v5067_v53, %v5053_v55 }
 0x76d   : > { %5072 = vst [vmem:[%s8559_s27 + $0x18] sm:$0xff] %v5068_v50 }
 0x76e PF: > { %s16_s20 = sadd.s32 1, %s6125_s20  }
 0x76f   : > { %p13_p5 = scmp.ge.s32.totalorder %s16_s20, 4  }
 0x771   :  { %15 = sbr.rel (!%p13_p5) target bundleno = 2 (0x2), region = 70 }

</bundles_post_ra>
